<compile_context>
chip_gen: v7x
topology: tpu7x:2x2x1
jax: 0.10.0
libtpu: 0.0.40
codegen_flags: <defaults>
</compile_context>

<pallas_src>
import math

import jax
import jax.numpy as jnp
from jax.experimental import pallas as pl
from jax.experimental.pallas import tpu as pltpu

# ---- model hyper-parameters (small, consistent with the module) -----------------
B, S, D = 2, 16, 128          # batch, sequence, d_model (layer.size == D)
H = 4                         # attention heads
DK = D // H                   # per-head dim
DFF = 256                     # feed-forward hidden dim
N_LAYERS = 2                  # Encoder stack depth N
EPS = 1e-6
DISPLAY_SHAPE = False         # module prints x.size() when True; disabled for clean output


def _layernorm(x, g, b):
    # Annotated-Transformer LayerNorm: g * (x - mean) / (std + eps) + b
    # torch.Tensor.std defaults to the unbiased estimator (ddof = 1).
    mean = jnp.mean(x, axis=-1, keepdims=True)
    var = jnp.sum((x - mean) ** 2, axis=-1, keepdims=True) / (x.shape[-1] - 1)
    std = jnp.sqrt(var)
    return g * (x - mean) / (std + EPS) + b


# ---------------------------- fused Pallas kernel ----------------------------------
def encoder_kernel(x_ref, mask_ref,
                   wqkv_ref, bqkv_ref, wo_ref, w1_ref, w2_ref, b1_ref,
                   vecd_ref, normgb_ref,
                   o_ref):
    """Full encoder stack (all layers + final LN) for one batch element (grid=(B,))."""
    x = x_ref[0]                          # (S, D)
    mask = mask_ref[0]                    # (1, S)
    masked = (mask == 0.0)[None]          # (1, 1, S) -> broadcasts over (H, S, S); hoisted
    scale = 1.0 / math.sqrt(DK)

    for l in range(N_LAYERS):             # static unroll: whole stack fused, x stays in VMEM
        vd = vecd_ref[l]                  # (6, D): [ln1_g, ln1_b, ln2_g, ln2_b, bo, b2]
        ln1_g, ln1_b = vd[0:1], vd[1:2]
        ln2_g, ln2_b = vd[2:3], vd[3:4]
        bo, b2 = vd[4:5], vd[5:6]

        # ---- sublayer 1: x + self_attn(LN(x), LN(x), LN(x), mask) ----
        xn = _layernorm(x, ln1_g, ln1_b)
        # fused QKV projection: one (S,D) x (D,3D) GEMM
        qkv = jnp.dot(xn, wqkv_ref[l], preferred_element_type=jnp.float32) + bqkv_ref[l]

        # head-batched attention: (H, S, DK) tensors, batched contractions over H
        qh = jnp.stack([qkv[:, h * DK:(h + 1) * DK] for h in range(H)], axis=0)
        kh = jnp.stack([qkv[:, D + h * DK:D + (h + 1) * DK] for h in range(H)], axis=0)
        vh = jnp.stack([qkv[:, 2 * D + h * DK:2 * D + (h + 1) * DK] for h in range(H)], axis=0)

        scores = jnp.einsum('hqd,hkd->hqk', qh, kh,
                            preferred_element_type=jnp.float32) * scale      # (H, S, S)
        scores = jnp.where(masked, -1e9, scores)
        m = jnp.max(scores, axis=-1, keepdims=True)
        e = jnp.exp(scores - m)
        p = e / jnp.sum(e, axis=-1, keepdims=True)
        ctx = jnp.einsum('hqk,hkd->hqd', p, vh,
                         preferred_element_type=jnp.float32)                 # (H, S, DK)
        attn = jnp.concatenate([ctx[h] for h in range(H)], axis=-1)          # (S, D)
        x = x + jnp.dot(attn, wo_ref[l], preferred_element_type=jnp.float32) + bo

        # ---- sublayer 2: x + FFN(LN(x)) ----
        xn = _layernorm(x, ln2_g, ln2_b)
        hdn = jnp.maximum(
            jnp.dot(xn, w1_ref[l], preferred_element_type=jnp.float32) + b1_ref[l], 0.0)
        x = x + jnp.dot(hdn, w2_ref[l], preferred_element_type=jnp.float32) + b2

    # ---- final LayerNorm (fused into the same kernel) ----
    ngb = normgb_ref[...]                 # (2, D)
    o_ref[0] = _layernorm(x, ngb[0:1], ngb[1:2])


# ---------------------------- wrapper -----------------------------------------------
def _full_spec(shape):
    nd = len(shape)
    return pl.BlockSpec(shape, lambda b, _nd=nd: (0,) * _nd)


_WEIGHT_KEYS = ["wqkv", "bqkv", "wo", "w1", "w2", "b1", "vec_d", "norm_gb"]


def encoder_forward(x, mask, params):
    """Encoder.forward: all layers + final LayerNorm in one fused pallas_call."""
    weights = [params[k] for k in _WEIGHT_KEYS]
    in_specs = [pl.BlockSpec((1, S, D), lambda b: (b, 0, 0)),
                pl.BlockSpec((1, 1, S), lambda b: (b, 0, 0))]
    in_specs += [_full_spec(w.shape) for w in weights]
    out = pl.pallas_call(
        encoder_kernel,
        out_shape=jax.ShapeDtypeStruct((B, S, D), jnp.float32),
        grid_spec=pltpu.PrefetchScalarGridSpec(
            num_scalar_prefetch=0,
            grid=(B,),
            in_specs=in_specs,
            out_specs=pl.BlockSpec((1, S, D), lambda b: (b, 0, 0)),
        ),
        compiler_params=pltpu.CompilerParams(dimension_semantics=("parallel",)),
    )(x, mask, *weights)
    if DISPLAY_SHAPE:
        print("shape after whole encoder: ", out.shape)
    return out


# ---------------------------- parameter init ---------------------------------------
def init_params(key):
    def randn(k, shape):
        return jax.random.normal(k, shape, jnp.float32) * 0.02

    keys = jax.random.split(key, N_LAYERS)
    wqkv, bqkv, wo, w1, w2, b1, vec_d = [], [], [], [], [], [], []
    ones_d = jnp.ones((D,), jnp.float32)
    zeros_d = jnp.zeros((D,), jnp.float32)
    for i in range(N_LAYERS):
        ks = jax.random.split(keys[i], 12)
        wq, bq = randn(ks[0], (D, D)), randn(ks[1], (D,))
        wk, bk = randn(ks[2], (D, D)), randn(ks[3], (D,))
        wv, bv = randn(ks[4], (D, D)), randn(ks[5], (D,))
        wo_i, bo_i = randn(ks[6], (D, D)), randn(ks[7], (D,))
        w1_i, b1_i = randn(ks[8], (D, DFF)), randn(ks[9], (DFF,))
        w2_i, b2_i = randn(ks[10], (DFF, D)), randn(ks[11], (D,))
        wqkv.append(jnp.concatenate([wq, wk, wv], axis=1))          # (D, 3D)
        bqkv.append(jnp.concatenate([bq, bk, bv])[None, :])         # (1, 3D)
        wo.append(wo_i)
        w1.append(w1_i)
        b1.append(b1_i[None, :])                                    # (1, DFF)
        w2.append(w2_i)
        # pack all per-layer D-length vectors: ln1_g, ln1_b, ln2_g, ln2_b, bo, b2
        vec_d.append(jnp.stack([ones_d, zeros_d, ones_d, zeros_d, bo_i, b2_i], axis=0))
    return dict(
        wqkv=jnp.stack(wqkv),       # (N, D, 3D)
        bqkv=jnp.stack(bqkv),       # (N, 1, 3D)
        wo=jnp.stack(wo),           # (N, D, D)
        w1=jnp.stack(w1),           # (N, D, DFF)
        b1=jnp.stack(b1),           # (N, 1, DFF)
        w2=jnp.stack(w2),           # (N, DFF, D)
        vec_d=jnp.stack(vec_d),     # (N, 6, D)
        norm_gb=jnp.stack([ones_d, zeros_d]),  # (2, D): final LN gain, bias
    )


# ---------------------------- pure-JAX reference (for validation) -------------------
def _ref_encoder(x, mask, p):
    def ln(x, g, b):
        mean = jnp.mean(x, axis=-1, keepdims=True)
        var = jnp.sum((x - mean) ** 2, axis=-1, keepdims=True) / (x.shape[-1] - 1)
        return g * (x - mean) / (jnp.sqrt(var) + EPS) + b

    for l in range(N_LAYERS):
        vd = p["vec_d"][l]
        ln1_g, ln1_b = vd[0], vd[1]
        ln2_g, ln2_b = vd[2], vd[3]
        bo, b2 = vd[4], vd[5]

        xn = ln(x, ln1_g, ln1_b)
        qkv = xn @ p["wqkv"][l] + p["bqkv"][l]
        q, k, v = qkv[..., :D], qkv[..., D:2 * D], qkv[..., 2 * D:]
        qh = q.reshape(B, S, H, DK).transpose(0, 2, 1, 3)
        kh = k.reshape(B, S, H, DK).transpose(0, 2, 1, 3)
        vh = v.reshape(B, S, H, DK).transpose(0, 2, 1, 3)
        scores = jnp.einsum("bhqd,bhkd->bhqk", qh, kh) / math.sqrt(DK)
        scores = jnp.where(mask[:, :, None, :] == 0, -1e9, scores)
        pattn = jax.nn.softmax(scores, axis=-1)
        attn = jnp.einsum("bhqk,bhkd->bhqd", pattn, vh)
        attn = attn.transpose(0, 2, 1, 3).reshape(B, S, D)
        x = x + (attn @ p["wo"][l] + bo)
        xn = ln(x, ln2_g, ln2_b)
        x = x + (jnp.maximum(xn @ p["w1"][l] + p["b1"][l], 0.0) @ p["w2"][l] + b2)
    return ln(x, p["norm_gb"][0], p["norm_gb"][1])


if __name__ == "__main__":
    key = jax.random.PRNGKey(0)
    kx, kp = jax.random.split(key)
    x = jax.random.normal(kx, (B, S, D), jnp.float32)
    # mask (B, 1, S): 1 = attend, 0 = masked.  Mask the last 4 keys of batch element 1.
    mask = jnp.ones((B, 1, S), jnp.float32).at[1, 0, S - 4:].set(0.0)
    params = init_params(kp)

    out = encoder_forward(x, mask, params)
    out = jax.block_until_ready(out)

    ref = _ref_encoder(x, mask, params)
    assert out.shape == (B, S, D) and out.dtype == jnp.float32
    assert jnp.allclose(out, ref, atol=1e-4, rtol=1e-4), "Pallas output mismatch vs JAX reference"

    print("KERNEL_OK")
</pallas_src>

<mosaic_0001>
module attributes {stable_mosaic.version = 11 : i64} {
  func.func @encoder_kernel(%arg0: i32, %arg1: memref<1x16x128xf32, #tpu.memory_space<vmem>>, %arg2: memref<1x1x16xf32, #tpu.memory_space<vmem>>, %arg3: memref<2x128x384xf32, #tpu.memory_space<vmem>>, %arg4: memref<2x1x384xf32, #tpu.memory_space<vmem>>, %arg5: memref<2x128x128xf32, #tpu.memory_space<vmem>>, %arg6: memref<2x128x256xf32, #tpu.memory_space<vmem>>, %arg7: memref<2x256x128xf32, #tpu.memory_space<vmem>>, %arg8: memref<2x1x256xf32, #tpu.memory_space<vmem>>, %arg9: memref<2x6x128xf32, #tpu.memory_space<vmem>>, %arg10: memref<2x128xf32, #tpu.memory_space<vmem>>, %arg11: memref<1x16x128xf32, #tpu.memory_space<vmem>>) attributes {dimension_semantics = [#tpu.dimension_semantics<parallel>], iteration_bounds = array<i64: 2>, scalar_prefetch = 0 : i64, scratch_operands = 0 : i64, tpu.core_type = #tpu.core_type<tc>, window_params = [{transform_indices = @transform_0, window_bounds = array<i64: 1, 16, 128>}, {transform_indices = @transform_1, window_bounds = array<i64: 1, 1, 16>}, {pipeline_mode = #tpu.pipeline_mode<synchronous>, transform_indices = @transform_2, window_bounds = array<i64: 2, 128, 384>}, {pipeline_mode = #tpu.pipeline_mode<synchronous>, transform_indices = @transform_3, window_bounds = array<i64: 2, 1, 384>}, {pipeline_mode = #tpu.pipeline_mode<synchronous>, transform_indices = @transform_4, window_bounds = array<i64: 2, 128, 128>}, {pipeline_mode = #tpu.pipeline_mode<synchronous>, transform_indices = @transform_5, window_bounds = array<i64: 2, 128, 256>}, {pipeline_mode = #tpu.pipeline_mode<synchronous>, transform_indices = @transform_6, window_bounds = array<i64: 2, 256, 128>}, {pipeline_mode = #tpu.pipeline_mode<synchronous>, transform_indices = @transform_7, window_bounds = array<i64: 2, 1, 256>}, {pipeline_mode = #tpu.pipeline_mode<synchronous>, transform_indices = @transform_8, window_bounds = array<i64: 2, 6, 128>}, {pipeline_mode = #tpu.pipeline_mode<synchronous>, transform_indices = @transform_9, window_bounds = array<i64: 2, 128>}, {transform_indices = @transform_10, window_bounds = array<i64: 1, 16, 128>}]} {
    %c0 = arith.constant 0 : index
    %c0_0 = arith.constant 0 : index
    %c0_1 = arith.constant 0 : index
    %0 = vector.load %arg1[%c0, %c0_0, %c0_1] : memref<1x16x128xf32, #tpu.memory_space<vmem>>, vector<1x16x128xf32>
    %1 = vector.shape_cast %0 : vector<1x16x128xf32> to vector<16x128xf32>
    %c0_2 = arith.constant 0 : index
    %c0_3 = arith.constant 0 : index
    %c0_4 = arith.constant 0 : index
    %2 = vector.load %arg2[%c0_2, %c0_3, %c0_4] : memref<1x1x16xf32, #tpu.memory_space<vmem>>, vector<1x1x16xf32>
    %3 = vector.shape_cast %2 : vector<1x1x16xf32> to vector<1x16xf32>
    %cst = arith.constant 0.000000e+00 : f32
    %4 = vector.broadcast %cst : f32 to vector<1x16xf32>
    %5 = arith.cmpf oeq, %3, %4 : vector<1x16xf32>
    %6 = vector.shape_cast %5 : vector<1x16xi1> to vector<1x1x16xi1>
    %c0_5 = arith.constant 0 : index
    %c0_6 = arith.constant 0 : index
    %c0_7 = arith.constant 0 : index
    %7 = vector.load %arg9[%c0_5, %c0_6, %c0_7] : memref<2x6x128xf32, #tpu.memory_space<vmem>>, vector<1x6x128xf32>
    %8 = vector.shape_cast %7 : vector<1x6x128xf32> to vector<6x128xf32>
    %9 = vector.extract_strided_slice %8 {offsets = [0, 0], sizes = [1, 128], strides = [1, 1]} : vector<6x128xf32> to vector<1x128xf32>
    %10 = vector.extract_strided_slice %8 {offsets = [1, 0], sizes = [1, 128], strides = [1, 1]} : vector<6x128xf32> to vector<1x128xf32>
    %11 = vector.extract_strided_slice %8 {offsets = [2, 0], sizes = [1, 128], strides = [1, 1]} : vector<6x128xf32> to vector<1x128xf32>
    %12 = vector.extract_strided_slice %8 {offsets = [3, 0], sizes = [1, 128], strides = [1, 1]} : vector<6x128xf32> to vector<1x128xf32>
    %13 = vector.extract_strided_slice %8 {offsets = [4, 0], sizes = [1, 128], strides = [1, 1]} : vector<6x128xf32> to vector<1x128xf32>
    %14 = vector.extract_strided_slice %8 {offsets = [5, 0], sizes = [1, 128], strides = [1, 1]} : vector<6x128xf32> to vector<1x128xf32>
    %cst_8 = arith.constant dense<0.000000e+00> : vector<16xf32>
    %15 = vector.multi_reduction <add>, %1, %cst_8 [1] : vector<16x128xf32> to vector<16xf32>
    %16 = vector.shape_cast %15 : vector<16xf32> to vector<16x1xf32>
    %cst_9 = arith.constant 1.280000e+02 : f32
    %17 = vector.broadcast %cst_9 : f32 to vector<16x1xf32>
    %18 = arith.divf %16, %17 : vector<16x1xf32>
    %19 = vector.broadcast %18 : vector<16x1xf32> to vector<16x128xf32>
    %20 = arith.subf %1, %19 : vector<16x128xf32>
    %21 = arith.mulf %20, %20 : vector<16x128xf32>
    %cst_10 = arith.constant dense<0.000000e+00> : vector<16xf32>
    %22 = vector.multi_reduction <add>, %21, %cst_10 [1] : vector<16x128xf32> to vector<16xf32>
    %23 = vector.shape_cast %22 : vector<16xf32> to vector<16x1xf32>
    %cst_11 = arith.constant 1.270000e+02 : f32
    %24 = vector.broadcast %cst_11 : f32 to vector<16x1xf32>
    %25 = arith.divf %23, %24 : vector<16x1xf32>
    %26 = math.sqrt %25 : vector<16x1xf32>
    %27 = vector.broadcast %18 : vector<16x1xf32> to vector<16x128xf32>
    %28 = arith.subf %1, %27 : vector<16x128xf32>
    %29 = vector.broadcast %9 : vector<1x128xf32> to vector<16x128xf32>
    %30 = arith.mulf %29, %28 : vector<16x128xf32>
    %cst_12 = arith.constant 9.99999997E-7 : f32
    %31 = vector.broadcast %cst_12 : f32 to vector<16x1xf32>
    %32 = arith.addf %26, %31 : vector<16x1xf32>
    %33 = vector.broadcast %32 : vector<16x1xf32> to vector<16x128xf32>
    %34 = arith.divf %30, %33 : vector<16x128xf32>
    %35 = vector.broadcast %10 : vector<1x128xf32> to vector<16x128xf32>
    %36 = arith.addf %34, %35 : vector<16x128xf32>
    %c0_13 = arith.constant 0 : index
    %c0_14 = arith.constant 0 : index
    %c0_15 = arith.constant 0 : index
    %37 = vector.load %arg3[%c0_13, %c0_14, %c0_15] : memref<2x128x384xf32, #tpu.memory_space<vmem>>, vector<1x128x384xf32>
    %38 = vector.shape_cast %37 : vector<1x128x384xf32> to vector<128x384xf32>
    %cst_16 = arith.constant dense<0.000000e+00> : vector<16x384xf32>
    %39 = tpu.matmul %36, %38, %cst_16 {dimension_numbers = #tpu.dot_dimension_numbers<[1], [0], [0], [1], [0, 0, 1, 1], [], []>} : vector<16x128xf32>, vector<128x384xf32>, vector<16x384xf32> -> vector<16x384xf32>
    %c0_17 = arith.constant 0 : index
    %c0_18 = arith.constant 0 : index
    %c0_19 = arith.constant 0 : index
    %40 = vector.load %arg4[%c0_17, %c0_18, %c0_19] : memref<2x1x384xf32, #tpu.memory_space<vmem>>, vector<1x1x384xf32>
    %41 = vector.shape_cast %40 : vector<1x1x384xf32> to vector<1x384xf32>
    %42 = vector.broadcast %41 : vector<1x384xf32> to vector<16x384xf32>
    %43 = arith.addf %39, %42 : vector<16x384xf32>
    %44 = vector.extract_strided_slice %43 {offsets = [0, 0], sizes = [16, 32], strides = [1, 1]} : vector<16x384xf32> to vector<16x32xf32>
    %45 = vector.extract_strided_slice %43 {offsets = [0, 32], sizes = [16, 32], strides = [1, 1]} : vector<16x384xf32> to vector<16x32xf32>
    %46 = vector.extract_strided_slice %43 {offsets = [0, 64], sizes = [16, 32], strides = [1, 1]} : vector<16x384xf32> to vector<16x32xf32>
    %47 = vector.extract_strided_slice %43 {offsets = [0, 96], sizes = [16, 32], strides = [1, 1]} : vector<16x384xf32> to vector<16x32xf32>
    %48 = vector.shape_cast %44 : vector<16x32xf32> to vector<1x16x32xf32>
    %49 = vector.shape_cast %45 : vector<16x32xf32> to vector<1x16x32xf32>
    %50 = vector.shape_cast %46 : vector<16x32xf32> to vector<1x16x32xf32>
    %51 = vector.shape_cast %47 : vector<16x32xf32> to vector<1x16x32xf32>
    %52 = tpu.concatenate %48, %49, %50, %51 in 0 : vector<1x16x32xf32>, vector<1x16x32xf32>, vector<1x16x32xf32>, vector<1x16x32xf32> -> vector<4x16x32xf32>
    %53 = vector.extract_strided_slice %43 {offsets = [0, 128], sizes = [16, 32], strides = [1, 1]} : vector<16x384xf32> to vector<16x32xf32>
    %54 = vector.extract_strided_slice %43 {offsets = [0, 160], sizes = [16, 32], strides = [1, 1]} : vector<16x384xf32> to vector<16x32xf32>
    %55 = vector.extract_strided_slice %43 {offsets = [0, 192], sizes = [16, 32], strides = [1, 1]} : vector<16x384xf32> to vector<16x32xf32>
    %56 = vector.extract_strided_slice %43 {offsets = [0, 224], sizes = [16, 32], strides = [1, 1]} : vector<16x384xf32> to vector<16x32xf32>
    %57 = vector.shape_cast %53 : vector<16x32xf32> to vector<1x16x32xf32>
    %58 = vector.shape_cast %54 : vector<16x32xf32> to vector<1x16x32xf32>
    %59 = vector.shape_cast %55 : vector<16x32xf32> to vector<1x16x32xf32>
    %60 = vector.shape_cast %56 : vector<16x32xf32> to vector<1x16x32xf32>
    %61 = tpu.concatenate %57, %58, %59, %60 in 0 : vector<1x16x32xf32>, vector<1x16x32xf32>, vector<1x16x32xf32>, vector<1x16x32xf32> -> vector<4x16x32xf32>
    %62 = vector.extract_strided_slice %43 {offsets = [0, 256], sizes = [16, 32], strides = [1, 1]} : vector<16x384xf32> to vector<16x32xf32>
    %63 = vector.extract_strided_slice %43 {offsets = [0, 288], sizes = [16, 32], strides = [1, 1]} : vector<16x384xf32> to vector<16x32xf32>
    %64 = vector.extract_strided_slice %43 {offsets = [0, 320], sizes = [16, 32], strides = [1, 1]} : vector<16x384xf32> to vector<16x32xf32>
    %65 = vector.extract_strided_slice %43 {offsets = [0, 352], sizes = [16, 32], strides = [1, 1]} : vector<16x384xf32> to vector<16x32xf32>
    %66 = vector.shape_cast %62 : vector<16x32xf32> to vector<1x16x32xf32>
    %67 = vector.shape_cast %63 : vector<16x32xf32> to vector<1x16x32xf32>
    %68 = vector.shape_cast %64 : vector<16x32xf32> to vector<1x16x32xf32>
    %69 = vector.shape_cast %65 : vector<16x32xf32> to vector<1x16x32xf32>
    %70 = tpu.concatenate %66, %67, %68, %69 in 0 : vector<1x16x32xf32>, vector<1x16x32xf32>, vector<1x16x32xf32>, vector<1x16x32xf32> -> vector<4x16x32xf32>
    "tpu.trace_start"() <{level = 10 : i32, message = "hqd,hkd->hqk"}> : () -> ()
    %cst_20 = arith.constant dense<0.000000e+00> : vector<4x16x16xf32>
    %71 = tpu.matmul %52, %61, %cst_20 {dimension_numbers = #tpu.dot_dimension_numbers<[2], [2], [1], [1], [0, 0, 0, 1, 1, 1], [0], [0]>} : vector<4x16x32xf32>, vector<4x16x32xf32>, vector<4x16x16xf32> -> vector<4x16x16xf32>
    "tpu.trace_stop"() : () -> ()
    %cst_21 = arith.constant 0.176776692 : f32
    %72 = vector.broadcast %cst_21 : f32 to vector<4x16x16xf32>
    %73 = arith.mulf %71, %72 : vector<4x16x16xf32>
    %cst_22 = arith.constant -1.000000e+09 : f32
    %74 = vector.shape_cast %6 : vector<1x1x16xi1> to vector<1x1x16xi1>
    %75 = vector.broadcast %74 : vector<1x1x16xi1> to vector<4x16x16xi1>
    %76 = vector.broadcast %cst_22 : f32 to vector<4x16x16xf32>
    %77 = arith.select %75, %76, %73 : vector<4x16x16xi1>, vector<4x16x16xf32>
    %cst_23 = arith.constant dense<0xFF800000> : vector<4x16xf32>
    %78 = vector.multi_reduction <maximumf>, %77, %cst_23 [2] : vector<4x16x16xf32> to vector<4x16xf32>
    %79 = vector.shape_cast %78 : vector<4x16xf32> to vector<4x16x1xf32>
    %80 = vector.broadcast %79 : vector<4x16x1xf32> to vector<4x16x16xf32>
    %81 = arith.subf %77, %80 : vector<4x16x16xf32>
    %82 = math.exp %81 : vector<4x16x16xf32>
    %cst_24 = arith.constant dense<0.000000e+00> : vector<4x16xf32>
    %83 = vector.multi_reduction <add>, %82, %cst_24 [2] : vector<4x16x16xf32> to vector<4x16xf32>
    %84 = vector.shape_cast %83 : vector<4x16xf32> to vector<4x16x1xf32>
    %85 = vector.broadcast %84 : vector<4x16x1xf32> to vector<4x16x16xf32>
    %86 = arith.divf %82, %85 : vector<4x16x16xf32>
    "tpu.trace_start"() <{level = 10 : i32, message = "hqk,hkd->hqd"}> : () -> ()
    %cst_25 = arith.constant dense<0.000000e+00> : vector<4x16x32xf32>
    %87 = tpu.matmul %86, %70, %cst_25 {dimension_numbers = #tpu.dot_dimension_numbers<[2], [1], [1], [2], [0, 0, 0, 1, 1, 2], [0], [0]>} : vector<4x16x16xf32>, vector<4x16x32xf32>, vector<4x16x32xf32> -> vector<4x16x32xf32>
    "tpu.trace_stop"() : () -> ()
    %88 = vector.extract_strided_slice %87 {offsets = [0, 0, 0], sizes = [1, 16, 32], strides = [1, 1, 1]} : vector<4x16x32xf32> to vector<1x16x32xf32>
    %89 = vector.shape_cast %88 : vector<1x16x32xf32> to vector<16x32xf32>
    %90 = vector.extract_strided_slice %87 {offsets = [1, 0, 0], sizes = [1, 16, 32], strides = [1, 1, 1]} : vector<4x16x32xf32> to vector<1x16x32xf32>
    %91 = vector.shape_cast %90 : vector<1x16x32xf32> to vector<16x32xf32>
    %92 = vector.extract_strided_slice %87 {offsets = [2, 0, 0], sizes = [1, 16, 32], strides = [1, 1, 1]} : vector<4x16x32xf32> to vector<1x16x32xf32>
    %93 = vector.shape_cast %92 : vector<1x16x32xf32> to vector<16x32xf32>
    %94 = vector.extract_strided_slice %87 {offsets = [3, 0, 0], sizes = [1, 16, 32], strides = [1, 1, 1]} : vector<4x16x32xf32> to vector<1x16x32xf32>
    %95 = vector.shape_cast %94 : vector<1x16x32xf32> to vector<16x32xf32>
    %96 = tpu.concatenate %89, %91, %93, %95 in 1 : vector<16x32xf32>, vector<16x32xf32>, vector<16x32xf32>, vector<16x32xf32> -> vector<16x128xf32>
    %c0_26 = arith.constant 0 : index
    %c0_27 = arith.constant 0 : index
    %c0_28 = arith.constant 0 : index
    %97 = vector.load %arg5[%c0_26, %c0_27, %c0_28] : memref<2x128x128xf32, #tpu.memory_space<vmem>>, vector<1x128x128xf32>
    %98 = vector.shape_cast %97 : vector<1x128x128xf32> to vector<128x128xf32>
    %cst_29 = arith.constant dense<0.000000e+00> : vector<16x128xf32>
    %99 = tpu.matmul %96, %98, %cst_29 {dimension_numbers = #tpu.dot_dimension_numbers<[1], [0], [0], [1], [0, 0, 1, 1], [], []>} : vector<16x128xf32>, vector<128x128xf32>, vector<16x128xf32> -> vector<16x128xf32>
    %100 = arith.addf %1, %99 : vector<16x128xf32>
    %101 = vector.broadcast %13 : vector<1x128xf32> to vector<16x128xf32>
    %102 = arith.addf %100, %101 : vector<16x128xf32>
    %cst_30 = arith.constant dense<0.000000e+00> : vector<16xf32>
    %103 = vector.multi_reduction <add>, %102, %cst_30 [1] : vector<16x128xf32> to vector<16xf32>
    %104 = vector.shape_cast %103 : vector<16xf32> to vector<16x1xf32>
    %cst_31 = arith.constant 1.280000e+02 : f32
    %105 = vector.broadcast %cst_31 : f32 to vector<16x1xf32>
    %106 = arith.divf %104, %105 : vector<16x1xf32>
    %107 = vector.broadcast %106 : vector<16x1xf32> to vector<16x128xf32>
    %108 = arith.subf %102, %107 : vector<16x128xf32>
    %109 = arith.mulf %108, %108 : vector<16x128xf32>
    %cst_32 = arith.constant dense<0.000000e+00> : vector<16xf32>
    %110 = vector.multi_reduction <add>, %109, %cst_32 [1] : vector<16x128xf32> to vector<16xf32>
    %111 = vector.shape_cast %110 : vector<16xf32> to vector<16x1xf32>
    %cst_33 = arith.constant 1.270000e+02 : f32
    %112 = vector.broadcast %cst_33 : f32 to vector<16x1xf32>
    %113 = arith.divf %111, %112 : vector<16x1xf32>
    %114 = math.sqrt %113 : vector<16x1xf32>
    %115 = vector.broadcast %106 : vector<16x1xf32> to vector<16x128xf32>
    %116 = arith.subf %102, %115 : vector<16x128xf32>
    %117 = vector.broadcast %11 : vector<1x128xf32> to vector<16x128xf32>
    %118 = arith.mulf %117, %116 : vector<16x128xf32>
    %cst_34 = arith.constant 9.99999997E-7 : f32
    %119 = vector.broadcast %cst_34 : f32 to vector<16x1xf32>
    %120 = arith.addf %114, %119 : vector<16x1xf32>
    %121 = vector.broadcast %120 : vector<16x1xf32> to vector<16x128xf32>
    %122 = arith.divf %118, %121 : vector<16x128xf32>
    %123 = vector.broadcast %12 : vector<1x128xf32> to vector<16x128xf32>
    %124 = arith.addf %122, %123 : vector<16x128xf32>
    %c0_35 = arith.constant 0 : index
    %c0_36 = arith.constant 0 : index
    %c0_37 = arith.constant 0 : index
    %125 = vector.load %arg6[%c0_35, %c0_36, %c0_37] : memref<2x128x256xf32, #tpu.memory_space<vmem>>, vector<1x128x256xf32>
    %126 = vector.shape_cast %125 : vector<1x128x256xf32> to vector<128x256xf32>
    %cst_38 = arith.constant dense<0.000000e+00> : vector<16x256xf32>
    %127 = tpu.matmul %124, %126, %cst_38 {dimension_numbers = #tpu.dot_dimension_numbers<[1], [0], [0], [1], [0, 0, 1, 1], [], []>} : vector<16x128xf32>, vector<128x256xf32>, vector<16x256xf32> -> vector<16x256xf32>
    %c0_39 = arith.constant 0 : index
    %c0_40 = arith.constant 0 : index
    %c0_41 = arith.constant 0 : index
    %128 = vector.load %arg8[%c0_39, %c0_40, %c0_41] : memref<2x1x256xf32, #tpu.memory_space<vmem>>, vector<1x1x256xf32>
    %129 = vector.shape_cast %128 : vector<1x1x256xf32> to vector<1x256xf32>
    %130 = vector.broadcast %129 : vector<1x256xf32> to vector<16x256xf32>
    %131 = arith.addf %127, %130 : vector<16x256xf32>
    %cst_42 = arith.constant 0.000000e+00 : f32
    %132 = vector.broadcast %cst_42 : f32 to vector<16x256xf32>
    %133 = arith.maximumf %131, %132 : vector<16x256xf32>
    %c0_43 = arith.constant 0 : index
    %c0_44 = arith.constant 0 : index
    %c0_45 = arith.constant 0 : index
    %134 = vector.load %arg7[%c0_43, %c0_44, %c0_45] : memref<2x256x128xf32, #tpu.memory_space<vmem>>, vector<1x256x128xf32>
    %135 = vector.shape_cast %134 : vector<1x256x128xf32> to vector<256x128xf32>
    %cst_46 = arith.constant dense<0.000000e+00> : vector<16x128xf32>
    %136 = tpu.matmul %133, %135, %cst_46 {dimension_numbers = #tpu.dot_dimension_numbers<[1], [0], [0], [1], [0, 0, 1, 1], [], []>} : vector<16x256xf32>, vector<256x128xf32>, vector<16x128xf32> -> vector<16x128xf32>
    %137 = arith.addf %102, %136 : vector<16x128xf32>
    %138 = vector.broadcast %14 : vector<1x128xf32> to vector<16x128xf32>
    %139 = arith.addf %137, %138 : vector<16x128xf32>
    %c1 = arith.constant 1 : index
    %c0_47 = arith.constant 0 : index
    %c0_48 = arith.constant 0 : index
    %140 = vector.load %arg9[%c1, %c0_47, %c0_48] : memref<2x6x128xf32, #tpu.memory_space<vmem>>, vector<1x6x128xf32>
    %141 = vector.shape_cast %140 : vector<1x6x128xf32> to vector<6x128xf32>
    %142 = vector.extract_strided_slice %141 {offsets = [0, 0], sizes = [1, 128], strides = [1, 1]} : vector<6x128xf32> to vector<1x128xf32>
    %143 = vector.extract_strided_slice %141 {offsets = [1, 0], sizes = [1, 128], strides = [1, 1]} : vector<6x128xf32> to vector<1x128xf32>
    %144 = vector.extract_strided_slice %141 {offsets = [2, 0], sizes = [1, 128], strides = [1, 1]} : vector<6x128xf32> to vector<1x128xf32>
    %145 = vector.extract_strided_slice %141 {offsets = [3, 0], sizes = [1, 128], strides = [1, 1]} : vector<6x128xf32> to vector<1x128xf32>
    %146 = vector.extract_strided_slice %141 {offsets = [4, 0], sizes = [1, 128], strides = [1, 1]} : vector<6x128xf32> to vector<1x128xf32>
    %147 = vector.extract_strided_slice %141 {offsets = [5, 0], sizes = [1, 128], strides = [1, 1]} : vector<6x128xf32> to vector<1x128xf32>
    %cst_49 = arith.constant dense<0.000000e+00> : vector<16xf32>
    %148 = vector.multi_reduction <add>, %139, %cst_49 [1] : vector<16x128xf32> to vector<16xf32>
    %149 = vector.shape_cast %148 : vector<16xf32> to vector<16x1xf32>
    %cst_50 = arith.constant 1.280000e+02 : f32
    %150 = vector.broadcast %cst_50 : f32 to vector<16x1xf32>
    %151 = arith.divf %149, %150 : vector<16x1xf32>
    %152 = vector.broadcast %151 : vector<16x1xf32> to vector<16x128xf32>
    %153 = arith.subf %139, %152 : vector<16x128xf32>
    %154 = arith.mulf %153, %153 : vector<16x128xf32>
    %cst_51 = arith.constant dense<0.000000e+00> : vector<16xf32>
    %155 = vector.multi_reduction <add>, %154, %cst_51 [1] : vector<16x128xf32> to vector<16xf32>
    %156 = vector.shape_cast %155 : vector<16xf32> to vector<16x1xf32>
    %cst_52 = arith.constant 1.270000e+02 : f32
    %157 = vector.broadcast %cst_52 : f32 to vector<16x1xf32>
    %158 = arith.divf %156, %157 : vector<16x1xf32>
    %159 = math.sqrt %158 : vector<16x1xf32>
    %160 = vector.broadcast %151 : vector<16x1xf32> to vector<16x128xf32>
    %161 = arith.subf %139, %160 : vector<16x128xf32>
    %162 = vector.broadcast %142 : vector<1x128xf32> to vector<16x128xf32>
    %163 = arith.mulf %162, %161 : vector<16x128xf32>
    %cst_53 = arith.constant 9.99999997E-7 : f32
    %164 = vector.broadcast %cst_53 : f32 to vector<16x1xf32>
    %165 = arith.addf %159, %164 : vector<16x1xf32>
    %166 = vector.broadcast %165 : vector<16x1xf32> to vector<16x128xf32>
    %167 = arith.divf %163, %166 : vector<16x128xf32>
    %168 = vector.broadcast %143 : vector<1x128xf32> to vector<16x128xf32>
    %169 = arith.addf %167, %168 : vector<16x128xf32>
    %c1_54 = arith.constant 1 : index
    %c0_55 = arith.constant 0 : index
    %c0_56 = arith.constant 0 : index
    %170 = vector.load %arg3[%c1_54, %c0_55, %c0_56] : memref<2x128x384xf32, #tpu.memory_space<vmem>>, vector<1x128x384xf32>
    %171 = vector.shape_cast %170 : vector<1x128x384xf32> to vector<128x384xf32>
    %cst_57 = arith.constant dense<0.000000e+00> : vector<16x384xf32>
    %172 = tpu.matmul %169, %171, %cst_57 {dimension_numbers = #tpu.dot_dimension_numbers<[1], [0], [0], [1], [0, 0, 1, 1], [], []>} : vector<16x128xf32>, vector<128x384xf32>, vector<16x384xf32> -> vector<16x384xf32>
    %c1_58 = arith.constant 1 : index
    %c0_59 = arith.constant 0 : index
    %c0_60 = arith.constant 0 : index
    %173 = vector.load %arg4[%c1_58, %c0_59, %c0_60] : memref<2x1x384xf32, #tpu.memory_space<vmem>>, vector<1x1x384xf32>
    %174 = vector.shape_cast %173 : vector<1x1x384xf32> to vector<1x384xf32>
    %175 = vector.broadcast %174 : vector<1x384xf32> to vector<16x384xf32>
    %176 = arith.addf %172, %175 : vector<16x384xf32>
    %177 = vector.extract_strided_slice %176 {offsets = [0, 0], sizes = [16, 32], strides = [1, 1]} : vector<16x384xf32> to vector<16x32xf32>
    %178 = vector.extract_strided_slice %176 {offsets = [0, 32], sizes = [16, 32], strides = [1, 1]} : vector<16x384xf32> to vector<16x32xf32>
    %179 = vector.extract_strided_slice %176 {offsets = [0, 64], sizes = [16, 32], strides = [1, 1]} : vector<16x384xf32> to vector<16x32xf32>
    %180 = vector.extract_strided_slice %176 {offsets = [0, 96], sizes = [16, 32], strides = [1, 1]} : vector<16x384xf32> to vector<16x32xf32>
    %181 = vector.shape_cast %177 : vector<16x32xf32> to vector<1x16x32xf32>
    %182 = vector.shape_cast %178 : vector<16x32xf32> to vector<1x16x32xf32>
    %183 = vector.shape_cast %179 : vector<16x32xf32> to vector<1x16x32xf32>
    %184 = vector.shape_cast %180 : vector<16x32xf32> to vector<1x16x32xf32>
    %185 = tpu.concatenate %181, %182, %183, %184 in 0 : vector<1x16x32xf32>, vector<1x16x32xf32>, vector<1x16x32xf32>, vector<1x16x32xf32> -> vector<4x16x32xf32>
    %186 = vector.extract_strided_slice %176 {offsets = [0, 128], sizes = [16, 32], strides = [1, 1]} : vector<16x384xf32> to vector<16x32xf32>
    %187 = vector.extract_strided_slice %176 {offsets = [0, 160], sizes = [16, 32], strides = [1, 1]} : vector<16x384xf32> to vector<16x32xf32>
    %188 = vector.extract_strided_slice %176 {offsets = [0, 192], sizes = [16, 32], strides = [1, 1]} : vector<16x384xf32> to vector<16x32xf32>
    %189 = vector.extract_strided_slice %176 {offsets = [0, 224], sizes = [16, 32], strides = [1, 1]} : vector<16x384xf32> to vector<16x32xf32>
    %190 = vector.shape_cast %186 : vector<16x32xf32> to vector<1x16x32xf32>
    %191 = vector.shape_cast %187 : vector<16x32xf32> to vector<1x16x32xf32>
    %192 = vector.shape_cast %188 : vector<16x32xf32> to vector<1x16x32xf32>
    %193 = vector.shape_cast %189 : vector<16x32xf32> to vector<1x16x32xf32>
    %194 = tpu.concatenate %190, %191, %192, %193 in 0 : vector<1x16x32xf32>, vector<1x16x32xf32>, vector<1x16x32xf32>, vector<1x16x32xf32> -> vector<4x16x32xf32>
    %195 = vector.extract_strided_slice %176 {offsets = [0, 256], sizes = [16, 32], strides = [1, 1]} : vector<16x384xf32> to vector<16x32xf32>
    %196 = vector.extract_strided_slice %176 {offsets = [0, 288], sizes = [16, 32], strides = [1, 1]} : vector<16x384xf32> to vector<16x32xf32>
    %197 = vector.extract_strided_slice %176 {offsets = [0, 320], sizes = [16, 32], strides = [1, 1]} : vector<16x384xf32> to vector<16x32xf32>
    %198 = vector.extract_strided_slice %176 {offsets = [0, 352], sizes = [16, 32], strides = [1, 1]} : vector<16x384xf32> to vector<16x32xf32>
    %199 = vector.shape_cast %195 : vector<16x32xf32> to vector<1x16x32xf32>
    %200 = vector.shape_cast %196 : vector<16x32xf32> to vector<1x16x32xf32>
    %201 = vector.shape_cast %197 : vector<16x32xf32> to vector<1x16x32xf32>
    %202 = vector.shape_cast %198 : vector<16x32xf32> to vector<1x16x32xf32>
    %203 = tpu.concatenate %199, %200, %201, %202 in 0 : vector<1x16x32xf32>, vector<1x16x32xf32>, vector<1x16x32xf32>, vector<1x16x32xf32> -> vector<4x16x32xf32>
    "tpu.trace_start"() <{level = 10 : i32, message = "hqd,hkd->hqk"}> : () -> ()
    %cst_61 = arith.constant dense<0.000000e+00> : vector<4x16x16xf32>
    %204 = tpu.matmul %185, %194, %cst_61 {dimension_numbers = #tpu.dot_dimension_numbers<[2], [2], [1], [1], [0, 0, 0, 1, 1, 1], [0], [0]>} : vector<4x16x32xf32>, vector<4x16x32xf32>, vector<4x16x16xf32> -> vector<4x16x16xf32>
    "tpu.trace_stop"() : () -> ()
    %cst_62 = arith.constant 0.176776692 : f32
    %205 = vector.broadcast %cst_62 : f32 to vector<4x16x16xf32>
    %206 = arith.mulf %204, %205 : vector<4x16x16xf32>
    %cst_63 = arith.constant -1.000000e+09 : f32
    %207 = vector.shape_cast %6 : vector<1x1x16xi1> to vector<1x1x16xi1>
    %208 = vector.broadcast %207 : vector<1x1x16xi1> to vector<4x16x16xi1>
    %209 = vector.broadcast %cst_63 : f32 to vector<4x16x16xf32>
    %210 = arith.select %208, %209, %206 : vector<4x16x16xi1>, vector<4x16x16xf32>
    %cst_64 = arith.constant dense<0xFF800000> : vector<4x16xf32>
    %211 = vector.multi_reduction <maximumf>, %210, %cst_64 [2] : vector<4x16x16xf32> to vector<4x16xf32>
    %212 = vector.shape_cast %211 : vector<4x16xf32> to vector<4x16x1xf32>
    %213 = vector.broadcast %212 : vector<4x16x1xf32> to vector<4x16x16xf32>
    %214 = arith.subf %210, %213 : vector<4x16x16xf32>
    %215 = math.exp %214 : vector<4x16x16xf32>
    %cst_65 = arith.constant dense<0.000000e+00> : vector<4x16xf32>
    %216 = vector.multi_reduction <add>, %215, %cst_65 [2] : vector<4x16x16xf32> to vector<4x16xf32>
    %217 = vector.shape_cast %216 : vector<4x16xf32> to vector<4x16x1xf32>
    %218 = vector.broadcast %217 : vector<4x16x1xf32> to vector<4x16x16xf32>
    %219 = arith.divf %215, %218 : vector<4x16x16xf32>
    "tpu.trace_start"() <{level = 10 : i32, message = "hqk,hkd->hqd"}> : () -> ()
    %cst_66 = arith.constant dense<0.000000e+00> : vector<4x16x32xf32>
    %220 = tpu.matmul %219, %203, %cst_66 {dimension_numbers = #tpu.dot_dimension_numbers<[2], [1], [1], [2], [0, 0, 0, 1, 1, 2], [0], [0]>} : vector<4x16x16xf32>, vector<4x16x32xf32>, vector<4x16x32xf32> -> vector<4x16x32xf32>
    "tpu.trace_stop"() : () -> ()
    %221 = vector.extract_strided_slice %220 {offsets = [0, 0, 0], sizes = [1, 16, 32], strides = [1, 1, 1]} : vector<4x16x32xf32> to vector<1x16x32xf32>
    %222 = vector.shape_cast %221 : vector<1x16x32xf32> to vector<16x32xf32>
    %223 = vector.extract_strided_slice %220 {offsets = [1, 0, 0], sizes = [1, 16, 32], strides = [1, 1, 1]} : vector<4x16x32xf32> to vector<1x16x32xf32>
    %224 = vector.shape_cast %223 : vector<1x16x32xf32> to vector<16x32xf32>
    %225 = vector.extract_strided_slice %220 {offsets = [2, 0, 0], sizes = [1, 16, 32], strides = [1, 1, 1]} : vector<4x16x32xf32> to vector<1x16x32xf32>
    %226 = vector.shape_cast %225 : vector<1x16x32xf32> to vector<16x32xf32>
    %227 = vector.extract_strided_slice %220 {offsets = [3, 0, 0], sizes = [1, 16, 32], strides = [1, 1, 1]} : vector<4x16x32xf32> to vector<1x16x32xf32>
    %228 = vector.shape_cast %227 : vector<1x16x32xf32> to vector<16x32xf32>
    %229 = tpu.concatenate %222, %224, %226, %228 in 1 : vector<16x32xf32>, vector<16x32xf32>, vector<16x32xf32>, vector<16x32xf32> -> vector<16x128xf32>
    %c1_67 = arith.constant 1 : index
    %c0_68 = arith.constant 0 : index
    %c0_69 = arith.constant 0 : index
    %230 = vector.load %arg5[%c1_67, %c0_68, %c0_69] : memref<2x128x128xf32, #tpu.memory_space<vmem>>, vector<1x128x128xf32>
    %231 = vector.shape_cast %230 : vector<1x128x128xf32> to vector<128x128xf32>
    %cst_70 = arith.constant dense<0.000000e+00> : vector<16x128xf32>
    %232 = tpu.matmul %229, %231, %cst_70 {dimension_numbers = #tpu.dot_dimension_numbers<[1], [0], [0], [1], [0, 0, 1, 1], [], []>} : vector<16x128xf32>, vector<128x128xf32>, vector<16x128xf32> -> vector<16x128xf32>
    %233 = arith.addf %139, %232 : vector<16x128xf32>
    %234 = vector.broadcast %146 : vector<1x128xf32> to vector<16x128xf32>
    %235 = arith.addf %233, %234 : vector<16x128xf32>
    %cst_71 = arith.constant dense<0.000000e+00> : vector<16xf32>
    %236 = vector.multi_reduction <add>, %235, %cst_71 [1] : vector<16x128xf32> to vector<16xf32>
    %237 = vector.shape_cast %236 : vector<16xf32> to vector<16x1xf32>
    %cst_72 = arith.constant 1.280000e+02 : f32
    %238 = vector.broadcast %cst_72 : f32 to vector<16x1xf32>
    %239 = arith.divf %237, %238 : vector<16x1xf32>
    %240 = vector.broadcast %239 : vector<16x1xf32> to vector<16x128xf32>
    %241 = arith.subf %235, %240 : vector<16x128xf32>
    %242 = arith.mulf %241, %241 : vector<16x128xf32>
    %cst_73 = arith.constant dense<0.000000e+00> : vector<16xf32>
    %243 = vector.multi_reduction <add>, %242, %cst_73 [1] : vector<16x128xf32> to vector<16xf32>
    %244 = vector.shape_cast %243 : vector<16xf32> to vector<16x1xf32>
    %cst_74 = arith.constant 1.270000e+02 : f32
    %245 = vector.broadcast %cst_74 : f32 to vector<16x1xf32>
    %246 = arith.divf %244, %245 : vector<16x1xf32>
    %247 = math.sqrt %246 : vector<16x1xf32>
    %248 = vector.broadcast %239 : vector<16x1xf32> to vector<16x128xf32>
    %249 = arith.subf %235, %248 : vector<16x128xf32>
    %250 = vector.broadcast %144 : vector<1x128xf32> to vector<16x128xf32>
    %251 = arith.mulf %250, %249 : vector<16x128xf32>
    %cst_75 = arith.constant 9.99999997E-7 : f32
    %252 = vector.broadcast %cst_75 : f32 to vector<16x1xf32>
    %253 = arith.addf %247, %252 : vector<16x1xf32>
    %254 = vector.broadcast %253 : vector<16x1xf32> to vector<16x128xf32>
    %255 = arith.divf %251, %254 : vector<16x128xf32>
    %256 = vector.broadcast %145 : vector<1x128xf32> to vector<16x128xf32>
    %257 = arith.addf %255, %256 : vector<16x128xf32>
    %c1_76 = arith.constant 1 : index
    %c0_77 = arith.constant 0 : index
    %c0_78 = arith.constant 0 : index
    %258 = vector.load %arg6[%c1_76, %c0_77, %c0_78] : memref<2x128x256xf32, #tpu.memory_space<vmem>>, vector<1x128x256xf32>
    %259 = vector.shape_cast %258 : vector<1x128x256xf32> to vector<128x256xf32>
    %cst_79 = arith.constant dense<0.000000e+00> : vector<16x256xf32>
    %260 = tpu.matmul %257, %259, %cst_79 {dimension_numbers = #tpu.dot_dimension_numbers<[1], [0], [0], [1], [0, 0, 1, 1], [], []>} : vector<16x128xf32>, vector<128x256xf32>, vector<16x256xf32> -> vector<16x256xf32>
    %c1_80 = arith.constant 1 : index
    %c0_81 = arith.constant 0 : index
    %c0_82 = arith.constant 0 : index
    %261 = vector.load %arg8[%c1_80, %c0_81, %c0_82] : memref<2x1x256xf32, #tpu.memory_space<vmem>>, vector<1x1x256xf32>
    %262 = vector.shape_cast %261 : vector<1x1x256xf32> to vector<1x256xf32>
    %263 = vector.broadcast %262 : vector<1x256xf32> to vector<16x256xf32>
    %264 = arith.addf %260, %263 : vector<16x256xf32>
    %cst_83 = arith.constant 0.000000e+00 : f32
    %265 = vector.broadcast %cst_83 : f32 to vector<16x256xf32>
    %266 = arith.maximumf %264, %265 : vector<16x256xf32>
    %c1_84 = arith.constant 1 : index
    %c0_85 = arith.constant 0 : index
    %c0_86 = arith.constant 0 : index
    %267 = vector.load %arg7[%c1_84, %c0_85, %c0_86] : memref<2x256x128xf32, #tpu.memory_space<vmem>>, vector<1x256x128xf32>
    %268 = vector.shape_cast %267 : vector<1x256x128xf32> to vector<256x128xf32>
    %cst_87 = arith.constant dense<0.000000e+00> : vector<16x128xf32>
    %269 = tpu.matmul %266, %268, %cst_87 {dimension_numbers = #tpu.dot_dimension_numbers<[1], [0], [0], [1], [0, 0, 1, 1], [], []>} : vector<16x256xf32>, vector<256x128xf32>, vector<16x128xf32> -> vector<16x128xf32>
    %270 = arith.addf %235, %269 : vector<16x128xf32>
    %271 = vector.broadcast %147 : vector<1x128xf32> to vector<16x128xf32>
    %272 = arith.addf %270, %271 : vector<16x128xf32>
    %c0_88 = arith.constant 0 : index
    %c0_89 = arith.constant 0 : index
    %273 = vector.load %arg10[%c0_88, %c0_89] : memref<2x128xf32, #tpu.memory_space<vmem>>, vector<2x128xf32>
    %274 = vector.extract_strided_slice %273 {offsets = [0, 0], sizes = [1, 128], strides = [1, 1]} : vector<2x128xf32> to vector<1x128xf32>
    %275 = vector.extract_strided_slice %273 {offsets = [1, 0], sizes = [1, 128], strides = [1, 1]} : vector<2x128xf32> to vector<1x128xf32>
    %cst_90 = arith.constant dense<0.000000e+00> : vector<16xf32>
    %276 = vector.multi_reduction <add>, %272, %cst_90 [1] : vector<16x128xf32> to vector<16xf32>
    %277 = vector.shape_cast %276 : vector<16xf32> to vector<16x1xf32>
    %cst_91 = arith.constant 1.280000e+02 : f32
    %278 = vector.broadcast %cst_91 : f32 to vector<16x1xf32>
    %279 = arith.divf %277, %278 : vector<16x1xf32>
    %280 = vector.broadcast %279 : vector<16x1xf32> to vector<16x128xf32>
    %281 = arith.subf %272, %280 : vector<16x128xf32>
    %282 = arith.mulf %281, %281 : vector<16x128xf32>
    %cst_92 = arith.constant dense<0.000000e+00> : vector<16xf32>
    %283 = vector.multi_reduction <add>, %282, %cst_92 [1] : vector<16x128xf32> to vector<16xf32>
    %284 = vector.shape_cast %283 : vector<16xf32> to vector<16x1xf32>
    %cst_93 = arith.constant 1.270000e+02 : f32
    %285 = vector.broadcast %cst_93 : f32 to vector<16x1xf32>
    %286 = arith.divf %284, %285 : vector<16x1xf32>
    %287 = math.sqrt %286 : vector<16x1xf32>
    %288 = vector.broadcast %279 : vector<16x1xf32> to vector<16x128xf32>
    %289 = arith.subf %272, %288 : vector<16x128xf32>
    %290 = vector.broadcast %274 : vector<1x128xf32> to vector<16x128xf32>
    %291 = arith.mulf %290, %289 : vector<16x128xf32>
    %cst_94 = arith.constant 9.99999997E-7 : f32
    %292 = vector.broadcast %cst_94 : f32 to vector<16x1xf32>
    %293 = arith.addf %287, %292 : vector<16x1xf32>
    %294 = vector.broadcast %293 : vector<16x1xf32> to vector<16x128xf32>
    %295 = arith.divf %291, %294 : vector<16x128xf32>
    %296 = vector.broadcast %275 : vector<1x128xf32> to vector<16x128xf32>
    %297 = arith.addf %295, %296 : vector<16x128xf32>
    %c0_95 = arith.constant 0 : index
    %c0_96 = arith.constant 0 : index
    %c0_97 = arith.constant 0 : index
    %298 = vector.load %arg11[%c0_95, %c0_96, %c0_97] : memref<1x16x128xf32, #tpu.memory_space<vmem>>, vector<1x16x128xf32>
    %299 = vector.shape_cast %298 : vector<1x16x128xf32> to vector<16x128xf32>
    %300 = vector.shape_cast %297 : vector<16x128xf32> to vector<1x16x128xf32>
    tpu.vector_store %arg11[%c0_95, %c0_96, %c0_97], %300 {strides = array<i32>} : memref<1x16x128xf32, #tpu.memory_space<vmem>>, vector<1x16x128xf32>,
    return
  }
  func.func @transform_0(%arg0: i32) -> (i32, i32, i32) {
    %c0_i32 = arith.constant 0 : i32
    %c0_i32_0 = arith.constant 0 : i32
    %c0_i32_1 = arith.constant 0 : i32
    return %arg0, %c0_i32, %c0_i32_0 : i32, i32, i32
  }
  func.func @transform_1(%arg0: i32) -> (i32, i32, i32) {
    %c0_i32 = arith.constant 0 : i32
    %c0_i32_0 = arith.constant 0 : i32
    %c0_i32_1 = arith.constant 0 : i32
    return %arg0, %c0_i32, %c0_i32_0 : i32, i32, i32
  }
  func.func @transform_2(%arg0: i32) -> (i32, i32, i32) {
    %c0_i32 = arith.constant 0 : i32
    %c0_i32_0 = arith.constant 0 : i32
    %c0_i32_1 = arith.constant 0 : i32
    %c0_i32_2 = arith.constant 0 : i32
    return %c0_i32, %c0_i32_0, %c0_i32_1 : i32, i32, i32
  }
  func.func @transform_3(%arg0: i32) -> (i32, i32, i32) {
    %c0_i32 = arith.constant 0 : i32
    %c0_i32_0 = arith.constant 0 : i32
    %c0_i32_1 = arith.constant 0 : i32
    %c0_i32_2 = arith.constant 0 : i32
    return %c0_i32, %c0_i32_0, %c0_i32_1 : i32, i32, i32
  }
  func.func @transform_4(%arg0: i32) -> (i32, i32, i32) {
    %c0_i32 = arith.constant 0 : i32
    %c0_i32_0 = arith.constant 0 : i32
    %c0_i32_1 = arith.constant 0 : i32
    %c0_i32_2 = arith.constant 0 : i32
    return %c0_i32, %c0_i32_0, %c0_i32_1 : i32, i32, i32
  }
  func.func @transform_5(%arg0: i32) -> (i32, i32, i32) {
    %c0_i32 = arith.constant 0 : i32
    %c0_i32_0 = arith.constant 0 : i32
    %c0_i32_1 = arith.constant 0 : i32
    %c0_i32_2 = arith.constant 0 : i32
    return %c0_i32, %c0_i32_0, %c0_i32_1 : i32, i32, i32
  }
  func.func @transform_6(%arg0: i32) -> (i32, i32, i32) {
    %c0_i32 = arith.constant 0 : i32
    %c0_i32_0 = arith.constant 0 : i32
    %c0_i32_1 = arith.constant 0 : i32
    %c0_i32_2 = arith.constant 0 : i32
    return %c0_i32, %c0_i32_0, %c0_i32_1 : i32, i32, i32
  }
  func.func @transform_7(%arg0: i32) -> (i32, i32, i32) {
    %c0_i32 = arith.constant 0 : i32
    %c0_i32_0 = arith.constant 0 : i32
    %c0_i32_1 = arith.constant 0 : i32
    %c0_i32_2 = arith.constant 0 : i32
    return %c0_i32, %c0_i32_0, %c0_i32_1 : i32, i32, i32
  }
  func.func @transform_8(%arg0: i32) -> (i32, i32, i32) {
    %c0_i32 = arith.constant 0 : i32
    %c0_i32_0 = arith.constant 0 : i32
    %c0_i32_1 = arith.constant 0 : i32
    %c0_i32_2 = arith.constant 0 : i32
    return %c0_i32, %c0_i32_0, %c0_i32_1 : i32, i32, i32
  }
  func.func @transform_9(%arg0: i32) -> (i32, i32) {
    %c0_i32 = arith.constant 0 : i32
    %c0_i32_0 = arith.constant 0 : i32
    %c0_i32_1 = arith.constant 0 : i32
    return %c0_i32, %c0_i32_0 : i32, i32
  }
  func.func @transform_10(%arg0: i32) -> (i32, i32, i32) {
    %c0_i32 = arith.constant 0 : i32
    %c0_i32_0 = arith.constant 0 : i32
    %c0_i32_1 = arith.constant 0 : i32
    return %arg0, %c0_i32, %c0_i32_0 : i32, i32, i32
  }
}

</mosaic_0001>

<bundles_post_ra>
// kernel: tpu_custom_call.1
= control target key start
LH: loop header
LB: loop body
LE: loop exit
PB: predicated region body
PF: predicated region fallthrough
CT: control target
= control target key end

     0   :  { %s5835_s0 = inlined_call_operand.hbm [shape: f32[2,16,128], index: 0, kind: input, shape index: {}]   ;;  %s5836_s1 = inlined_call_operand.vmem [shape: f32[2,1,16], index: 1, kind: input, shape index: {}]   ;;  %s5837_s2 = inlined_call_operand.hbm [shape: f32[2,128,384], index: 2, kind: input, shape index: {}]   ;;  %s5838_s3 = inlined_call_operand.vmem [shape: f32[2,1,384], index: 3, kind: input, shape index: {}]   ;;  %s5839_s4 = inlined_call_operand.hbm [shape: f32[2,128,128], index: 4, kind: input, shape index: {}]   ;;  %s5840_s5 = inlined_call_operand.hbm [shape: f32[2,128,256], index: 5, kind: input, shape index: {}]   ;;  %s5841_s6 = inlined_call_operand.hbm [shape: f32[2,256,128], index: 6, kind: input, shape index: {}]   ;;  %s5842_s7 = inlined_call_operand.vmem [shape: f32[2,1,256], index: 7, kind: input, shape index: {}]   ;;  %s5843_s8 = inlined_call_operand.vmem [shape: f32[2,6,128], index: 8, kind: input, shape index: {}]   ;;  %s5844_s9 = inlined_call_operand.vmem [shape: f32[2,128], index: 9, kind: input, shape index: {}]   ;;  %s5845_s10 = inlined_call_operand.hbm [shape: f32[2,16,128], index: 10, kind: output, shape index: {}]  }
   0x1   :  { %5852 = sst [smem:[#allocation18_spill]] %s5837_s2 }
   0x2   :  { %5853 = sst [smem:[#allocation19_spill]] %s5845_s10 }
   0x3   :  { %15 = vsyncpa [#allocation3], 0 }
   0x4   :  { %17 = vsyncpa [#allocation3 + $0x1], 0 }
   0x5   :  { %18 = vsyncpa [#allocation6], 0 }
   0x6   :  { %19 = vsyncpa [#allocation9], 0 }
   0x7   :  { %20 = vsyncpa [#allocation4], 0 }
   0x8   :  { %22 = vsyncpa [#allocation4 + $0x1], 0  ;;  %s5167_s13 = smov 0   ;;  %s5169_s14 = smov 0  }
   0x9   :  { %s5171_s15 = smov 0   ;;  %s5173_s16 = smov 0  }
   0xa LB: > { %5854 = sst [smem:[#allocation16_spill]] %s5079_s13  ;;  %s5188_s17 = sadd.s32 4294967295, %s5091_s16   ;;  %s5091_s16 = sphi %s5173_s16, %s5883_s16   ;;  %s5087_s15 = sphi %s5171_s15, %s5882_s15   ;;  %s5083_s14 = sphi %s5169_s14, %s5881_s14   ;;  %s5079_s13 = sphi %s5167_s13, %s5880_s13  }
   0xb   : > { %s3640_s18 = sadd.s32 4294967294, %s5091_s16   ;;  %p48_p0 = scmp.ne.s32.totalorder %s5083_s14, %s5079_s13 }
   0xc   : > { %p5846_p1 = scmp.eq.s32.totalorder %s5188_s17, 0  ;;  %p272_p3 = scmp.eq.s32.totalorder %s3640_s18, 1 }
   0xd   : > { %p3641_p5 = scmp.ge.s32.totalorder %s5091_s16, 1  ;;  %p279_p7 = scmp.lt.s32.totalorder %s5091_s16, 3 }
   0xe   : > { %p5197_p4 = por %p5846_p1, %p48_p0  ;;  %p5202_p6 = por %p272_p3, %p48_p0 }
   0xf   : > { %p5207_p8 = pnand %p3641_p5, %p279_p7  ;;  %s5093_s22 = smov [#allocation5]  }
  0x10   : > { %s5855_s19 = scalar_select %p5197_p4, 1, 0 }
  0x11   : > { %s5856_s20 = scalar_select %p5202_p6, 1, 0 }
  0x12   : > { %s5858_s21 = scalar_select %p5207_p8, 1, 0 }
  0x13   : > { %5857 = sst [smem:[#allocation17_spill]] %s5856_s20  ;;  %s291_s23 = sshll.u32 %s5093_s22, 4  ;;  %s5211_s23 = int_to_ptr.vmem [resolvable:$true] %s291_s23 }
  0x14   : > { %p4599_p9 = pneg %p5207_p8  ;;  %s5094_s25 = smov [#allocation8]  }
  0x15   : > { %s320_s26 = sshll.u32 %s5094_s25, 4  ;;  %s5860_s2 = sld [smem:[#allocation18_spill]]  ;;  %s5222_s26 = int_to_ptr.vmem [resolvable:$true] %s320_s26 }
  0x16   : > { %p5218_p11 = pnand %p4599_p9, %p5846_p1 }
  0x18   : > { %p5232_p13 = pneg %p5218_p11 }
  0x1b   : > { %s4875_s29 = scalar_lea.hbm %s5860_s2, 12288 }
  0x1c   : > { %p4876_p12 = scmp.ne.s32.totalorder %s5860_s2, %s4875_s29  ;;  %p4882_p5 = scmp.lt.u32.totalorder %s4875_s29, %s5860_s2 }
  0x1e   : > { %p4878_p0 = pnand %p5232_p13, %p4876_p12 }
  0x20   : > { %p4879_p3 = pneg %p4878_p0 }
  0x22   : > { %p4884_p7 = pnand %p4882_p5, %p4879_p3 }
  0x24   : > { %4887 = shalt.err (!%p4884_p7)
}
  0x25   : > { %s4888_s25 = scalar_lea.vmem %s5211_s23, 12288  ;;  %p4896_p2 = scmp.lt.s32.totalorder %s5211_s23, %s5211_s23 }
  0x26   : > { %p4889_p9 = scmp.ne.s32.totalorder %s5211_s23, %s4888_s25  ;;  %p4897_p6 = scmp.lt.s32.totalorder %s4888_s25, %s4888_s25 }
  0x28   : > { %p4891_p10 = pnand %p4889_p9, %p5232_p13  ;;  %p4898_p12 = por %p4897_p6, %p4896_p2 }
  0x2a   : > { %p4892_p1 = pneg %p4891_p10 }
  0x2c   : > { %p4899_p0 = pnand %p4898_p12, %p4892_p1 }
  0x2e   : > { %4902 = shalt.err (!%p4899_p0)
}
  0x2f   : > { %s5095_s27 = smov 384   ;;  %s5096_s28 = smov 24  }
  0x30   : > { %4602 = dma.hbm_to_vmem [thread:$0]  (!%p5218_p11), %s5860_s2, 12288, %s5211_s23, [#allocation6], %s5095_s27, %s5095_s27, %s5096_s28  }
  0x31   : > { %s4903_s22 = scalar_lea.hbm %s5840_s5, 8192 }
  0x32   : > { %p4904_p2 = scmp.ne.s32.totalorder %s5840_s5, %s4903_s22  ;;  %p4910_p10 = scmp.lt.u32.totalorder %s4903_s22, %s5840_s5 }
  0x34   : > { %p4906_p1 = pnand %p4904_p2, %p5232_p13 }
  0x36   : > { %p4907_p6 = pneg %p4906_p1 }
  0x38   : > { %p4912_p3 = pnand %p4910_p10, %p4907_p6 }
  0x3a   : > { %4915 = shalt.err (!%p4912_p3)
}
  0x3b   : > { %s4916_s23 = scalar_lea.vmem %s5222_s26, 8192  ;;  %p4924_p12 = scmp.lt.s32.totalorder %s5222_s26, %s5222_s26 }
  0x3c   : > { %p4917_p5 = scmp.ne.s32.totalorder %s5222_s26, %s4916_s23  ;;  %p4925_p0 = scmp.lt.s32.totalorder %s4916_s23, %s4916_s23 }
  0x3e   : > { %p4919_p7 = pnand %p4917_p5, %p5232_p13  ;;  %p4926_p2 = por %p4925_p0, %p4924_p12 }
  0x40   : > { %p4920_p9 = pneg %p4919_p7 }
  0x42   : > { %p4927_p1 = pnand %p4926_p2, %p4920_p9 }
  0x44   : > { %4930 = shalt.err (!%p4927_p1)
}
  0x45   : > { %s5097_s13 = smov 256   ;;  %s5098_s10 = smov 16  }
  0x46   : > { %4608 = dma.hbm_to_vmem [thread:$0]  (!%p5218_p11), %s5840_s5, 8192, %s5222_s26, [#allocation9], %s5097_s13, %s5097_s13, %s5098_s10  }
  0x47   : > { %s5099_s28 = smov [#allocation7]   ;;  %s4931_s18 = scalar_lea.hbm %s5839_s4, 4096 }
  0x48   : > { %s307_s29 = sshll.u32 %s5099_s28, 4  ;;  %p4932_p6 = scmp.ne.s32.totalorder %s5839_s4, %s4931_s18  ;;  %s308_s29 = int_to_ptr.vmem [resolvable:$true] %s307_s29 }
  0x49   : > { %p4938_p5 = scmp.lt.u32.totalorder %s4931_s18, %s5839_s4 }
  0x4a   : > { %p4934_p10 = pnand %p4932_p6, %p5232_p13 }
  0x4c   : > { %p4935_p3 = pneg %p4934_p10 }
  0x4e   : > { %p4940_p7 = pnand %p4938_p5, %p4935_p3 }
  0x50   : > { %4943 = shalt.err (!%p4940_p7)
}
  0x51   : > { %s4944_s26 = scalar_lea.vmem %s308_s29, 4096  ;;  %p4952_p2 = scmp.lt.s32.totalorder %s308_s29, %s308_s29 }
  0x52   : > { %p4945_p9 = scmp.ne.s32.totalorder %s308_s29, %s4944_s26  ;;  %p4953_p1 = scmp.lt.s32.totalorder %s4944_s26, %s4944_s26 }
  0x54   : > { %p4947_p12 = pnand %p4945_p9, %p5232_p13  ;;  %p4954_p4 = por %p4953_p1, %p4952_p2 }
  0x56   : > { %p4948_p0 = pneg %p4947_p12 }
  0x58   : > { %p4955_p8 = pnand %p4954_p4, %p4948_p0 }
  0x5a   : > { %4958 = shalt.err (!%p4955_p8)
}
  0x5b   : > { %s5100_s13 = smov 128   ;;  %s5101_s10 = smov 8  }
  0x5c   : > { %4605 = dma.hbm_to_vmem [thread:$0]  (!%p5218_p11), %s5839_s4, 4096, %s308_s29, [#allocation6], %s5100_s13, %s5100_s13, %s5101_s10  }
  0x5d   : > { %s5102_s27 = smov [#allocation10]   ;;  %s4959_s18 = scalar_lea.hbm %s5841_s6, 8192 }
  0x5e   : > { %s333_s28 = sshll.u32 %s5102_s27, 4  ;;  %p4960_p4 = scmp.ne.s32.totalorder %s5841_s6, %s4959_s18  ;;  %s334_s28 = int_to_ptr.vmem [resolvable:$true] %s333_s28 }
  0x5f   : > { %p4966_p10 = scmp.lt.u32.totalorder %s4959_s18, %s5841_s6 }
  0x60   : > { %p4962_p8 = pnand %p4960_p4, %p5232_p13 }
  0x62   : > { %p4963_p6 = pneg %p4962_p8 }
  0x64   : > { %p4968_p3 = pnand %p4966_p10, %p4963_p6 }
  0x66   : > { %4971 = shalt.err (!%p4968_p3)
}
  0x67   : > { %s4972_s29 = scalar_lea.vmem %s334_s28, 8192  ;;  %p4980_p12 = scmp.lt.s32.totalorder %s334_s28, %s334_s28 }
  0x68   : > { %p4973_p5 = scmp.ne.s32.totalorder %s334_s28, %s4972_s29  ;;  %p4981_p0 = scmp.lt.s32.totalorder %s4972_s29, %s4972_s29 }
  0x6a   : > { %p4975_p7 = pnand %p4973_p5, %p5232_p13  ;;  %p4982_p2 = por %p4981_p0, %p4980_p12 }
  0x6c   : > { %p4976_p9 = pneg %p4975_p7 }
  0x6e   : > { %p4983_p1 = pnand %p4982_p2, %p4976_p9 }
  0x70   : > { %4986 = shalt.err (!%p4983_p1)
}
  0x71   : > { %4611 = dma.hbm_to_vmem [thread:$0]  (!%p5218_p11), %s5841_s6, 8192, %s334_s28, [#allocation9], %s5100_s13, %s5100_s13, %s5101_s10  }
  0x72   : > { %s5319_s12 = sadd.s32 1, %s5091_s16   ;;  %s35_s24 = sadd.s32 1, %s5087_s15 }
  0x73   : > { %s32_s27 = ssub.s32 %s5091_s16, %s5319_s12  ;;  %p42_p13 = scmp.ne.s32.totalorder %s5087_s15, %s5083_s14 }
  0x74   : > { %p33_p4 = scmp.eq.s32.totalorder %s32_s27, 0  ;;  %p43_p8 = scmp.eq.s32.totalorder %s5091_s16, 0 }
  0x75   : > { %p5862_p6 = scmp.eq.s32.totalorder %s5188_s17, 1  ;;  %p4624_p3 = scmp.lt.s32.totalorder %s5091_s16, 2 }
  0x76   : > { %s5335_s11 = scalar_select %p33_p4, %s5087_s15, %s35_s24  }
  0x77   : > { %p5329_p10 = por %p5862_p6, %p42_p13  ;;  %p44_p5 = por %p43_p8, %p42_p13 }
  0x78   : > { %s356_s18 = sand.u32 1, %s5087_s15   ;;  %s3713_s28 = sshll.u32 %s5091_s16, 8 }
  0x79   : > { %s3647_s22 = sshll.u32 %s356_s18, 4  ;;  %s5342_s26 = scalar_lea.hbm %s5835_s0, %s3713_s28 }
  0x7a   : > { %s360_s29 = scalar_lea.vmem [#allocation2], %s3647_s22  ;;  %p5346_p11 = pnand %p4624_p3, %p44_p5 }
  0x7b   : > { %s367_s2 = sshll.u32 %s360_s29, 4  ;;  %s5350_s24 = scalar_lea.sflag [#allocation3], %s356_s18  ;;  %s5344_s2 = int_to_ptr.vmem [resolvable:$true] %s367_s2 }
  0x7c   : > { %s4987_s27 = scalar_lea.hbm %s5342_s26, 256  ;;  %p4989_p9 = pneg %p5346_p11 }
  0x7d   : > { %p4988_p7 = scmp.ne.s32.totalorder %s5342_s26, %s4987_s27  ;;  %s4992_s25 = scalar_lea.hbm %s5835_s0, 512 }
  0x7e   : > { %p4993_p2 = scmp.lt.u32.totalorder %s5342_s26, %s5835_s0  ;;  %p4994_p1 = scmp.lt.u32.totalorder %s4992_s25, %s4987_s27 }
  0x7f   : > { %p4990_p12 = pnand %p4989_p9, %p4988_p7  ;;  %p4996_p4 = scmp.lt.u32.totalorder %s4987_s27, %s5342_s26 }
  0x80   : > { %p4995_p13 = por %p4994_p1, %p4993_p2 }
  0x81   : > { %p4991_p0 = pneg %p4990_p12 }
  0x82   : > { %p4997_p8 = por %p4996_p4, %p4995_p13 }
  0x84   : > { %p4998_p6 = pnand %p4997_p8, %p4991_p0 }
  0x86   : > { %5001 = shalt.err (!%p4998_p6)
}
  0x87   : > { %s5002_s18 = scalar_lea.vmem %s5344_s2, 256  ;;  %s5103_s22 = smov [#allocation2]  }
  0x88   : > { %p5003_p3 = scmp.ne.s32.totalorder %s5344_s2, %s5002_s18  ;;  %s5007_s28 = sshll.u32 %s5103_s22, 4  ;;  %s5008_s28 = int_to_ptr.vmem [resolvable:$false] %s5007_s28 }
  0x89   : > { %s5009_s23 = scalar_lea.vmem %s5008_s28, 512  ;;  %p5010_p12 = scmp.lt.s32.totalorder %s5344_s2, %s5008_s28 }
  0x8a   : > { %p5005_p5 = pnand %p5003_p3, %p4989_p9  ;;  %p5011_p2 = scmp.lt.s32.totalorder %s5009_s23, %s5002_s18 }
  0x8c   : > { %p5006_p7 = pneg %p5005_p5  ;;  %p5012_p1 = por %p5011_p2, %p5010_p12 }
  0x8e   : > { %p5013_p13 = pnand %p5012_p1, %p5006_p7 }
  0x90   : > { %5016 = shalt.err (!%p5013_p13)
}
  0x91   : > { %4615 = dma.hbm_to_vmem [thread:$0]  (!%p5346_p11), %s5342_s26, 256, %s5344_s2, %s5350_s24, %s5100_s13, %s5100_s13, %s5101_s10  }
  0x92   : > { %p5865_p9 = scmp.ne.s32.totalorder %s5858_s21, 0 }
  0x93   : > { %s5384_s27 = sand.u32 (!%p5865_p9), 1, %s5083_s14   ;;  %p5866_p0 = scmp.ne.s32.totalorder (!%p5865_p9), %s5855_s19, 0 }
  0x94   : > { %385 = sbr.rel (%p5865_p9) target bundleno = 5573 (0x15c5), region = 60  ;;  %s3651_s25 = sshll.u32 (!%p5865_p9), %s5384_s27, 4 }
  0x95   : > { %s388_s29 = scalar_lea.sflag (!%p5865_p9), [#allocation3], %s5384_s27  ;;  %s391_s20 = scalar_lea.vmem (!%p5865_p9), [#allocation2], %s3651_s25 }
  0x9b   : > { %5062 = dma.done.wait (%p5866_p0), %s388_s29, 256  }
  0x9c   : > { %5064 = vsyncadd (%p5866_p0), %s388_s29, 4294967040  ;;  %p5867_p11 = scmp.eq.s32.totalorder %s5188_s17, 0 }
  0x9e   : > { %5066 = dma.done.wait (%p5867_p11), [#allocation6], 16384   ;;  %p5868_p4 = pmov %p5867_p11 }
  0xa0   : > { %5068 = vsyncadd (%p5868_p4), [#allocation6], 4294950912  ;;  %p5869_p8 = pmov %p5868_p4 }
  0xa1   : > { %p5870_p6 = pmov %p5868_p4 }
  0xa2   : > { %5070 = dma.done.wait (%p5869_p8), [#allocation9], 16384  }
  0xa3   : > { %5072 = vsyncadd (%p5870_p6), [#allocation9], 4294950912  ;;  %v5402_v0 = vld [vmem:[%s391_s20] sm:$0xff]  ;;  %v5405_v1 = vld [vmem:[%s391_s20 + $0x8] sm:$0xff]  ;;  %v5104_v59 = vmov 0.0   ;;  %vm770_vm4 = vcmask 261120  }
  0xa4   : > { %455 = vadd.xlane.f32.xlu0 %v5402_v0  ;;  %v506_v10 = vld [vmem:[#allocation5 + $0x8] sm:$0xff]  ;;  %v509_v11 = vld [vmem:[#allocation5 + $0x20] sm:$0xff]  ;;  %v508_v14 = vld [vmem:[#allocation5 + $0x18] sm:$0xff]  ;;  %634 = vmatprep.mubr.f32.mxu0 %v5104_v59  ;;  %s5105_s26 = smov 96   ;;  %s5106_s2 = smov 64   ;;  %vm1125_vm8 = vcmask 130048  }
  0xa5   : > { %v4179_v12 = vpack.c.bf16 %v509_v11, %v506_v10  ;;  %v505_v13 = vld [vmem:[#allocation5] sm:$0xff]  ;;  %v512_v16 = vld [vmem:[#allocation5 + $0x38] sm:$0xff]  ;;  %v515_v17 = vld [vmem:[#allocation5 + $0x50] sm:$0xff]  ;;  %s5107_s24 = smov 32   ;;  %p447_p3 = scmp.lt.s32.totalorder %s5188_s17, 1  ;;  %vm1564_vm9 = vcmask 523264  }
  0xa6   : > { %v4181_v15 = vpack.c.bf16 %v508_v14, %v505_v13  ;;  %v507_v18 = vld [vmem:[#allocation5 + $0x10] sm:$0xff]  ;;  %v4183_v19 = vpack.c.bf16 %v515_v17, %v512_v16  ;;  %v510_v20 = vld [vmem:[#allocation5 + $0x28] sm:$0xff]  ;;  %v521_v26 = vld [vmem:[#allocation5 + $0x80] sm:$0xff]  ;;  %vm1567_vm10 = vcmask 785408   ;;  %s3714_s20 = sshll.u32 %s5188_s17, 8  ;;  %s446_s19 = scalar_lea.vmem [#allocation11], %s3651_s25 }
  0xa7   : > { %4180 = vmatprep.subr.bf16.mxu0 %v4179_v12  ;;  %v511_v21 = vld [vmem:[#allocation5 + $0x30] sm:$0xff]  ;;  %v514_v22 = vld [vmem:[#allocation5 + $0x48] sm:$0xff]  ;;  %v4211_v23 = vpack.c.bf16 %v510_v20, %v507_v18  ;;  %v513_v27 = vld [vmem:[#allocation5 + $0x40] sm:$0xff]  ;;  %s448_s18 = scalar_select %p447_p3, %s5188_s17, 1 }
  0xa8   : > { %457 = vadd.xlane.f32.xlu0 %v5405_v1  ;;  %4182 = vmatpush1.bf16.msra.mxu0 %v4181_v15  ;;  %v4185_v24 = vpack.c.bf16 %v514_v22, %v511_v21  ;;  %v518_v25 = vld [vmem:[#allocation5 + $0x68] sm:$0xff]  ;;  %v516_v29 = vld [vmem:[#allocation5 + $0x58] sm:$0xff]  ;;  %v517_v30 = vld [vmem:[#allocation5 + $0x60] sm:$0xff]  ;;  %s3520_s21 = sshll.u32 %s446_s19, 4  ;;  %s5109_s25 = smov [#allocation11]   ;;  %s5791_s21 = int_to_ptr.vmem [resolvable:$true] %s3520_s21 }
  0xa9   : > { %4184 = vmatprep.subr.bf16.mxu0 %v4183_v19  ;;  %4212 = vmatprep.subr.bf16.mxu1 %v4211_v23  ;;  %v4187_v28 = vpack.c.bf16 %v521_v26, %v518_v25  ;;  %v520_v31 = vld [vmem:[#allocation5 + $0x78] sm:$0xff]  ;;  %v4215_v32 = vpack.c.bf16 %v516_v29, %v513_v27  ;;  %v527_v35 = vld [vmem:[#allocation5 + $0xb0] sm:$0xff]  ;;  %v522_v38 = vld [vmem:[#allocation5 + $0x88] sm:$0xff]  ;;  %s449_s23 = scalar_lea.vmem %s5836_s1, %s448_s18  ;;  %s5875_s18 = sld [smem:[#allocation19_spill]] }
  0xaa   : > { %4214 = vmatpush3.bf16.msra.mxu1 %v4211_v23  ;;  %v4189_v33 = vpack.c.bf16 %v520_v31, %v517_v30  ;;  %v524_v34 = vld [vmem:[#allocation5 + $0x98] sm:$0xff]  ;;  %v519_v36 = vld [vmem:[#allocation5 + $0x70] sm:$0xff]  ;;  %v526_v40 = vld [vmem:[#allocation5 + $0xa8] sm:$0xff]  ;;  %s5017_s17 = scalar_lea.vmem %s5791_s21, 256 }
  0xab   : > { %4216 = vmatprep.subr.bf16.mxu1 %v4215_v32  ;;  %v4191_v37 = vpack.c.bf16 %v527_v35, %v524_v34  ;;  %v523_v39 = vld [vmem:[#allocation5 + $0x90] sm:$0xff]  ;;  %v4219_v41 = vpack.c.bf16 %v522_v38, %v519_v36  ;;  %v530_v43 = vld [vmem:[#allocation5 + $0xc8] sm:$0xff]  ;;  %v533_v44 = vld [vmem:[#allocation5 + $0xe0] sm:$0xff]  ;;  %p5018_p5 = scmp.ne.s32.totalorder %s5791_s21, %s5017_s17 }
  0xac   : > { %4186 = vmatpush1.bf16.msra.mxu0 %v4185_v24  ;;  %v4193_v42 = vpack.c.bf16 %v526_v40, %v523_v39  ;;  %v525_v45 = vld [vmem:[#allocation5 + $0xa0] sm:$0xff]  ;;  %v4195_v46 = vpack.c.bf16 %v533_v44, %v530_v43  ;;  %v528_v47 = vld [vmem:[#allocation5 + $0xb8] sm:$0xff]  ;;  %v539_v53 = vld [vmem:[#allocation5 + $0x110] sm:$0xff] }
  0xad   : > { %4188 = vmatprep.subr.bf16.mxu0 %v4187_v28  ;;  %v529_v48 = vld [vmem:[#allocation5 + $0xc0] sm:$0xff]  ;;  %v532_v49 = vld [vmem:[#allocation5 + $0xd8] sm:$0xff]  ;;  %v4223_v50 = vpack.c.bf16 %v528_v47, %v525_v45  ;;  %v531_v54 = vld [vmem:[#allocation5 + $0xd0] sm:$0xff]  ;;  %v487_v28 = vlaneseq  ;;  %p5019_p7 = pnand %p5018_p5, %p5329_p10 }
  0xae   : > { %4218 = vmatpush3.bf16.msra.mxu1 %v4215_v32  ;;  %v4197_v51 = vpack.c.bf16 %v532_v49, %v529_v48  ;;  %v536_v52 = vld [vmem:[#allocation5 + $0xf8] sm:$0xff]  ;;  %v534_v56 = vld [vmem:[#allocation5 + $0xe8] sm:$0xff]  ;;  %v535_v57 = vld [vmem:[#allocation5 + $0xf0] sm:$0xff] }
  0xaf   : > { %4220 = vmatprep.subr.bf16.mxu1 %v4219_v41  ;;  %v4199_v55 = vpack.c.bf16 %v539_v53, %v536_v52  ;;  %v538_v58 = vld [vmem:[#allocation5 + $0x108] sm:$0xff]  ;;  %v4227_v60 = vpack.c.bf16 %v534_v56, %v531_v54  ;;  %v545_v63 = vld [vmem:[#allocation5 + $0x140] sm:$0xff]  ;;  %v548_v11 = vld [vmem:[#allocation5 + $0x158] sm:$0xff]  ;;  %s5789_s22 = scalar_lea.hbm %s5875_s18, %s3714_s20  ;;  %p5020_p12 = pneg %p5019_p7 }
  0xb0   : > { %4190 = vmatpush1.bf16.msra.mxu0 %v4189_v33  ;;  %v4201_v61 = vpack.c.bf16 %v538_v58, %v535_v57  ;;  %v542_v62 = vld [vmem:[#allocation5 + $0x128] sm:$0xff]  ;;  %v551_v12 = vld [vmem:[#allocation5 + $0x170] sm:$0xff]  ;;  %v549_v20 = vld [vmem:[#allocation5 + $0x160] sm:$0xff]  ;;  %v5419_v33 = vshrl.u32 %v487_v28, 7 }
  0xb1   : > { %4192 = vmatprep.subr.bf16.mxu0 %v4191_v37  ;;  %v543_v13 = vld [vmem:[#allocation5 + $0x130] sm:$0xff]  ;;  %v4207_v14 = vpack.c.bf16 %v551_v12, %v548_v11  ;;  %v546_v15 = vld [vmem:[#allocation5 + $0x148] sm:$0xff]  ;;  %v552_v21 = vld [vmem:[#allocation5 + $0x178] sm:$0xff] }
  0xb2   : > { %4222 = vmatpush3.bf16.msra.mxu1 %v4219_v41  ;;  %v547_v16 = vld [vmem:[#allocation5 + $0x150] sm:$0xff]  ;;  %v550_v17 = vld [vmem:[#allocation5 + $0x168] sm:$0xff]  ;;  %v4235_v18 = vpack.c.bf16 %v546_v15, %v543_v13  ;;  %v4239_v22 = vpack.c.bf16 %v552_v21, %v549_v20  ;;  %v5422_v39 = vsub.s32 0, %v5419_v33  ;;  %v5427_v41 = vld [vmem:[%s5843_s8] sm:$0x3f]  ;;  %v5432_v44 = vsub.s32 1, %v5419_v33 }
  0xb3   : > { %4224 = vmatprep.subr.bf16.mxu1 %v4223_v50  ;;  %v4209_v19 = vpack.c.bf16 %v550_v17, %v547_v16  ;;  %vm5452_vm5 = vmpackc.low %vm770_vm4, %vm770_vm4 }
  0xb4   : > { %4194 = vmatpush1.bf16.msra.mxu0 %v4193_v42  ;;  %v490_v43 = vrot.slane %v5427_v41, %v5422_v39 }
  0xb5   : > { %4196 = vmatprep.subr.bf16.mxu0 %v4195_v46  ;;  %v502_v46 = vrot.slane %v5427_v41, %v5432_v44 }
  0xb6   : > { %4226 = vmatpush3.bf16.msra.mxu1 %v4223_v50 }
  0xb7   : > { %4228 = vmatprep.subr.bf16.mxu1 %v4227_v60 }
  0xb8   : > { %4198 = vmatpush1.bf16.msra.mxu0 %v4197_v51 }
  0xb9   : > { %4200 = vmatprep.subr.bf16.mxu0 %v4199_v55  ;;  %v5444_v55 = vsub.s32 2, %v5419_v33 }
  0xba   : > { %4230 = vmatpush3.bf16.msra.mxu1 %v4227_v60 }
  0xbc   : > { %4202 = vmatpush1.bf16.msra.mxu0 %v4201_v61 }
 0x131   : > { %v456_v2 = vpop.xlane.xlu0 %455 }
 0x132   : > { %v460_v3 = vmul.f32 0.0078125, %v456_v2  ;;  %v537_v2 = vld [vmem:[#allocation5 + $0x100] sm:$0xff] }
 0x134   : > { %v5409_v4 = vsub.f32 %v5402_v0, %v460_v3  ;;  %v4203_v3 = vpack.c.bf16 %v545_v63, %v542_v62 }
 0x135   : > { %v458_v5 = vpop.xlane.xlu0 %457 }
 0x136   : > { %v461_v6 = vmul.f32 0.0078125, %v458_v5  ;;  %v464_v7 = vmul.f32 %v5409_v4, %v5409_v4  ;;  %v540_v5 = vld [vmem:[#allocation5 + $0x118] sm:$0xff]  ;;  %4204 = vmatprep.subr.bf16.mxu0 %v4203_v3  ;;  %v491_v45 = vmul.f32 %v490_v43, %v5409_v4  ;;  %v553_v4 = vld [vmem:[%s5838_s3] sm:$0x7] }
 0x137   : > { %v558_v54 = vrot.slane %v553_v4, %v5422_v39  ;;  %v566_v58 = vrot.slane %v553_v4, %v5444_v55  ;;  %v562_v60 = vrot.slane %v553_v4, %v5432_v44 }
 0x138   : > { %v5414_v8 = vsub.f32 %v5405_v1, %v461_v6  ;;  %466 = vadd.xlane.f32.xlu1 %v464_v7  ;;  %v541_v6 = vld [vmem:[#allocation5 + $0x120] sm:$0xff]  ;;  %v544_v7 = vld [vmem:[#allocation5 + $0x138] sm:$0xff] }
 0x139   : > { %v4205_v10 = vpack.c.bf16 %v544_v7, %v541_v6 }
 0x13a   : > { %v465_v9 = vmul.f32 %v5414_v8, %v5414_v8  ;;  %v492_v49 = vmul.f32 %v490_v43, %v5414_v8 }
 0x13b   : > { %4206 = vmatpush1.bf16.msra.mxu0 %v4205_v10 }
 0x13c   : > { %468 = vadd.xlane.f32.xlu1 %v465_v9  ;;  %v4231_v9 = vpack.c.bf16 %v540_v5, %v537_v2  ;;  %4208 = vmatprep.subr.bf16.mxu0 %v4207_v14 }
 0x13e   : > { %4232 = vmatprep.subr.bf16.mxu1 %v4231_v9 }
 0x13f   : > { %4234 = vmatpush3.bf16.msra.mxu1 %v4231_v9  ;;  %4210 = vmatpush1.bf16.msra.mxu0 %v4209_v19 }
 0x140   : > { %4236 = vmatprep.subr.bf16.mxu1 %v4235_v18 }
 0x143   : > { %4238 = vmatpush3.bf16.msra.mxu1 %v4235_v18 }
 0x144   : > { %4240 = vmatprep.subr.bf16.mxu1 %v4239_v22 }
 0x147   : > { %4242 = vmatpush3.bf16.msra.mxu1 %v4239_v22 }
 0x1c5   : > { %v467_v23 = vpop.xlane.xlu1 %466 }
 0x1c6   : > { %v471_v24 = vmul.f32 0.007874016, %v467_v23 }
 0x1c8   : > { %4769 = vrsqrt.f32 %v471_v24  ;;  %vm475_vm0 = vcmp.eq.f32.partialorder %v471_v24, inf  ;;  %v478_v30 = vand.u32 2147483648, %v471_v24  ;;  %vm477_vm1 = vcmp.eq.f32.partialorder %v471_v24, 0.0 }
 0x1c9   : > { %v469_v25 = vpop.xlane.xlu1 %468 }
 0x1ca   : > { %v472_v26 = vmul.f32 0.007874016, %v469_v25 }
 0x1cc   : > { %4771 = vrsqrt.f32 %v472_v26  ;;  %vm482_vm2 = vcmp.eq.f32.partialorder %v472_v26, inf  ;;  %v485_v37 = vand.u32 2147483648, %v472_v26  ;;  %vm484_vm3 = vcmp.eq.f32.partialorder %v472_v26, 0.0 }
 0x1d2   : > { %v4770_v27 = vpop.eup %4769 }
 0x1d3   : > { %v474_v29 = vmul.f32 %v4770_v27, %v471_v24 }
 0x1d5   : > { %v476_v31 = vsel %vm475_vm0, %v471_v24, %v474_v29 }
 0x1d6   : > { %v4772_v32 = vpop.eup %4771  ;;  %v479_v34 = vsel %vm477_vm1, %v478_v30, %v476_v31 }
 0x1d7   : > { %v481_v35 = vmul.f32 %v4772_v32, %v472_v26  ;;  %v493_v36 = vadd.f32 1e-06, %v479_v34  ;;  %v452_v34 = vld [vmem:[%s449_s23] sm:$0x1] }
 0x1d8   : > { %vm453_vm6 = vcmp.eq.f32.partialorder %v452_v34, 0.0 }
 0x1d9   : > { %v483_v38 = vsel %vm482_vm2, %v472_v26, %v481_v35  ;;  %4773 = vrcp.f32 %v493_v36  ;;  %v5108_v35 = vmov 0  }
 0x1da   : > { %v486_v40 = vsel %vm484_vm3, %v485_v37, %v483_v38  ;;  %v1111_v36 = vsel %vm453_vm6, 1, %v5108_v35 }
 0x1db   : > { %v494_v42 = vadd.f32 1e-06, %v486_v40  ;;  %v1115_v37 = vrot.slane %v1111_v36, %v5422_v39 }
 0x1dd   : > { %4775 = vrcp.f32 %v494_v42  ;;  %vm5495_vm7 = vcmp.eq.s32.totalorder %v1115_v37, 1 }
 0x1e3   : > { %v4774_v47 = vpop.eup %4773 }
 0x1e4   : > { %v496_v48 = vmul.f32 %v4774_v47, %v491_v45 }
 0x1e6   : > { %v503_v50 = vadd.f32 %v502_v46, %v496_v48 }
 0x1e7   : > { %v4776_v51 = vpop.eup %4775 }
 0x1e8   : > { %635 = vmatmul.mubr.f32.vlgmr.msra.gmra.mrb[0].mxu0 %v503_v50  ;;  %3959 = vmatprep.mubr.f32.mxu1 %v503_v50  ;;  %v498_v52 = vmul.f32 %v4776_v51, %v492_v49 }
 0x1e9   : > { %640 = vmatprep.mubr.f32.mxu0 %v5104_v59 }
 0x1ea   : > { %v504_v53 = vadd.f32 %v502_v46, %v498_v52 }
 0x1ec   : > { %641 = vmatmul.mubr.f32.gmra.mrb[2].mxu0 %v504_v53  ;;  %3960 = vmatmul.mubr.f32.vlgmr.msra.gmra.mrb[0].mxu1 %v504_v53 }
 0x2bb   : > { %v636_v8 = vpop.f32.mrb[0].mxu0 }
 0x2bc   : > { %v637_v56 = vadd.f32 %v636_v8, %v558_v54  ;;  %v638_v57 = vpop.f32.mrb[1].mxu0 }
 0x2bd   : > { %v639_v5 = vadd.f32 %v638_v57, %v562_v60 }
 0x2be   : > { %724 = vrot.lane.b32.xlu1 %v637_v56, %s5105_s26  ;;  %3966 = vmatprep.mubr.msk.f32.mxu1 %vm770_vm4, %v637_v56 }
 0x2bf   : > { %v642_v61 = vpop.f32.mrb[2].mxu0  ;;  %v3961_v62 = vpop.f32.mrb[0].mxu1 }
 0x2c0   : > { %v719_v63 = vadd.f32 %v3961_v62, %v566_v58  ;;  %v644_v2 = vpop.f32.mrb[3].mxu0  ;;  %v713_v3 = vpop.f32.mrb[1].mxu1  ;;  %v643_v14 = vadd.f32 %v642_v61, %v558_v54 }
 0x2c1   : > { %v645_v6 = vadd.f32 %v644_v2, %v562_v60  ;;  %v714_v7 = vadd.f32 %v713_v3, %v566_v58 }
 0x2c3   : > { %v4267_v9 = vpack.c.bf16 %v719_v63, %v714_v7  ;;  %v4684_v10 = vpack.i.bf16 %v645_v6, %v639_v5  ;;  %v4243_v11 = vpack.c.bf16 %v645_v6, %v639_v5  ;;  %v5456_v13 = vpack.i.bf16 %v719_v63, %v714_v7 }
 0x2c5   : > { %4268 = vmatprep.subr.bf16.mxu0 %v4267_v9  ;;  %4685 = vrot.lane.b32.xlu1 %v4684_v10, %s5106_s2 }
 0x2c6   : > { %4680 = vrot.lane.b32.xlu0 %v4684_v10, %s5105_s26  ;;  %4245 = vmatprep.subr.msk.bf16.mxu1 %vm5452_vm5, %v4243_v11 }
 0x2c7   : > { %4248 = vmatpush3.bf16.xpose.msk.msra.mxu1 %vm5452_vm5, %v4243_v11  ;;  %4270 = vmatpush3.bf16.msra.mxu0 %v4267_v9 }
 0x2c9   : > { %726 = vrot.lane.b32.xlu1 %v643_v14, %s5105_s26 }
 0x2ca   : > { %4690 = vrot.lane.b32.xlu0 %v4684_v10, %s5107_s24 }
 0x2cd   : > { %728 = vrot.lane.b32.xlu1 %v637_v56, %s5106_s2 }
 0x2ce   : > { %730 = vrot.lane.b32.xlu0 %v643_v14, %s5106_s2  ;;  %3967 = vmatmul.mubr.msk.f32.vlgmr.msra.gmra.mrb[2].mxu1 %vm770_vm4, %v643_v14 }
 0x2d1   : > { %732 = vrot.lane.b32.xlu1 %v637_v56, %s5107_s24 }
 0x2d2   : > { %734 = vrot.lane.b32.xlu0 %v643_v14, %s5107_s24 }
 0x330   : > { %v725_v15 = vpop.permute.xlu1 %724 }
 0x331   : > { %3973 = vmatprep.mubr.msk.f32.mxu1 %vm770_vm4, %v725_v15 }
 0x337   : > { %v4686_v16 = vpop.permute.xlu1 %4685 }
 0x338   : > { %v4681_v17 = vpop.permute.xlu0 %4680  ;;  %v4688_v20 = vunpack.i.h.bf16 %v4686_v16  ;;  %v4687_v21 = vunpack.i.l.bf16 %v4686_v16 }
 0x339   : > { %v4683_v18 = vunpack.i.h.bf16 %v4681_v17  ;;  %v4682_v19 = vunpack.i.l.bf16 %v4681_v17 }
 0x33a   : > { %v4255_v23 = vpack.c.bf16 %v4688_v20, %v4687_v21 }
 0x33b   : > { %v4249_v22 = vpack.c.bf16 %v4683_v18, %v4682_v19  ;;  %v727_v25 = vpop.permute.xlu1 %726 }
 0x33c   : > { %v4691_v24 = vpop.permute.xlu0 %4690 }
 0x33d   : > { %4251 = vmatprep.subr.msk.bf16.mxu1 %vm5452_vm5, %v4249_v22  ;;  %v4693_v26 = vunpack.i.h.bf16 %v4691_v24  ;;  %v4692_v27 = vunpack.i.l.bf16 %v4691_v24 }
 0x33e   : > { %4254 = vmatpush3.bf16.xpose.msk.msra.mxu1 %vm5452_vm5, %v4249_v22 }
 0x33f   : > { %4257 = vmatprep.subr.msk.bf16.mxu1 %vm5452_vm5, %v4255_v23  ;;  %v4261_v28 = vpack.c.bf16 %v4693_v26, %v4692_v27  ;;  %v729_v29 = vpop.permute.xlu1 %728 }
 0x340   : > { %v731_v30 = vpop.permute.xlu0 %730 }
 0x343   : > { %v733_v31 = vpop.permute.xlu1 %732 }
 0x344   : > { %v735_v32 = vpop.permute.xlu0 %734 }
 0x345   : > { %3974 = vmatmul.mubr.msk.f32.vlgmr.msra.gmra.mrb[4].mxu1 %vm770_vm4, %v727_v25 }
 0x346   : > { %4260 = vmatpush3.bf16.xpose.msk.msra.mxu1 %vm5452_vm5, %v4255_v23  ;;  %3980 = vmatprep.mubr.msk.f32.mxu1 %vm770_vm4, %v729_v29 }
 0x347   : > { %4263 = vmatprep.subr.msk.bf16.mxu1 %vm5452_vm5, %v4261_v28 }
 0x34d   : > { %3981 = vmatmul.mubr.msk.f32.vlgmr.msra.gmra.mrb[6].mxu1 %vm770_vm4, %v731_v30 }
 0x34e   : > { %4266 = vmatpush3.bf16.xpose.msk.msra.mxu1 %vm5452_vm5, %v4261_v28  ;;  %3987 = vmatprep.mubr.msk.f32.mxu1 %vm770_vm4, %v733_v31 }
 0x355   : > { %3988 = vmatmul.mubr.msk.f32.vlgmr.msra.gmra.mrb[8].mxu1 %vm770_vm4, %v735_v32 }
 0x3a1   : > { %v3968_v38 = vpop.f32.mrb[2].mxu1 }
 0x3a2   : > { %v1104_v42 = vmul.f32 0.17677669, %v3968_v38  ;;  %v845_v43 = vpop.f32.mrb[3].mxu1 }
 0x3a3   : > { %v1103_v45 = vmul.f32 0.17677669, %v845_v43 }
 0x3a4   : > { %v1118_v46 = vsel %vm5495_vm7, -1e+09, %v1104_v42 }
 0x3a5   : > { %v1129_v47 = vsel %vm1125_vm8, %v1118_v46, -inf  ;;  %v1117_v48 = vsel %vm5495_vm7, -1e+09, %v1103_v45 }
 0x3a6   : > { %1130 = vmax.xlane.f32.xlu0 %v1129_v47  ;;  %v1126_v49 = vsel %vm1125_vm8, %v1117_v48, -inf }
 0x3a7   : > { %1127 = vmax.xlane.f32.xlu1 %v1126_v49 }
 0x418   : > { %v3975_v50 = vpop.f32.mrb[4].mxu1 }
 0x419   : > { %v1106_v51 = vmul.f32 0.17677669, %v3975_v50  ;;  %v928_v52 = vpop.f32.mrb[5].mxu1 }
 0x41a   : > { %v1105_v53 = vmul.f32 0.17677669, %v928_v52 }
 0x41b   : > { %v1120_v4 = vsel %vm5495_vm7, -1e+09, %v1106_v51 }
 0x41c   : > { %v1135_v54 = vsel %vm1125_vm8, %v1120_v4, -inf  ;;  %v1119_v8 = vsel %vm5495_vm7, -1e+09, %v1105_v53 }
 0x41d   : > { %1136 = vmax.xlane.f32.xlu0 %v1135_v54  ;;  %v1132_v57 = vsel %vm1125_vm8, %v1119_v8, -inf }
 0x420   : > { %v3982_v56 = vpop.f32.mrb[6].mxu1 }
 0x421   : > { %v1108_v58 = vmul.f32 0.17677669, %v3982_v56  ;;  %1133 = vmax.xlane.f32.xlu0 %v1132_v57  ;;  %v1011_v60 = vpop.f32.mrb[7].mxu1 }
 0x422   : > { %v1107_v61 = vmul.f32 0.17677669, %v1011_v60 }
 0x423   : > { %v1122_v62 = vsel %vm5495_vm7, -1e+09, %v1108_v58 }
 0x424   : > { %v1141_v63 = vsel %vm1125_vm8, %v1122_v62, -inf  ;;  %v1121_v2 = vsel %vm5495_vm7, -1e+09, %v1107_v61 }
 0x425   : > { %1142 = vmax.xlane.f32.xlu0 %v1141_v63  ;;  %v1138_v3 = vsel %vm1125_vm8, %v1121_v2, -inf }
 0x426   : > { %1139 = vmax.xlane.f32.xlu1 %v1138_v3 }
 0x428   : > { %v3989_v5 = vpop.f32.mrb[8].mxu1 }
 0x429   : > { %v1110_v6 = vmul.f32 0.17677669, %v3989_v5  ;;  %v1094_v7 = vpop.f32.mrb[9].mxu1 }
 0x42a   : > { %v1109_v9 = vmul.f32 0.17677669, %v1094_v7 }
 0x42b   : > { %v1124_v10 = vsel %vm5495_vm7, -1e+09, %v1110_v6 }
 0x42c   : > { %v1147_v11 = vsel %vm1125_vm8, %v1124_v10, -inf  ;;  %v1123_v14 = vsel %vm5495_vm7, -1e+09, %v1109_v9 }
 0x42d   : > { %1148 = vmax.xlane.f32.xlu0 %v1147_v11  ;;  %v1144_v15 = vsel %vm1125_vm8, %v1123_v14, -inf }
 0x42e   : > { %1145 = vmax.xlane.f32.xlu1 %v1144_v15 }
 0x433   : > { %v1131_v16 = vpop.xlane.xlu0 %1130 }
 0x434   : > { %v1151_v17 = vsub.f32 %v1118_v46, %v1131_v16  ;;  %v1128_v21 = vpop.xlane.xlu1 %1127 }
 0x435   : > { %v1150_v22 = vsub.f32 %v1117_v48, %v1128_v21 }
 0x436   : > { %v1160_v18 = vmul.f32 1.442695, %v1151_v17 }
 0x437   : > { %v1158_v23 = vmul.f32 1.442695, %v1150_v22 }
 0x438   : > { %4777 = vpow2.f32 %v1160_v18 }
 0x439   : > { %4779 = vpow2.f32 %v1158_v23 }
 0x43f   : > { %4695 = vrot.lane.b32.xlu1 %v5456_v13, %s5105_s26 }
 0x442   : > { %v5525_v19 = vpop.eup %4777 }
 0x443   : > { %v1177_v20 = vsel %vm1125_vm8, %v5525_v19, 0.0  ;;  %v4780_v24 = vpop.eup %4779 }
 0x444   : > { %1178 = vadd.xlane.f32.xlu0 %v1177_v20  ;;  %v1174_v25 = vsel %vm1125_vm8, %v4780_v24, 0.0 }
 0x463   : > { %1175 = vadd.xlane.f32.xlu1 %v1174_v25 }
 0x4aa   : > { %v1137_v26 = vpop.xlane.xlu0 %1136 }
 0x4ab   : > { %v1153_v27 = vsub.f32 %v1120_v4, %v1137_v26 }
 0x4ad   : > { %v1164_v28 = vmul.f32 1.442695, %v1153_v27 }
 0x4ae   : > { %v1134_v29 = vpop.xlane.xlu0 %1133 }
 0x4af   : > { %4781 = vpow2.f32 %v1164_v28  ;;  %v1152_v30 = vsub.f32 %v1119_v8, %v1134_v29 }
 0x4b1   : > { %v1162_v31 = vmul.f32 1.442695, %v1152_v30 }
 0x4b2   : > { %v1143_v32 = vpop.xlane.xlu0 %1142 }
 0x4b3   : > { %4783 = vpow2.f32 %v1162_v31  ;;  %v1155_v34 = vsub.f32 %v1122_v62, %v1143_v32  ;;  %v1140_v35 = vpop.xlane.xlu1 %1139 }
 0x4b4   : > { %v1154_v36 = vsub.f32 %v1121_v2, %v1140_v35 }
 0x4b5   : > { %v1168_v37 = vmul.f32 1.442695, %v1155_v34 }
 0x4b6   : > { %v1166_v38 = vmul.f32 1.442695, %v1154_v36 }
 0x4b7   : > { %4785 = vpow2.f32 %v1168_v37 }
 0x4b8   : > { %4787 = vpow2.f32 %v1166_v38 }
 0x4b9   : > { %v4782_v42 = vpop.eup %4781 }
 0x4ba   : > { %v1149_v43 = vpop.xlane.xlu0 %1148  ;;  %v1183_v45 = vsel %vm1125_vm8, %v4782_v42, 0.0 }
 0x4bb   : > { %v1157_v46 = vsub.f32 %v1124_v10, %v1149_v43  ;;  %1184 = vadd.xlane.f32.xlu0 %v1183_v45  ;;  %v1146_v47 = vpop.xlane.xlu1 %1145  ;;  %v1571_v43 = vld [vmem:[#allocation7 + $0x8] sm:$0xff]  ;;  %v1572_v45 = vld [vmem:[#allocation7 + $0x10] sm:$0xff] }
 0x4bc   : > { %v1156_v48 = vsub.f32 %v1123_v14, %v1146_v47  ;;  %v1573_v47 = vld [vmem:[#allocation7 + $0x18] sm:$0xff] }
 0x4bd   : > { %v4784_v49 = vpop.eup %4783  ;;  %v1172_v50 = vmul.f32 1.442695, %v1157_v46 }
 0x4be   : > { %v1170_v51 = vmul.f32 1.442695, %v1156_v48  ;;  %v1180_v52 = vsel %vm1125_vm8, %v4784_v49, 0.0  ;;  %v4287_v48 = vpack.c.bf16 %v1573_v47, %v1572_v45 }
 0x4bf   : > { %4789 = vpow2.f32 %v1172_v50  ;;  %1181 = vadd.xlane.f32.xlu1 %v1180_v52  ;;  %v4696_v53 = vpop.permute.xlu1 %4695  ;;  %v1575_v50 = vld [vmem:[#allocation7 + $0x28] sm:$0xff]  ;;  %v1576_v52 = vld [vmem:[#allocation7 + $0x30] sm:$0xff] }
 0x4c0   : > { %4791 = vpow2.f32 %v1170_v51  ;;  %v4698_v4 = vunpack.i.h.bf16 %v4696_v53  ;;  %v4697_v54 = vunpack.i.l.bf16 %v4696_v53  ;;  %v1577_v53 = vld [vmem:[#allocation7 + $0x38] sm:$0xff] }
 0x4c1   : > { %v4786_v8 = vpop.eup %4785 }
 0x4c2   : > { %v4788_v56 = vpop.eup %4787  ;;  %v4271_v57 = vpack.c.bf16 %v4698_v4, %v4697_v54  ;;  %v1189_v58 = vsel %vm1125_vm8, %v4786_v8, 0.0  ;;  %v4295_v4 = vpack.c.bf16 %v1577_v53, %v1576_v52  ;;  %v1718_v53 = vld [vmem:[#allocation8 + $0x8] sm:$0xff] }
 0x4c3   : > { %1190 = vadd.xlane.f32.xlu0 %v1189_v58  ;;  %v1186_v60 = vsel %vm1125_vm8, %v4788_v56, 0.0 }
 0x4c4   : > { %1187 = vadd.xlane.f32.xlu1 %v1186_v60  ;;  %4272 = vmatprep.subr.bf16.mxu1 %v4271_v57  ;;  %v1580_v60 = vld [vmem:[#allocation7 + $0x50] sm:$0xff] }
 0x4c5   : > { %4274 = vmatpush3.bf16.msra.mxu1 %v4271_v57  ;;  %v1579_v57 = vld [vmem:[#allocation7 + $0x48] sm:$0xff] }
 0x4c9   : > { %v4790_v61 = vpop.eup %4789 }
 0x4ca   : > { %v4792_v62 = vpop.eup %4791  ;;  %v1195_v63 = vsel %vm1125_vm8, %v4790_v61, 0.0 }
 0x4cb   : > { %1196 = vadd.xlane.f32.xlu0 %v1195_v63  ;;  %v1192_v2 = vsel %vm1125_vm8, %v4792_v62, 0.0 }
 0x4cc   : > { %1193 = vadd.xlane.f32.xlu1 %v1192_v2  ;;  %v1583_v2 = vld [vmem:[#allocation7 + $0x68] sm:$0xff] }
 0x4d1   : > { %v1179_v3 = vpop.xlane.xlu0 %1178 }
 0x4d2   : > { %4793 = vrcp.f32 %v1179_v3 }
 0x4dc   : > { %v4794_v6 = vpop.eup %4793 }
 0x4dd   : > { %4705 = vrot.lane.b32.xlu1 %v5456_v13, %s5107_s24  ;;  %v1201_v10 = vmul.f32 %v4794_v6, %v5525_v19 }
 0x4e1   : > { %4700 = vrot.lane.b32.xlu0 %v5456_v13, %s5106_s2 }
 0x4f0   : > { %v1176_v5 = vpop.xlane.xlu1 %1175 }
 0x4f1   : > { %4795 = vrcp.f32 %v1176_v5 }
 0x4fb   : > { %v4796_v7 = vpop.eup %4795 }
 0x4fc   : > { %v1199_v9 = vmul.f32 %v4796_v7, %v4780_v24  ;;  %v1584_v7 = vld [vmem:[#allocation7 + $0x70] sm:$0xff] }
 0x4fe   : > { %3994 = vmatprep.mubr.msk.f32.mxu0 %vm1125_vm8, %v1199_v9  ;;  %v1585_v9 = vld [vmem:[#allocation7 + $0x78] sm:$0xff] }
 0x4ff   : > { %3995 = vmatmul.mubr.msk.f32.vlgmr.msra.gmra.mrb[4].mxu0 %vm1125_vm8, %v1201_v10 }
 0x548   : > { %v1185_v11 = vpop.xlane.xlu0 %1184 }
 0x549   : > { %4797 = vrcp.f32 %v1185_v11  ;;  %v4311_v11 = vpack.c.bf16 %v1585_v9, %v1584_v7  ;;  %v1725_v7 = vld [vmem:[#allocation8 + $0x40] sm:$0xff]  ;;  %v1727_v9 = vld [vmem:[#allocation8 + $0x50] sm:$0xff] }
 0x54c   : > { %v1182_v14 = vpop.xlane.xlu1 %1181 }
 0x54d   : > { %4799 = vrcp.f32 %v1182_v14 }
 0x550   : > { %v1191_v13 = vpop.xlane.xlu0 %1190 }
 0x551   : > { %v1188_v15 = vpop.xlane.xlu1 %1187 }
 0x552   : > { %4801 = vrcp.f32 %v1188_v15 }
 0x553   : > { %v4798_v16 = vpop.eup %4797  ;;  %4803 = vrcp.f32 %v1191_v13 }
 0x554   : > { %v1205_v21 = vmul.f32 %v4798_v16, %v4782_v42  ;;  %v1570_v42 = vld [vmem:[#allocation7] sm:$0xff] }
 0x555   : > { %v4283_v46 = vpack.c.bf16 %v1571_v43, %v1570_v42 }
 0x557   : > { %v4800_v17 = vpop.eup %4799 }
 0x558   : > { %v1197_v18 = vpop.xlane.xlu0 %1196  ;;  %v1203_v20 = vmul.f32 %v4800_v17, %v4784_v49  ;;  %v1574_v49 = vld [vmem:[#allocation7 + $0x20] sm:$0xff] }
 0x559   : > { %4805 = vrcp.f32 %v1197_v18  ;;  %v1194_v22 = vpop.xlane.xlu1 %1193  ;;  %v4291_v51 = vpack.c.bf16 %v1575_v50, %v1574_v49 }
 0x55a   : > { %4807 = vrcp.f32 %v1194_v22  ;;  %4001 = vmatprep.mubr.msk.f32.mxu1 %vm1125_vm8, %v1203_v20 }
 0x55b   : > { %4002 = vmatmul.mubr.msk.f32.vlgmr.msra.gmra.mrb[10].mxu1 %vm1125_vm8, %v1205_v21 }
 0x55c   : > { %v4802_v19 = vpop.eup %4801  ;;  %v4701_v23 = vpop.permute.xlu0 %4700 }
 0x55d   : > { %v4703_v24 = vunpack.i.h.bf16 %v4701_v23  ;;  %v4702_v25 = vunpack.i.l.bf16 %v4701_v23  ;;  %v4706_v26 = vpop.permute.xlu1 %4705  ;;  %v1207_v27 = vmul.f32 %v4802_v19, %v4788_v56  ;;  %v4804_v31 = vpop.eup %4803  ;;  %v1578_v56 = vld [vmem:[#allocation7 + $0x40] sm:$0xff] }
 0x55e   : > { %v4708_v28 = vunpack.i.h.bf16 %v4706_v26  ;;  %v4707_v29 = vunpack.i.l.bf16 %v4706_v26  ;;  %v1209_v35 = vmul.f32 %v4804_v31, %v4786_v8  ;;  %v4299_v58 = vpack.c.bf16 %v1579_v57, %v1578_v56  ;;  %v1719_v56 = vld [vmem:[#allocation8 + $0x10] sm:$0xff] }
 0x55f   : > { %v4275_v30 = vpack.c.bf16 %v4703_v24, %v4702_v25  ;;  %4008 = vmatprep.mubr.msk.f32.mxu0 %vm1125_vm8, %v1207_v27 }
 0x560   : > { %v4279_v32 = vpack.c.bf16 %v4708_v28, %v4707_v29 }
 0x561   : > { %4276 = vmatprep.subr.bf16.mxu0 %v4275_v30 }
 0x562   : > { %4278 = vmatpush3.bf16.msra.mxu0 %v4275_v30  ;;  %4280 = vmatprep.subr.bf16.mxu1 %v4279_v32 }
 0x563   : > { %v4806_v34 = vpop.eup %4805  ;;  %4282 = vmatpush3.bf16.msra.mxu1 %v4279_v32  ;;  %4284 = vmatprep.subr.bf16.mxu0 %v4283_v46 }
 0x564   : > { %v4808_v36 = vpop.eup %4807  ;;  %v1213_v38 = vmul.f32 %v4806_v34, %v4790_v61  ;;  %v1581_v61 = vld [vmem:[#allocation7 + $0x58] sm:$0xff] }
 0x565   : > { %4009 = vmatmul.mubr.msk.f32.vlgmr.msra.gmra.mrb[6].mxu0 %vm1125_vm8, %v1209_v35  ;;  %v1211_v37 = vmul.f32 %v4808_v36, %v4792_v62  ;;  %v1582_v62 = vld [vmem:[#allocation7 + $0x60] sm:$0xff]  ;;  %v4303_v63 = vpack.c.bf16 %v1581_v61, %v1580_v60  ;;  %v1665_v35 = vsub.s32 4, %v5419_v33  ;;  %v1724_v60 = vld [vmem:[#allocation8 + $0x38] sm:$0xff] }
 0x566   : > { %4286 = vmatpush3.bf16.msra.mxu0 %v4283_v46  ;;  %v4307_v3 = vpack.c.bf16 %v1583_v2, %v1582_v62  ;;  %v1721_v62 = vld [vmem:[#allocation8 + $0x20] sm:$0xff] }
 0x567   : > { %4015 = vmatprep.mubr.msk.f32.mxu1 %vm1125_vm8, %v1211_v37  ;;  %4288 = vmatprep.subr.bf16.mxu0 %v4287_v48  ;;  %v1666_v36 = vrot.slane %v5427_v41, %v1665_v35 }
 0x568   : > { %4016 = vmatmul.mubr.msk.f32.vlgmr.msra.gmra.mrb[12].mxu1 %vm1125_vm8, %v1213_v38 }
 0x569   : > { %1825 = vmatprep.mubr.f32.mxu1 %v5104_v59 }
 0x56a   : > { %4290 = vmatpush3.bf16.msra.mxu0 %v4287_v48 }
 0x56b   : > { %4292 = vmatprep.subr.bf16.mxu0 %v4291_v51 }
 0x56e   : > { %4294 = vmatpush3.bf16.msra.mxu0 %v4291_v51 }
 0x56f   : > { %4296 = vmatprep.subr.bf16.mxu0 %v4295_v4 }
 0x572   : > { %4298 = vmatpush3.bf16.msra.mxu0 %v4295_v4  ;;  %v1720_v4 = vld [vmem:[#allocation8 + $0x18] sm:$0xff] }
 0x573   : > { %4300 = vmatprep.subr.bf16.mxu0 %v4299_v58 }
 0x576   : > { %4302 = vmatpush3.bf16.msra.mxu0 %v4299_v58  ;;  %v1722_v58 = vld [vmem:[#allocation8 + $0x28] sm:$0xff] }
 0x577   : > { %4304 = vmatprep.subr.bf16.mxu0 %v4303_v63  ;;  %v4319_v61 = vpack.c.bf16 %v1724_v60, %v1722_v58  ;;  %v1844_v58 = vld [vmem:[#allocation10 + $0x10] sm:$0xff]  ;;  %v1845_v60 = vld [vmem:[#allocation10 + $0x18] sm:$0xff] }
 0x57a   : > { %4306 = vmatpush3.bf16.msra.mxu0 %v4303_v63  ;;  %v1723_v63 = vld [vmem:[#allocation8 + $0x30] sm:$0xff] }
 0x57b   : > { %4308 = vmatprep.subr.bf16.mxu0 %v4307_v3  ;;  %v4321_v2 = vpack.c.bf16 %v1723_v63, %v1721_v62  ;;  %v1863_v62 = vld [vmem:[#allocation10 + $0xa8] sm:$0xff]  ;;  %v4353_v63 = vpack.c.bf16 %v1845_v60, %v1844_v58 }
 0x57e   : > { %4310 = vmatpush3.bf16.msra.mxu0 %v4307_v3  ;;  %v1726_v3 = vld [vmem:[#allocation8 + $0x48] sm:$0xff] }
 0x57f   : > { %4312 = vmatprep.subr.bf16.mxu0 %v4311_v11 }
 0x582   : > { %4314 = vmatpush3.bf16.msra.mxu0 %v4311_v11  ;;  %v1730_v11 = vld [vmem:[#allocation8 + $0x68] sm:$0xff] }
 0x5d2   : > { %v3996_v54 = vpop.f32.mrb[4].mxu0 }
 0x5d3   : > { %v1286_v8 = vpop.f32.mrb[5].mxu0 }
 0x62e   : > { %v4003_v5 = vpop.f32.mrb[10].mxu1 }
 0x62f   : > { %v1367_v6 = vpop.f32.mrb[11].mxu1 }
 0x630   : > { %v4709_v10 = vpack.i.bf16 %v4003_v5, %v1367_v6  ;;  %v1728_v5 = vld [vmem:[#allocation8 + $0x58] sm:$0xff] }
 0x631   : > { %v4323_v6 = vpack.c.bf16 %v1728_v5, %v1726_v3  ;;  %v1846_v3 = vld [vmem:[#allocation10 + $0x20] sm:$0xff]  ;;  %v1847_v5 = vld [vmem:[#allocation10 + $0x28] sm:$0xff] }
 0x632   : > { %4710 = vrot.lane.b32.xlu1 %v4709_v10, %s5107_s24  ;;  %v4325_v10 = vpack.c.bf16 %v1727_v9, %v1725_v7  ;;  %v1865_v7 = vld [vmem:[#allocation10 + $0xb8] sm:$0xff]  ;;  %v4357_v9 = vpack.c.bf16 %v1847_v5, %v1846_v3  ;;  %v1854_v3 = vld [vmem:[#allocation10 + $0x60] sm:$0xff] }
 0x638   : > { %v4010_v14 = vpop.f32.mrb[6].mxu0 }
 0x639   : > { %v1448_v15 = vpop.f32.mrb[7].mxu0 }
 0x63a   : > { %v4714_v13 = vpack.i.bf16 %v4010_v14, %v1448_v15  ;;  %v1732_v14 = vld [vmem:[#allocation8 + $0x78] sm:$0xff] }
 0x63b   : > { %v4017_v16 = vpop.f32.mrb[12].mxu1  ;;  %v4327_v15 = vpack.c.bf16 %v1732_v14, %v1730_v11  ;;  %v1848_v11 = vld [vmem:[#allocation10 + $0x30] sm:$0xff]  ;;  %v1849_v14 = vld [vmem:[#allocation10 + $0x38] sm:$0xff] }
 0x63c   : > { %4715 = vrot.lane.b32.xlu1 %v4714_v13, %s5106_s2  ;;  %v1529_v17 = vpop.f32.mrb[13].mxu1  ;;  %v1729_v13 = vld [vmem:[#allocation8 + $0x60] sm:$0xff] }
 0x63d   : > { %v4719_v18 = vpack.i.bf16 %v4017_v16, %v1529_v17  ;;  %v1731_v16 = vld [vmem:[#allocation8 + $0x70] sm:$0xff] }
 0x63e   : > { %v4329_v17 = vpack.c.bf16 %v1731_v16, %v1729_v13  ;;  %v1867_v13 = vld [vmem:[#allocation10 + $0xc8] sm:$0xff]  ;;  %v4361_v16 = vpack.c.bf16 %v1849_v14, %v1848_v11  ;;  %v1749_v11 = vld [vmem:[%s5842_s7] sm:$0x3] }
 0x63f   : > { %4720 = vrot.lane.b32.xlu0 %v4719_v18, %s5105_s26  ;;  %v1734_v18 = vld [vmem:[#allocation8 + $0x88] sm:$0xff]  ;;  %v1754_v14 = vrot.slane %v1749_v11, %v5422_v39 }
 0x6a4   : > { %v4711_v20 = vpop.permute.xlu1 %4710 }
 0x6a5   : > { %v4713_v21 = vunpack.i.h.bf16 %v4711_v20  ;;  %v4712_v22 = vunpack.i.l.bf16 %v4711_v20  ;;  %v1736_v20 = vld [vmem:[#allocation8 + $0x98] sm:$0xff] }
 0x6a7   : > { %v1563_v26 = vsel %vm770_vm4, %v3996_v54, %v4713_v21  ;;  %v1562_v29 = vsel %vm770_vm4, %v1286_v8, %v4712_v22  ;;  %v4315_v54 = vpack.c.bf16 %v1720_v4, %v1718_v53  ;;  %v1717_v8 = vld [vmem:[#allocation8] sm:$0xff]  ;;  %v4331_v21 = vpack.c.bf16 %v1736_v20, %v1734_v18  ;;  %v1843_v4 = vld [vmem:[#allocation10 + $0x8] sm:$0xff] }
 0x6a8   : > { %v4317_v57 = vpack.c.bf16 %v1719_v56, %v1717_v8  ;;  %v1733_v22 = vld [vmem:[#allocation8 + $0x80] sm:$0xff]  ;;  %v1861_v8 = vld [vmem:[#allocation10 + $0x98] sm:$0xff]  ;;  %v1851_v20 = vld [vmem:[#allocation10 + $0x48] sm:$0xff] }
 0x6a9   : > { %4316 = vmatprep.subr.bf16.mxu1 %v4315_v54  ;;  %v1860_v54 = vld [vmem:[#allocation10 + $0x90] sm:$0xff]  ;;  %v1850_v18 = vld [vmem:[#allocation10 + $0x40] sm:$0xff] }
 0x6aa   : > { %4318 = vmatpush1.bf16.msra.mxu1 %v4317_v57  ;;  %v4351_v57 = vpack.c.bf16 %v1861_v8, %v1860_v54  ;;  %v1713_v54 = vsub.s32 3, %v5419_v33 }
 0x6ab   : > { %4320 = vmatprep.subr.bf16.mxu1 %v4319_v61  ;;  %v1862_v61 = vld [vmem:[#allocation10 + $0xa0] sm:$0xff] }
 0x6ae   : > { %v4716_v19 = vpop.permute.xlu1 %4715  ;;  %4322 = vmatpush1.bf16.msra.mxu1 %v4321_v2  ;;  %v4355_v2 = vpack.c.bf16 %v1863_v62, %v1862_v61 }
 0x6af   : > { %v4718_v23 = vunpack.i.h.bf16 %v4716_v19  ;;  %v4717_v24 = vunpack.i.l.bf16 %v4716_v19  ;;  %4324 = vmatprep.subr.bf16.mxu1 %v4323_v6  ;;  %v1735_v19 = vld [vmem:[#allocation8 + $0x90] sm:$0xff] }
 0x6b0   : > { %v1864_v6 = vld [vmem:[#allocation10 + $0xb0] sm:$0xff] }
 0x6b1   : > { %v4721_v25 = vpop.permute.xlu0 %4720  ;;  %v1565_v30 = vsel %vm1564_vm9, %v1562_v29, %v4717_v24  ;;  %v1566_v31 = vsel %vm1564_vm9, %v1563_v26, %v4718_v23  ;;  %v4333_v23 = vpack.c.bf16 %v1735_v19, %v1733_v22  ;;  %v1738_v24 = vld [vmem:[#allocation8 + $0xa8] sm:$0xff]  ;;  %v1737_v26 = vld [vmem:[#allocation8 + $0xa0] sm:$0xff]  ;;  %v1869_v22 = vld [vmem:[#allocation10 + $0xd8] sm:$0xff]  ;;  %v4365_v19 = vpack.c.bf16 %v1851_v20, %v1850_v18 }
 0x6b2   : > { %v4723_v27 = vunpack.i.h.bf16 %v4721_v25  ;;  %v4722_v28 = vunpack.i.l.bf16 %v4721_v25  ;;  %4326 = vmatpush1.bf16.msra.mxu1 %v4325_v10  ;;  %v1740_v25 = vld [vmem:[#allocation8 + $0xb8] sm:$0xff]  ;;  %v1742_v29 = vld [vmem:[#allocation8 + $0xc8] sm:$0xff]  ;;  %v4359_v10 = vpack.c.bf16 %v1865_v7, %v1864_v6  ;;  %v1872_v6 = vld [vmem:[#allocation10 + $0xf0] sm:$0xff] }
 0x6b3   : > { %4328 = vmatprep.subr.bf16.mxu1 %v4327_v15  ;;  %v1866_v15 = vld [vmem:[#allocation10 + $0xc0] sm:$0xff] }
 0x6b4   : > { %v1568_v32 = vsel %vm1567_vm10, %v1565_v30, %v4722_v28  ;;  %v1569_v34 = vsel %vm1567_vm10, %v1566_v31, %v4723_v27  ;;  %v4335_v27 = vpack.c.bf16 %v1740_v25, %v1738_v24  ;;  %v1739_v28 = vld [vmem:[#allocation8 + $0xb0] sm:$0xff]  ;;  %v1744_v30 = vld [vmem:[#allocation8 + $0xd8] sm:$0xff] }
 0x6b5   : > { %4050 = vmatprep.mubr.f32.mxu0 %v1568_v32  ;;  %v4337_v31 = vpack.c.bf16 %v1739_v28, %v1737_v26  ;;  %v4339_v32 = vpack.c.bf16 %v1744_v30, %v1742_v29  ;;  %v1852_v24 = vld [vmem:[#allocation10 + $0x50] sm:$0xff]  ;;  %v1853_v25 = vld [vmem:[#allocation10 + $0x58] sm:$0xff]  ;;  %v1870_v26 = vld [vmem:[#allocation10 + $0xe0] sm:$0xff] }
 0x6b6   : > { %4051 = vmatmul.mubr.f32.vlgmr.msra.gmra.mrb[8].mxu0 %v1569_v34  ;;  %4330 = vmatpush1.bf16.msra.mxu1 %v4329_v17  ;;  %v1741_v34 = vld [vmem:[#allocation8 + $0xc0] sm:$0xff]  ;;  %v4363_v17 = vpack.c.bf16 %v1867_v13, %v1866_v15  ;;  %v4369_v28 = vpack.c.bf16 %v1853_v25, %v1852_v24  ;;  %v1758_v15 = vrot.slane %v1749_v11, %v5432_v44  ;;  %v2019_v11 = vld [vmem:[#allocation5 + $0x1d8] sm:$0xff] }
 0x6b7   : > { %4332 = vmatprep.subr.bf16.mxu1 %v4331_v21  ;;  %v1868_v21 = vld [vmem:[#allocation10 + $0xd0] sm:$0xff] }
 0x6ba   : > { %4334 = vmatpush1.bf16.msra.mxu1 %v4333_v23  ;;  %v4367_v23 = vpack.c.bf16 %v1869_v22, %v1868_v21 }
 0x6bb   : > { %4336 = vmatprep.subr.bf16.mxu1 %v4335_v27  ;;  %v1871_v27 = vld [vmem:[#allocation10 + $0xe8] sm:$0xff] }
 0x6bc   : > { %v4371_v29 = vpack.c.bf16 %v1871_v27, %v1870_v26  ;;  %v1953_v27 = vsub.s32 5, %v5419_v33 }
 0x6be   : > { %4338 = vmatpush1.bf16.msra.mxu1 %v4337_v31 }
 0x6bf   : > { %4340 = vmatprep.subr.bf16.mxu1 %v4339_v32 }
 0x789   : > { %v4052_v37 = vpop.f32.mrb[8].mxu0 }
 0x78a   : > { %v1662_v38 = vadd.f32 %v4052_v37, %v5405_v1  ;;  %v1652_v42 = vpop.f32.mrb[9].mxu0  ;;  %v1746_v37 = vld [vmem:[#allocation8 + $0xe8] sm:$0xff] }
 0x78b   : > { %v1661_v43 = vadd.f32 %v1652_v42, %v5402_v0 }
 0x78c   : > { %v5565_v45 = vadd.f32 %v1666_v36, %v1662_v38  ;;  %v1748_v38 = vld [vmem:[#allocation8 + $0xf8] sm:$0xff] }
 0x78d   : > { %v5567_v46 = vadd.f32 %v1666_v36, %v1661_v43  ;;  %v1743_v36 = vld [vmem:[#allocation8 + $0xd0] sm:$0xff]  ;;  %v4343_v43 = vpack.c.bf16 %v1748_v38, %v1746_v37 }
 0x78e   : > { %1671 = vadd.xlane.f32.xlu0 %v5565_v45  ;;  %v4341_v42 = vpack.c.bf16 %v1743_v36, %v1741_v34 }
 0x78f   : > { %1669 = vadd.xlane.f32.xlu1 %v5567_v46 }
 0x790   : > { %4342 = vmatpush1.bf16.msra.mxu1 %v4341_v42 }
 0x791   : > { %4344 = vmatprep.subr.bf16.mxu1 %v4343_v43 }
 0x81b   : > { %v1672_v47 = vpop.xlane.xlu0 %1671 }
 0x81c   : > { %v1670_v48 = vpop.xlane.xlu1 %1669  ;;  %v1674_v49 = vmul.f32 0.0078125, %v1672_v47  ;;  %v1745_v47 = vld [vmem:[#allocation8 + $0xe0] sm:$0xff] }
 0x81d   : > { %v1673_v50 = vmul.f32 0.0078125, %v1670_v48  ;;  %v1747_v48 = vld [vmem:[#allocation8 + $0xf0] sm:$0xff] }
 0x81e   : > { %v5575_v1 = vsub.f32 %v5565_v45, %v1674_v49  ;;  %v4345_v49 = vpack.c.bf16 %v1747_v48, %v1745_v47 }
 0x81f   : > { %v5572_v51 = vsub.f32 %v5567_v46, %v1673_v50  ;;  %v1858_v50 = vld [vmem:[#allocation10 + $0x80] sm:$0xff] }
 0x820   : > { %v1678_v52 = vmul.f32 %v5575_v1, %v5575_v1  ;;  %4346 = vmatpush1.bf16.msra.mxu1 %v4345_v49 }
 0x821   : > { %v1677_v0 = vmul.f32 %v5572_v51, %v5572_v51 }
 0x823   : > { %1679 = vadd.xlane.f32.xlu0 %v1677_v0  ;;  %v1859_v0 = vld [vmem:[#allocation10 + $0x88] sm:$0xff] }
 0x824   : > { %v4347_v53 = vpack.c.bf16 %v1859_v0, %v1858_v50 }
 0x826   : > { %4348 = vmatprep.subr.bf16.mxu0 %v4347_v53 }
 0x827   : > { %1681 = vadd.xlane.f32.xlu0 %v1678_v52  ;;  %v1842_v52 = vld [vmem:[#allocation10] sm:$0xff] }
 0x828   : > { %v4349_v56 = vpack.c.bf16 %v1843_v4, %v1842_v52  ;;  %v1702_v4 = vrot.slane %v5427_v41, %v5444_v55 }
 0x82a   : > { %4350 = vmatpush3.bf16.msra.mxu0 %v4349_v56  ;;  %v1703_v8 = vmul.f32 %v1702_v4, %v5572_v51  ;;  %v1714_v56 = vrot.slane %v5427_v41, %v1713_v54  ;;  %v1704_v60 = vmul.f32 %v1702_v4, %v5575_v1  ;;  %v1855_v51 = vld [vmem:[#allocation10 + $0x68] sm:$0xff]  ;;  %v1873_v41 = vld [vmem:[#allocation10 + $0xf8] sm:$0xff] }
 0x82b   : > { %4352 = vmatprep.subr.bf16.mxu0 %v4351_v57  ;;  %v4373_v5 = vpack.c.bf16 %v1855_v51, %v1854_v3  ;;  %v4375_v7 = vpack.c.bf16 %v1873_v41, %v1872_v6  ;;  %v2009_v4 = vld [vmem:[#allocation5 + $0x188] sm:$0xff]  ;;  %v2014_v51 = vld [vmem:[#allocation5 + $0x1b0] sm:$0xff] }
 0x82c   : > { %v2013_v3 = vld [vmem:[#allocation5 + $0x1a8] sm:$0xff] }
 0x82e   : > { %4354 = vmatpush3.bf16.msra.mxu0 %v4353_v63 }
 0x82f   : > { %4356 = vmatprep.subr.bf16.mxu0 %v4355_v2 }
 0x832   : > { %4358 = vmatpush3.bf16.msra.mxu0 %v4357_v9  ;;  %v1856_v9 = vld [vmem:[#allocation10 + $0x70] sm:$0xff] }
 0x833   : > { %4360 = vmatprep.subr.bf16.mxu0 %v4359_v10  ;;  %v1857_v10 = vld [vmem:[#allocation10 + $0x78] sm:$0xff] }
 0x834   : > { %v4377_v1 = vpack.c.bf16 %v1857_v10, %v1856_v9  ;;  %v2024_v9 = vld [vmem:[#allocation5 + $0x200] sm:$0xff] }
 0x835   : > { %v2016_v10 = vld [vmem:[#allocation5 + $0x1c0] sm:$0xff] }
 0x836   : > { %4362 = vmatpush3.bf16.msra.mxu0 %v4361_v16 }
 0x837   : > { %4364 = vmatprep.subr.bf16.mxu0 %v4363_v17 }
 0x83a   : > { %4366 = vmatpush3.bf16.msra.mxu0 %v4365_v19 }
 0x83b   : > { %4368 = vmatprep.subr.bf16.mxu0 %v4367_v23 }
 0x83e   : > { %4370 = vmatpush3.bf16.msra.mxu0 %v4369_v28 }
 0x83f   : > { %4372 = vmatprep.subr.bf16.mxu0 %v4371_v29 }
 0x842   : > { %4374 = vmatpush3.bf16.msra.mxu0 %v4373_v5  ;;  %v2017_v5 = vld [vmem:[#allocation5 + $0x1c8] sm:$0xff] }
 0x843   : > { %4376 = vmatprep.subr.bf16.mxu0 %v4375_v7  ;;  %v4385_v41 = vpack.c.bf16 %v2017_v5, %v2014_v51  ;;  %v2021_v7 = vld [vmem:[#allocation5 + $0x1e8] sm:$0xff]  ;;  %v2054_v51 = vld [vmem:[#allocation5 + $0x2f0] sm:$0xff] }
 0x844   : > { %v2046_v5 = vld [vmem:[#allocation5 + $0x2b0] sm:$0xff] }
 0x846   : > { %4378 = vmatpush3.bf16.msra.mxu0 %v4377_v1  ;;  %v4387_v1 = vpack.c.bf16 %v2024_v9, %v2021_v7  ;;  %v2050_v7 = vld [vmem:[#allocation5 + $0x2d0] sm:$0xff]  ;;  %v2053_v9 = vld [vmem:[#allocation5 + $0x2e8] sm:$0xff] }
 0x8b0   : > { %v1680_v30 = vpop.xlane.xlu0 %1679 }
 0x8b1   : > { %v1683_v31 = vmul.f32 0.007874016, %v1680_v30 }
 0x8b3   : > { %4809 = vrsqrt.f32 %v1683_v31  ;;  %vm1687_vm11 = vcmp.eq.f32.partialorder %v1683_v31, inf  ;;  %v1690_v38 = vand.u32 2147483648, %v1683_v31  ;;  %vm1689_vm12 = vcmp.eq.f32.partialorder %v1683_v31, 0.0 }
 0x8b4   : > { %v1682_v32 = vpop.xlane.xlu0 %1681 }
 0x8b5   : > { %v1684_v34 = vmul.f32 0.007874016, %v1682_v32 }
 0x8b7   : > { %4811 = vrsqrt.f32 %v1684_v34  ;;  %vm1694_vm13 = vcmp.eq.f32.partialorder %v1684_v34, inf  ;;  %v1697_v50 = vand.u32 2147483648, %v1684_v34  ;;  %vm1696_vm14 = vcmp.eq.f32.partialorder %v1684_v34, 0.0 }
 0x8bd   : > { %v4810_v36 = vpop.eup %4809 }
 0x8be   : > { %v1686_v37 = vmul.f32 %v4810_v36, %v1683_v31 }
 0x8c0   : > { %v1688_v42 = vsel %vm1687_vm11, %v1683_v31, %v1686_v37  ;;  %v4873_v31 = vld [vmem:[%s5843_s8] sm:$0x3f] }
 0x8c1   : > { %v4812_v43 = vpop.eup %4811  ;;  %v1691_v47 = vsel %vm1689_vm12, %v1690_v38, %v1688_v42  ;;  %v1954_v32 = vrot.slane %v4873_v31, %v1953_v27  ;;  %v2031_v31 = vld [vmem:[#allocation5 + $0x238] sm:$0xff] }
 0x8c2   : > { %v1693_v48 = vmul.f32 %v4812_v43, %v1684_v34  ;;  %v1705_v49 = vadd.f32 1e-06, %v1691_v47 }
 0x8c4   : > { %v1695_v0 = vsel %vm1694_vm13, %v1684_v34, %v1693_v48  ;;  %4813 = vrcp.f32 %v1705_v49 }
 0x8c5   : > { %v1698_v52 = vsel %vm1696_vm14, %v1697_v50, %v1695_v0 }
 0x8c6   : > { %v1706_v53 = vadd.f32 1e-06, %v1698_v52 }
 0x8c8   : > { %4815 = vrcp.f32 %v1706_v53 }
 0x8ce   : > { %v4814_v57 = vpop.eup %4813 }
 0x8cf   : > { %v1708_v58 = vmul.f32 %v4814_v57, %v1703_v8  ;;  %v2012_v8 = vld [vmem:[#allocation5 + $0x1a0] sm:$0xff] }
 0x8d0   : > { %v2008_v57 = vld [vmem:[#allocation5 + $0x180] sm:$0xff] }
 0x8d1   : > { %v1715_v61 = vadd.f32 %v1714_v56, %v1708_v58  ;;  %v2011_v58 = vld [vmem:[#allocation5 + $0x198] sm:$0xff] }
 0x8d2   : > { %v4816_v62 = vpop.eup %4815 }
 0x8d3   : > { %1826 = vmatmul.mubr.f32.vlgmr.msra.gmra.mrb[14].mxu1 %v1715_v61  ;;  %v1710_v63 = vmul.f32 %v4816_v62, %v1704_v60  ;;  %v4381_v60 = vpack.c.bf16 %v2011_v58, %v2008_v57  ;;  %v2015_v61 = vld [vmem:[#allocation5 + $0x1b8] sm:$0xff]  ;;  %v2018_v62 = vld [vmem:[#allocation5 + $0x1d0] sm:$0xff]  ;;  %v2040_v57 = vld [vmem:[#allocation5 + $0x280] sm:$0xff] }
 0x8d4   : > { %1831 = vmatprep.mubr.f32.mxu1 %v5104_v59 }
 0x8d5   : > { %v1716_v2 = vadd.f32 %v1714_v56, %v1710_v63  ;;  %v4379_v56 = vpack.c.bf16 %v2012_v8, %v2009_v4  ;;  %v2010_v63 = vld [vmem:[#allocation5 + $0x190] sm:$0xff]  ;;  %v2045_v8 = vld [vmem:[#allocation5 + $0x2a8] sm:$0xff] }
 0x8d6   : > { %v4411_v6 = vpack.c.bf16 %v2013_v3, %v2010_v63  ;;  %v2051_v3 = vld [vmem:[#allocation5 + $0x2d8] sm:$0xff] }
 0x8d7   : > { %1832 = vmatmul.mubr.f32.gmra.mrb[16].mxu1 %v1716_v2  ;;  %4380 = vmatprep.subr.bf16.mxu1 %v4379_v56  ;;  %v4383_v2 = vpack.c.bf16 %v2018_v62, %v2015_v61  ;;  %v2048_v56 = vld [vmem:[#allocation5 + $0x2c0] sm:$0xff]  ;;  %v2047_v62 = vld [vmem:[#allocation5 + $0x2b8] sm:$0xff] }
 0x8d8   : > { %2138 = vmatprep.mubr.f32.mxu1 %v5104_v59  ;;  %4382 = vmatpush1.bf16.msra.mxu1 %v4381_v60  ;;  %v4403_v58 = vpack.c.bf16 %v2048_v56, %v2045_v8  ;;  %v2043_v60 = vld [vmem:[#allocation5 + $0x298] sm:$0xff]  ;;  %v2044_v61 = vld [vmem:[#allocation5 + $0x2a0] sm:$0xff] }
 0x8d9   : > { %4384 = vmatprep.subr.bf16.mxu1 %v4383_v2  ;;  %4412 = vmatprep.subr.bf16.mxu0 %v4411_v6  ;;  %v4431_v63 = vpack.c.bf16 %v2043_v60, %v2040_v57  ;;  %v4405_v2 = vpack.c.bf16 %v2047_v62, %v2044_v61 }
 0x8dc   : > { %4386 = vmatpush1.bf16.msra.mxu1 %v4385_v41  ;;  %v2049_v41 = vld [vmem:[#allocation5 + $0x2c8] sm:$0xff] }
 0x8dd   : > { %4388 = vmatprep.subr.bf16.mxu1 %v4387_v1  ;;  %v4409_v1 = vpack.c.bf16 %v2053_v9, %v2050_v7 }
 0x9a6   : > { %v1827_v13 = vpop.f32.mrb[14].mxu1 }
 0x9a7   : > { %v1828_v16 = vadd.f32 %v1827_v13, %v1754_v14  ;;  %v1829_v17 = vpop.f32.mrb[15].mxu1  ;;  %v4415_v13 = vpack.c.bf16 %v2019_v11, %v2016_v10  ;;  %v4435_v10 = vpack.c.bf16 %v2049_v41, %v2046_v5  ;;  %v2052_v11 = vld [vmem:[#allocation5 + $0x2e0] sm:$0xff] }
 0x9a8   : > { %v1830_v18 = vadd.f32 %v1829_v17, %v1758_v15  ;;  %v2027_v17 = vld [vmem:[#allocation5 + $0x218] sm:$0xff] }
 0x9a9   : > { %v1838_v22 = vmax.f32 %v1828_v16, 0.0 }
 0x9aa   : > { %v1839_v20 = vmax.f32 %v1830_v18, 0.0  ;;  %v1833_v21 = vpop.f32.mrb[16].mxu1  ;;  %v2030_v18 = vld [vmem:[#allocation5 + $0x230] sm:$0xff] }
 0x9ab   : > { %v1834_v19 = vadd.f32 %v1833_v21, %v1754_v14  ;;  %v1835_v23 = vpop.f32.mrb[17].mxu1  ;;  %v2020_v14 = vld [vmem:[#allocation5 + $0x1e0] sm:$0xff]  ;;  %v4391_v21 = vpack.c.bf16 %v2030_v18, %v2027_v17 }
 0x9ac   : > { %v1836_v24 = vadd.f32 %v1835_v23, %v1758_v15  ;;  %1938 = vmatprep.mubr.f32.mxu0 %v1839_v20  ;;  %v2023_v15 = vld [vmem:[#allocation5 + $0x1f8] sm:$0xff]  ;;  %v2022_v20 = vld [vmem:[#allocation5 + $0x1f0] sm:$0xff]  ;;  %v2029_v23 = vld [vmem:[#allocation5 + $0x228] sm:$0xff] }
 0x9ad   : > { %1939 = vmatmul.mubr.f32.vlgmr.msra.gmra.mrb[10].mxu0 %v1838_v22  ;;  %v1840_v26 = vmax.f32 %v1834_v19, 0.0  ;;  %v4389_v16 = vpack.c.bf16 %v2023_v15, %v2020_v14  ;;  %v2025_v22 = vld [vmem:[#allocation5 + $0x208] sm:$0xff]  ;;  %v2026_v19 = vld [vmem:[#allocation5 + $0x210] sm:$0xff]  ;;  %v2055_v14 = vld [vmem:[#allocation5 + $0x2f8] sm:$0xff] }
 0x9ae   : > { %v1841_v25 = vmax.f32 %v1836_v24, 0.0  ;;  %4414 = vmatpush3.bf16.msra.mxu0 %v4411_v6  ;;  %v4419_v24 = vpack.c.bf16 %v2025_v22, %v2022_v20  ;;  %v4407_v6 = vpack.c.bf16 %v2054_v51, %v2051_v3  ;;  %v4439_v15 = vpack.c.bf16 %v2055_v14, %v2052_v11 }
 0x9af   : > { %4416 = vmatprep.subr.bf16.mxu0 %v4415_v13  ;;  %4390 = vmatpush1.bf16.msra.mxu1 %v4389_v16 }
 0x9b0   : > { %1943 = vmatprep.mubr.f32.mxu0 %v1841_v25  ;;  %v4393_v25 = vpack.c.bf16 %v2029_v23, %v2026_v19  ;;  %4392 = vmatprep.subr.bf16.mxu1 %v4391_v21 }
 0x9b1   : > { %1944 = vmatmul.mubr.f32.gmra.mrb[12].mxu0 %v1840_v26  ;;  %v2033_v26 = vld [vmem:[#allocation5 + $0x248] sm:$0xff] }
 0x9b2   : > { %4418 = vmatpush3.bf16.msra.mxu0 %v4415_v13 }
 0x9b3   : > { %4420 = vmatprep.subr.bf16.mxu0 %v4419_v24  ;;  %4394 = vmatpush1.bf16.msra.mxu1 %v4393_v25 }
 0x9b6   : > { %4422 = vmatpush3.bf16.msra.mxu0 %v4419_v24 }
 0xa80   : > { %v3815_v28 = vpop.f32.mrb[10].mxu0 }
 0xa81   : > { %v3816_v29 = vpop.f32.mrb[11].mxu0 }
 0xa82   : > { %v3817_v30 = vadd.f32 %v3816_v29, %v3815_v28  ;;  %v2036_v28 = vld [vmem:[#allocation5 + $0x260] sm:$0xff] }
 0xa83   : > { %v2028_v29 = vld [vmem:[#allocation5 + $0x220] sm:$0xff] }
 0xa84   : > { %v1949_v34 = vadd.f32 %v3817_v30, %v5567_v46  ;;  %v3818_v36 = vpop.f32.mrb[12].mxu0  ;;  %v4395_v30 = vpack.c.bf16 %v2036_v28, %v2033_v26 }
 0xa85   : > { %v3819_v37 = vpop.f32.mrb[13].mxu0 }
 0xa86   : > { %v3820_v38 = vadd.f32 %v3819_v37, %v3818_v36  ;;  %v5603_v42 = vadd.f32 %v1954_v32, %v1949_v34  ;;  %v2035_v34 = vld [vmem:[#allocation5 + $0x258] sm:$0xff]  ;;  %v4423_v36 = vpack.c.bf16 %v2031_v31, %v2028_v29  ;;  %4396 = vmatprep.subr.bf16.mxu1 %v4395_v30  ;;  %v5623_v31 = vld [vmem:[%s5843_s8 + $0x8] sm:$0x3f] }
 0xa88   : > { %v1950_v43 = vadd.f32 %v3820_v38, %v5565_v45  ;;  %1959 = vadd.xlane.f32.xlu1 %v5603_v42  ;;  %4424 = vmatprep.subr.bf16.mxu0 %v4423_v36  ;;  %v2039_v38 = vld [vmem:[#allocation5 + $0x278] sm:$0xff] }
 0xa89   : > { %4426 = vmatpush3.bf16.msra.mxu0 %v4423_v36 }
 0xa8a   : > { %v5607_v47 = vadd.f32 %v1954_v32, %v1950_v43  ;;  %v2032_v32 = vld [vmem:[#allocation5 + $0x240] sm:$0xff]  ;;  %v2042_v43 = vld [vmem:[#allocation5 + $0x290] sm:$0xff] }
 0xa8b   : > { %v4397_v37 = vpack.c.bf16 %v2035_v34, %v2032_v32  ;;  %v1992_v34 = vrot.slane %v5623_v31, %v5422_v39 }
 0xa8c   : > { %1961 = vadd.xlane.f32.xlu0 %v5607_v47 }
 0xa8d   : > { %4398 = vmatpush1.bf16.msra.mxu1 %v4397_v37  ;;  %v2004_v37 = vrot.slane %v5623_v31, %v5432_v44 }
 0xb15   : > { %v1960_v48 = vpop.xlane.xlu1 %1959 }
 0xb16   : > { %v1963_v49 = vmul.f32 0.0078125, %v1960_v48  ;;  %v2034_v48 = vld [vmem:[#allocation5 + $0x250] sm:$0xff] }
 0xb18   : > { %v5611_v50 = vsub.f32 %v5603_v42, %v1963_v49  ;;  %v4399_v49 = vpack.c.bf16 %v2042_v43, %v2039_v38 }
 0xb19   : > { %v1962_v0 = vpop.xlane.xlu0 %1961 }
 0xb1a   : > { %v1964_v46 = vmul.f32 0.0078125, %v1962_v0  ;;  %v1967_v52 = vmul.f32 %v5611_v50, %v5611_v50  ;;  %v2037_v0 = vld [vmem:[#allocation5 + $0x268] sm:$0xff]  ;;  %4400 = vmatprep.subr.bf16.mxu1 %v4399_v49  ;;  %v1993_v36 = vmul.f32 %v1992_v34, %v5611_v50  ;;  %v3682_v50 = vld [vmem:[%s5838_s3 + $0x3] sm:$0x7] }
 0xb1b   : > { %v2066_v57 = vrot.slane %v3682_v50, %v5432_v44 }
 0xb1c   : > { %v5616_v53 = vsub.f32 %v5607_v47, %v1964_v46  ;;  %1969 = vadd.xlane.f32.xlu1 %v1967_v52  ;;  %v2038_v46 = vld [vmem:[#allocation5 + $0x270] sm:$0xff]  ;;  %v2041_v52 = vld [vmem:[#allocation5 + $0x288] sm:$0xff] }
 0xb1d   : > { %v4401_v4 = vpack.c.bf16 %v2041_v52, %v2038_v46 }
 0xb1e   : > { %v1968_v45 = vmul.f32 %v5616_v53, %v5616_v53 }
 0xb1f   : > { %4402 = vmatpush1.bf16.msra.mxu1 %v4401_v4 }
 0xb20   : > { %1971 = vadd.xlane.f32.xlu0 %v1968_v45  ;;  %v4427_v45 = vpack.c.bf16 %v2037_v0, %v2034_v48  ;;  %4404 = vmatprep.subr.bf16.mxu1 %v4403_v58  ;;  %v1994_v48 = vmul.f32 %v1992_v34, %v5616_v53  ;;  %v2070_v53 = vrot.slane %v3682_v50, %v5444_v55 }
 0xb22   : > { %4428 = vmatprep.subr.bf16.mxu0 %v4427_v45 }
 0xb23   : > { %4430 = vmatpush3.bf16.msra.mxu0 %v4427_v45  ;;  %4406 = vmatpush1.bf16.msra.mxu1 %v4405_v2  ;;  %v2062_v45 = vrot.slane %v3682_v50, %v5422_v39 }
 0xb24   : > { %4432 = vmatprep.subr.bf16.mxu0 %v4431_v63  ;;  %4408 = vmatprep.subr.bf16.mxu1 %v4407_v6 }
 0xb27   : > { %4434 = vmatpush3.bf16.msra.mxu0 %v4431_v63  ;;  %4410 = vmatpush1.bf16.msra.mxu1 %v4409_v1 }
 0xb28   : > { %4436 = vmatprep.subr.bf16.mxu0 %v4435_v10 }
 0xb2b   : > { %4438 = vmatpush3.bf16.msra.mxu0 %v4435_v10 }
 0xb2c   : > { %4440 = vmatprep.subr.bf16.mxu0 %v4439_v15 }
 0xb2f   : > { %4442 = vmatpush3.bf16.msra.mxu0 %v4439_v15 }
 0xba9   : > { %v1970_v13 = vpop.xlane.xlu1 %1969 }
 0xbaa   : > { %v1973_v16 = vmul.f32 0.007874016, %v1970_v13 }
 0xbac   : > { %4817 = vrsqrt.f32 %v1973_v16  ;;  %vm1977_vm15 = vcmp.eq.f32.partialorder %v1973_v16, inf  ;;  %v1980_v22 = vand.u32 2147483648, %v1973_v16  ;;  %vm1979_vm0 = vcmp.eq.f32.partialorder %v1973_v16, 0.0 }
 0xbad   : > { %v1972_v17 = vpop.xlane.xlu0 %1971 }
 0xbae   : > { %v1974_v18 = vmul.f32 0.007874016, %v1972_v17 }
 0xbb0   : > { %4819 = vrsqrt.f32 %v1974_v18  ;;  %vm1984_vm1 = vcmp.eq.f32.partialorder %v1974_v18, inf  ;;  %v1987_v28 = vand.u32 2147483648, %v1974_v18  ;;  %vm1986_vm2 = vcmp.eq.f32.partialorder %v1974_v18, 0.0 }
 0xbb6   : > { %v4818_v20 = vpop.eup %4817 }
 0xbb7   : > { %v1976_v21 = vmul.f32 %v4818_v20, %v1973_v16 }
 0xbb9   : > { %v1978_v19 = vsel %vm1977_vm15, %v1973_v16, %v1976_v21 }
 0xbba   : > { %v4820_v23 = vpop.eup %4819  ;;  %v1981_v24 = vsel %vm1979_vm0, %v1980_v22, %v1978_v19 }
 0xbbb   : > { %v1995_v25 = vadd.f32 1e-06, %v1981_v24  ;;  %v1983_v26 = vmul.f32 %v4820_v23, %v1974_v18 }
 0xbbd   : > { %4821 = vrcp.f32 %v1995_v25  ;;  %v1985_v29 = vsel %vm1984_vm1, %v1974_v18, %v1983_v26 }
 0xbbe   : > { %v1988_v30 = vsel %vm1986_vm2, %v1987_v28, %v1985_v29 }
 0xbbf   : > { %v1996_v32 = vadd.f32 1e-06, %v1988_v30 }
 0xbc1   : > { %4823 = vrcp.f32 %v1996_v32 }
 0xbc7   : > { %v4822_v38 = vpop.eup %4821 }
 0xbc8   : > { %v1998_v43 = vmul.f32 %v4822_v38, %v1993_v36 }
 0xbca   : > { %v2005_v49 = vadd.f32 %v2004_v37, %v1998_v43 }
 0xbcb   : > { %v4824_v0 = vpop.eup %4823 }
 0xbcc   : > { %2139 = vmatmul.mubr.f32.vlgmr.msra.gmra.mrb[18].mxu1 %v2005_v49  ;;  %4085 = vmatprep.mubr.f32.mxu0 %v2005_v49  ;;  %v2000_v46 = vmul.f32 %v4824_v0, %v1994_v48 }
 0xbcd   : > { %2144 = vmatprep.mubr.f32.mxu1 %v5104_v59 }
 0xbce   : > { %v2006_v52 = vadd.f32 %v2004_v37, %v2000_v46 }
 0xbd0   : > { %2145 = vmatmul.mubr.f32.gmra.mrb[20].mxu1 %v2006_v52  ;;  %4086 = vmatmul.mubr.f32.vlgmr.msra.gmra.mrb[14].mxu0 %v2006_v52 }
 0xc9f   : > { %v2140_v4 = vpop.f32.mrb[18].mxu1 }
 0xca0   : > { %v2141_v8 = vadd.f32 %v2140_v4, %v2062_v45  ;;  %v2142_v56 = vpop.f32.mrb[19].mxu1 }
 0xca1   : > { %v2143_v2 = vadd.f32 %v2142_v56, %v2066_v57 }
 0xca2   : > { %4092 = vmatprep.mubr.msk.f32.mxu1 %vm770_vm4, %v2141_v8 }
 0xca3   : > { %v2146_v58 = vpop.f32.mrb[20].mxu1  ;;  %v4087_v60 = vpop.f32.mrb[14].mxu0 }
 0xca4   : > { %v2223_v61 = vadd.f32 %v4087_v60, %v2070_v53  ;;  %v2148_v62 = vpop.f32.mrb[21].mxu1  ;;  %v2217_v63 = vpop.f32.mrb[15].mxu0  ;;  %v2147_v9 = vadd.f32 %v2146_v58, %v2062_v45 }
 0xca5   : > { %v2149_v3 = vadd.f32 %v2148_v62, %v2066_v57  ;;  %v2218_v51 = vadd.f32 %v2217_v63, %v2070_v53 }
 0xca7   : > { %v4467_v5 = vpack.c.bf16 %v2223_v61, %v2218_v51  ;;  %v4729_v6 = vpack.i.bf16 %v2149_v3, %v2143_v2  ;;  %v4443_v41 = vpack.c.bf16 %v2149_v3, %v2143_v2  ;;  %v5639_v7 = vpack.i.bf16 %v2223_v61, %v2218_v51 }
 0xca9   : > { %4468 = vmatprep.subr.bf16.mxu0 %v4467_v5  ;;  %4730 = vrot.lane.b32.xlu0 %v4729_v6, %s5106_s2 }
 0xcaa   : > { %4725 = vrot.lane.b32.xlu1 %v4729_v6, %s5105_s26  ;;  %4445 = vmatprep.subr.msk.bf16.mxu1 %vm5452_vm5, %v4443_v41 }
 0xcab   : > { %4448 = vmatpush3.bf16.xpose.msk.msra.mxu1 %vm5452_vm5, %v4443_v41  ;;  %4470 = vmatpush3.bf16.msra.mxu0 %v4467_v5 }
 0xcad   : > { %2232 = vrot.lane.b32.xlu0 %v2141_v8, %s5106_s2 }
 0xcae   : > { %2228 = vrot.lane.b32.xlu1 %v2141_v8, %s5105_s26 }
 0xcb1   : > { %2236 = vrot.lane.b32.xlu0 %v2141_v8, %s5107_s24 }
 0xcb2   : > { %2230 = vrot.lane.b32.xlu1 %v2147_v9, %s5105_s26  ;;  %4093 = vmatmul.mubr.msk.f32.vlgmr.msra.gmra.mrb[22].mxu1 %vm770_vm4, %v2147_v9 }
 0xcb6   : > { %4735 = vrot.lane.b32.xlu1 %v4729_v6, %s5107_s24 }
 0xcba   : > { %2234 = vrot.lane.b32.xlu1 %v2147_v9, %s5106_s2 }
 0xcbe   : > { %2238 = vrot.lane.b32.xlu1 %v2147_v9, %s5107_s24 }
 0xd1b   : > { %v4731_v10 = vpop.permute.xlu0 %4730 }
 0xd1c   : > { %v4726_v1 = vpop.permute.xlu1 %4725  ;;  %v4733_v11 = vunpack.i.h.bf16 %v4731_v10  ;;  %v4732_v14 = vunpack.i.l.bf16 %v4731_v10 }
 0xd1d   : > { %v4728_v15 = vunpack.i.h.bf16 %v4726_v1  ;;  %v4727_v13 = vunpack.i.l.bf16 %v4726_v1 }
 0xd1e   : > { %v4455_v18 = vpack.c.bf16 %v4733_v11, %v4732_v14 }
 0xd1f   : > { %v4449_v16 = vpack.c.bf16 %v4728_v15, %v4727_v13  ;;  %v2233_v22 = vpop.permute.xlu0 %2232 }
 0xd20   : > { %v2229_v17 = vpop.permute.xlu1 %2228 }
 0xd21   : > { %4451 = vmatprep.subr.msk.bf16.mxu1 %vm5452_vm5, %v4449_v16  ;;  %4099 = vmatprep.mubr.msk.f32.mxu1 %vm770_vm4, %v2229_v17 }
 0xd22   : > { %4454 = vmatpush3.bf16.xpose.msk.msra.mxu1 %vm5452_vm5, %v4449_v16 }
 0xd23   : > { %4457 = vmatprep.subr.msk.bf16.mxu1 %vm5452_vm5, %v4455_v18  ;;  %v2237_v26 = vpop.permute.xlu0 %2236 }
 0xd24   : > { %v2231_v20 = vpop.permute.xlu1 %2230 }
 0xd28   : > { %v4736_v21 = vpop.permute.xlu1 %4735 }
 0xd29   : > { %v4738_v19 = vunpack.i.h.bf16 %v4736_v21  ;;  %v4737_v23 = vunpack.i.l.bf16 %v4736_v21  ;;  %4100 = vmatmul.mubr.msk.f32.vlgmr.msra.gmra.mrb[24].mxu1 %vm770_vm4, %v2231_v20 }
 0xd2a   : > { %4460 = vmatpush3.bf16.xpose.msk.msra.mxu1 %vm5452_vm5, %v4455_v18  ;;  %4106 = vmatprep.mubr.msk.f32.mxu1 %vm770_vm4, %v2233_v22 }
 0xd2b   : > { %v4461_v24 = vpack.c.bf16 %v4738_v19, %v4737_v23 }
 0xd2c   : > { %v2235_v25 = vpop.permute.xlu1 %2234 }
 0xd2d   : > { %4463 = vmatprep.subr.msk.bf16.mxu1 %vm5452_vm5, %v4461_v24 }
 0xd30   : > { %v2239_v28 = vpop.permute.xlu1 %2238 }
 0xd31   : > { %4107 = vmatmul.mubr.msk.f32.vlgmr.msra.gmra.mrb[26].mxu1 %vm770_vm4, %v2235_v25 }
 0xd32   : > { %4466 = vmatpush3.bf16.xpose.msk.msra.mxu1 %vm5452_vm5, %v4461_v24  ;;  %4113 = vmatprep.mubr.msk.f32.mxu1 %vm770_vm4, %v2237_v26 }
 0xd39   : > { %4114 = vmatmul.mubr.msk.f32.vlgmr.msra.gmra.mrb[28].mxu1 %vm770_vm4, %v2239_v28 }
 0xd85   : > { %v4094_v29 = vpop.f32.mrb[22].mxu1 }
 0xd86   : > { %v2607_v30 = vmul.f32 0.17677669, %v4094_v29  ;;  %v2348_v32 = vpop.f32.mrb[23].mxu1 }
 0xd87   : > { %v2606_v34 = vmul.f32 0.17677669, %v2348_v32 }
 0xd88   : > { %v2615_v36 = vsel %vm5495_vm7, -1e+09, %v2607_v30 }
 0xd89   : > { %v2625_v37 = vsel %vm1125_vm8, %v2615_v36, -inf  ;;  %v2614_v38 = vsel %vm5495_vm7, -1e+09, %v2606_v34 }
 0xd8a   : > { %2626 = vmax.xlane.f32.xlu1 %v2625_v37  ;;  %v2622_v12 = vsel %vm1125_vm8, %v2614_v38, -inf }
 0xd8b   : > { %2623 = vmax.xlane.f32.xlu0 %v2622_v12 }
 0xdfc   : > { %v4101_v43 = vpop.f32.mrb[24].mxu1 }
 0xdfd   : > { %v2609_v48 = vmul.f32 0.17677669, %v4101_v43  ;;  %v2431_v49 = vpop.f32.mrb[25].mxu1 }
 0xdfe   : > { %v2608_v0 = vmul.f32 0.17677669, %v2431_v49 }
 0xdff   : > { %v2617_v46 = vsel %vm5495_vm7, -1e+09, %v2609_v48 }
 0xe00   : > { %v2631_v52 = vsel %vm1125_vm8, %v2617_v46, -inf  ;;  %v2616_v50 = vsel %vm5495_vm7, -1e+09, %v2608_v0 }
 0xe01   : > { %2632 = vmax.xlane.f32.xlu0 %v2631_v52  ;;  %v2628_v4 = vsel %vm1125_vm8, %v2616_v50, -inf }
 0xe04   : > { %v4108_v45 = vpop.f32.mrb[26].mxu1 }
 0xe05   : > { %v2611_v8 = vmul.f32 0.17677669, %v4108_v45  ;;  %2629 = vmax.xlane.f32.xlu0 %v2628_v4  ;;  %v2514_v56 = vpop.f32.mrb[27].mxu1 }
 0xe06   : > { %v2610_v53 = vmul.f32 0.17677669, %v2514_v56 }
 0xe07   : > { %v2619_v57 = vsel %vm5495_vm7, -1e+09, %v2611_v8 }
 0xe08   : > { %v2637_v58 = vsel %vm1125_vm8, %v2619_v57, -inf  ;;  %v2618_v60 = vsel %vm5495_vm7, -1e+09, %v2610_v53 }
 0xe09   : > { %2638 = vmax.xlane.f32.xlu1 %v2637_v58  ;;  %v2634_v61 = vsel %vm1125_vm8, %v2618_v60, -inf }
 0xe0a   : > { %2635 = vmax.xlane.f32.xlu0 %v2634_v61 }
 0xe0c   : > { %v4115_v62 = vpop.f32.mrb[28].mxu1 }
 0xe0d   : > { %v2613_v63 = vmul.f32 0.17677669, %v4115_v62  ;;  %v2597_v2 = vpop.f32.mrb[29].mxu1 }
 0xe0e   : > { %v2612_v3 = vmul.f32 0.17677669, %v2597_v2 }
 0xe0f   : > { %v2621_v51 = vsel %vm5495_vm7, -1e+09, %v2613_v63 }
 0xe10   : > { %v2643_v5 = vsel %vm1125_vm8, %v2621_v51, -inf  ;;  %v2620_v6 = vsel %vm5495_vm7, -1e+09, %v2612_v3 }
 0xe11   : > { %2644 = vmax.xlane.f32.xlu1 %v2643_v5  ;;  %v2640_v41 = vsel %vm1125_vm8, %v2620_v6, -inf }
 0xe12   : > { %2641 = vmax.xlane.f32.xlu0 %v2640_v41 }
 0xe17   : > { %v2627_v9 = vpop.xlane.xlu1 %2626 }
 0xe18   : > { %v2647_v10 = vsub.f32 %v2615_v36, %v2627_v9  ;;  %v2624_v1 = vpop.xlane.xlu0 %2623 }
 0xe19   : > { %v2646_v11 = vsub.f32 %v2614_v38, %v2624_v1 }
 0xe1a   : > { %v2656_v14 = vmul.f32 1.442695, %v2647_v10 }
 0xe1b   : > { %v2654_v15 = vmul.f32 1.442695, %v2646_v11 }
 0xe1c   : > { %4825 = vpow2.f32 %v2656_v14 }
 0xe1d   : > { %4827 = vpow2.f32 %v2654_v15 }
 0xe26   : > { %v4826_v13 = vpop.eup %4825 }
 0xe27   : > { %v4828_v16 = vpop.eup %4827  ;;  %v2673_v17 = vsel %vm1125_vm8, %v4826_v13, 0.0 }
 0xe28   : > { %2674 = vadd.xlane.f32.xlu1 %v2673_v17  ;;  %v2670_v40 = vsel %vm1125_vm8, %v4828_v16, 0.0 }
 0xe29   : > { %2671 = vadd.xlane.f32.xlu0 %v2670_v40 }
 0xe8e   : > { %v2633_v18 = vpop.xlane.xlu0 %2632 }
 0xe8f   : > { %v2649_v20 = vsub.f32 %v2617_v46, %v2633_v18 }
 0xe91   : > { %v2660_v21 = vmul.f32 1.442695, %v2649_v20 }
 0xe92   : > { %v2630_v22 = vpop.xlane.xlu0 %2629 }
 0xe93   : > { %4829 = vpow2.f32 %v2660_v21  ;;  %v2648_v19 = vsub.f32 %v2616_v50, %v2630_v22 }
 0xe95   : > { %v2658_v23 = vmul.f32 1.442695, %v2648_v19 }
 0xe96   : > { %v2639_v24 = vpop.xlane.xlu1 %2638 }
 0xe97   : > { %4831 = vpow2.f32 %v2658_v23  ;;  %v2651_v25 = vsub.f32 %v2619_v57, %v2639_v24  ;;  %v2636_v26 = vpop.xlane.xlu0 %2635 }
 0xe98   : > { %v2650_v28 = vsub.f32 %v2618_v60, %v2636_v26 }
 0xe99   : > { %v2664_v29 = vmul.f32 1.442695, %v2651_v25 }
 0xe9a   : > { %v2662_v30 = vmul.f32 1.442695, %v2650_v28 }
 0xe9b   : > { %4833 = vpow2.f32 %v2664_v29 }
 0xe9c   : > { %4835 = vpow2.f32 %v2662_v30 }
 0xe9d   : > { %v5699_v32 = vpop.eup %4829 }
 0xe9e   : > { %v2645_v34 = vpop.xlane.xlu1 %2644  ;;  %v2679_v36 = vsel %vm1125_vm8, %v5699_v32, 0.0 }
 0xe9f   : > { %v2653_v37 = vsub.f32 %v2621_v51, %v2645_v34  ;;  %2680 = vadd.xlane.f32.xlu1 %v2679_v36  ;;  %v2642_v38 = vpop.xlane.xlu0 %2641 }
 0xea0   : > { %v2652_v12 = vsub.f32 %v2620_v6, %v2642_v38  ;;  %v3065_v38 = vld [vmem:[#allocation7 + $0x80] sm:$0xff] }
 0xea1   : > { %v4832_v43 = vpop.eup %4831  ;;  %v2668_v48 = vmul.f32 1.442695, %v2653_v37 }
 0xea2   : > { %v2666_v49 = vmul.f32 1.442695, %v2652_v12  ;;  %v2676_v0 = vsel %vm1125_vm8, %v4832_v43, 0.0  ;;  %v3067_v12 = vld [vmem:[#allocation7 + $0x90] sm:$0xff] }
 0xea3   : > { %4837 = vpow2.f32 %v2668_v48  ;;  %2677 = vadd.xlane.f32.xlu0 %v2676_v0  ;;  %v3068_v48 = vld [vmem:[#allocation7 + $0x98] sm:$0xff]  ;;  %v3069_v0 = vld [vmem:[#allocation7 + $0xa0] sm:$0xff] }
 0xea4   : > { %4839 = vpow2.f32 %v2666_v49  ;;  %v4487_v49 = vpack.c.bf16 %v3068_v48, %v3067_v12 }
 0xea5   : > { %v4834_v46 = vpop.eup %4833 }
 0xea6   : > { %v4836_v52 = vpop.eup %4835  ;;  %v2685_v50 = vsel %vm1125_vm8, %v4834_v46, 0.0 }
 0xea7   : > { %2686 = vadd.xlane.f32.xlu1 %v2685_v50  ;;  %v2682_v45 = vsel %vm1125_vm8, %v4836_v52, 0.0  ;;  %v3071_v50 = vld [vmem:[#allocation7 + $0xb0] sm:$0xff] }
 0xea8   : > { %2683 = vadd.xlane.f32.xlu0 %v2682_v45  ;;  %v3072_v45 = vld [vmem:[#allocation7 + $0xb8] sm:$0xff] }
 0xead   : > { %v5706_v4 = vpop.eup %4837 }
 0xeae   : > { %v4840_v8 = vpop.eup %4839  ;;  %v2691_v56 = vsel %vm1125_vm8, %v5706_v4, 0.0 }
 0xeaf   : > { %2692 = vadd.xlane.f32.xlu1 %v2691_v56  ;;  %v2688_v53 = vsel %vm1125_vm8, %v4840_v8, 0.0  ;;  %v3074_v56 = vld [vmem:[#allocation7 + $0xc8] sm:$0xff] }
 0xeb0   : > { %2689 = vadd.xlane.f32.xlu0 %v2688_v53 }
 0xeb5   : > { %v2675_v57 = vpop.xlane.xlu1 %2674 }
 0xeb6   : > { %4841 = vrcp.f32 %v2675_v57  ;;  %v2672_v58 = vpop.xlane.xlu0 %2671  ;;  %v3075_v57 = vld [vmem:[#allocation7 + $0xd0] sm:$0xff] }
 0xeb7   : > { %4843 = vrcp.f32 %v2672_v58  ;;  %v3076_v58 = vld [vmem:[#allocation7 + $0xd8] sm:$0xff] }
 0xec0   : > { %v4842_v60 = vpop.eup %4841  ;;  %4745 = vrot.lane.b32.xlu1 %v5639_v7, %s5106_s2 }
 0xec1   : > { %v4844_v61 = vpop.eup %4843  ;;  %v2697_v63 = vmul.f32 %v4842_v60, %v4826_v13  ;;  %v4503_v60 = vpack.c.bf16 %v3076_v58, %v3075_v57  ;;  %v3217_v58 = vld [vmem:[#allocation8 + $0x120] sm:$0xff] }
 0xec2   : > { %v2695_v62 = vmul.f32 %v4844_v61, %v4828_v16  ;;  %v3077_v61 = vld [vmem:[#allocation7 + $0xe0] sm:$0xff] }
 0xec4   : > { %4750 = vrot.lane.b32.xlu1 %v5639_v7, %s5107_s24  ;;  %4120 = vmatprep.mubr.msk.f32.mxu0 %vm1125_vm8, %v2695_v62  ;;  %v3078_v62 = vld [vmem:[#allocation7 + $0xe8] sm:$0xff] }
 0xec5   : > { %4121 = vmatmul.mubr.msk.f32.vlgmr.msra.gmra.mrb[16].mxu0 %vm1125_vm8, %v2697_v63  ;;  %v4507_v63 = vpack.c.bf16 %v3078_v62, %v3077_v61  ;;  %v3222_v62 = vld [vmem:[#allocation8 + $0x148] sm:$0xff] }
 0xec6   : > { %4740 = vrot.lane.b32.xlu0 %v5639_v7, %s5105_s26 }
 0xf2c   : > { %v2681_v3 = vpop.xlane.xlu1 %2680 }
 0xf30   : > { %v2678_v2 = vpop.xlane.xlu0 %2677 }
 0xf31   : > { %4845 = vrcp.f32 %v2678_v2  ;;  %v3079_v2 = vld [vmem:[#allocation7 + $0xf0] sm:$0xff] }
 0xf34   : > { %v2687_v5 = vpop.xlane.xlu1 %2686 }
 0xf35   : > { %v2684_v51 = vpop.xlane.xlu0 %2683 }
 0xf36   : > { %4847 = vrcp.f32 %v2684_v51 }
 0xf37   : > { %4849 = vrcp.f32 %v2687_v5 }
 0xf38   : > { %4851 = vrcp.f32 %v2681_v3  ;;  %v3080_v3 = vld [vmem:[#allocation7 + $0xf8] sm:$0xff] }
 0xf39   : > { %v4511_v51 = vpack.c.bf16 %v3080_v3, %v3079_v2  ;;  %v3221_v3 = vld [vmem:[#allocation8 + $0x140] sm:$0xff] }
 0xf3b   : > { %v4846_v6 = vpop.eup %4845 }
 0xf3c   : > { %v2693_v41 = vpop.xlane.xlu1 %2692  ;;  %v2699_v9 = vmul.f32 %v4846_v6, %v4832_v43 }
 0xf3d   : > { %v2690_v10 = vpop.xlane.xlu0 %2689 }
 0xf3e   : > { %4853 = vrcp.f32 %v2690_v10  ;;  %4127 = vmatprep.mubr.msk.f32.mxu1 %vm1125_vm8, %v2699_v9 }
 0xf3f   : > { %4855 = vrcp.f32 %v2693_v41 }
 0xf40   : > { %v4848_v1 = vpop.eup %4847  ;;  %v4746_v11 = vpop.permute.xlu1 %4745 }
 0xf41   : > { %v4748_v14 = vunpack.i.h.bf16 %v4746_v11  ;;  %v4747_v7 = vunpack.i.l.bf16 %v4746_v11  ;;  %v4741_v15 = vpop.permute.xlu0 %4740  ;;  %v2703_v13 = vmul.f32 %v4848_v1, %v4836_v52  ;;  %v4850_v18 = vpop.eup %4849 }
 0xf42   : > { %v4743_v16 = vunpack.i.h.bf16 %v4741_v15  ;;  %v4742_v17 = vunpack.i.l.bf16 %v4741_v15  ;;  %v4852_v22 = vpop.eup %4851  ;;  %v2705_v24 = vmul.f32 %v4850_v18, %v4834_v46  ;;  %v3070_v46 = vld [vmem:[#allocation7 + $0xa8] sm:$0xff] }
 0xf43   : > { %v4475_v40 = vpack.c.bf16 %v4748_v14, %v4747_v7  ;;  %4134 = vmatprep.mubr.msk.f32.mxu0 %vm1125_vm8, %v2703_v13  ;;  %v2701_v28 = vmul.f32 %v4852_v22, %v5699_v32  ;;  %v3066_v32 = vld [vmem:[#allocation7 + $0x88] sm:$0xff]  ;;  %v4491_v52 = vpack.c.bf16 %v3070_v46, %v3069_v0 }
 0xf44   : > { %v4471_v20 = vpack.c.bf16 %v4743_v16, %v4742_v17  ;;  %v4751_v21 = vpop.permute.xlu1 %4750  ;;  %v4483_v43 = vpack.c.bf16 %v3066_v32, %v3065_v38  ;;  %v3214_v46 = vld [vmem:[#allocation8 + $0x108] sm:$0xff] }
 0xf45   : > { %v4753_v19 = vunpack.i.h.bf16 %v4751_v21  ;;  %v4752_v23 = vunpack.i.l.bf16 %v4751_v21  ;;  %4476 = vmatprep.subr.bf16.mxu0 %v4475_v40 }
 0xf46   : > { %4472 = vmatprep.subr.bf16.mxu1 %v4471_v20  ;;  %4478 = vmatpush3.bf16.msra.mxu0 %v4475_v40 }
 0xf47   : > { %v4479_v25 = vpack.c.bf16 %v4753_v19, %v4752_v23  ;;  %4474 = vmatpush3.bf16.msra.mxu1 %v4471_v20  ;;  %4484 = vmatprep.subr.bf16.mxu0 %v4483_v43 }
 0xf48   : > { %v4854_v26 = vpop.eup %4853 }
 0xf49   : > { %v4856_v29 = vpop.eup %4855  ;;  %4135 = vmatmul.mubr.msk.f32.vlgmr.msra.gmra.mrb[18].mxu0 %vm1125_vm8, %v2705_v24  ;;  %4480 = vmatprep.subr.bf16.mxu1 %v4479_v25  ;;  %v2707_v30 = vmul.f32 %v4854_v26, %v4840_v8  ;;  %v3073_v8 = vld [vmem:[#allocation7 + $0xc0] sm:$0xff] }
 0xf4a   : > { %4128 = vmatmul.mubr.msk.f32.vlgmr.msra.gmra.mrb[30].mxu1 %vm1125_vm8, %v2701_v28  ;;  %v2709_v34 = vmul.f32 %v4856_v29, %v5706_v4  ;;  %4486 = vmatpush3.bf16.msra.mxu0 %v4483_v43  ;;  %v4495_v4 = vpack.c.bf16 %v3072_v45, %v3071_v50  ;;  %v4499_v53 = vpack.c.bf16 %v3074_v56, %v3073_v8  ;;  %v3213_v45 = vld [vmem:[#allocation8 + $0x100] sm:$0xff]  ;;  %v3218_v56 = vld [vmem:[#allocation8 + $0x128] sm:$0xff] }
 0xf4b   : > { %4482 = vmatpush3.bf16.msra.mxu1 %v4479_v25  ;;  %4141 = vmatprep.mubr.msk.f32.mxu1 %vm1125_vm8, %v2707_v30  ;;  %v3161_v29 = vrot.slane %v5623_v31, %v1665_v35 }
 0xf4c   : > { %4488 = vmatprep.subr.bf16.mxu0 %v4487_v49 }
 0xf4e   : > { %4142 = vmatmul.mubr.msk.f32.vlgmr.msra.gmra.mrb[32].mxu1 %vm1125_vm8, %v2709_v34  ;;  %4490 = vmatpush3.bf16.msra.mxu0 %v4487_v49 }
 0xf4f   : > { %3322 = vmatprep.mubr.f32.mxu1 %v5104_v59  ;;  %4492 = vmatprep.subr.bf16.mxu0 %v4491_v52 }
 0xf52   : > { %4494 = vmatpush3.bf16.msra.mxu0 %v4491_v52  ;;  %v3216_v52 = vld [vmem:[#allocation8 + $0x118] sm:$0xff] }
 0xf53   : > { %4496 = vmatprep.subr.bf16.mxu0 %v4495_v4  ;;  %v4515_v50 = vpack.c.bf16 %v3216_v52, %v3214_v46  ;;  %v3341_v46 = vld [vmem:[#allocation10 + $0x108] sm:$0xff]  ;;  %v3358_v52 = vld [vmem:[#allocation10 + $0x190] sm:$0xff] }
 0xf55   : > { %4516 = vmatprep.subr.bf16.mxu1 %v4515_v50  ;;  %v3359_v50 = vld [vmem:[#allocation10 + $0x198] sm:$0xff] }
 0xf56   : > { %4498 = vmatpush3.bf16.msra.mxu0 %v4495_v4  ;;  %v3215_v4 = vld [vmem:[#allocation8 + $0x110] sm:$0xff] }
 0xf57   : > { %4500 = vmatprep.subr.bf16.mxu0 %v4499_v53  ;;  %v4517_v8 = vpack.c.bf16 %v3215_v4, %v3213_v45  ;;  %v4551_v4 = vpack.c.bf16 %v3359_v50, %v3358_v52  ;;  %v3209_v52 = vrot.slane %v5623_v31, %v1713_v54  ;;  %v3354_v54 = vld [vmem:[#allocation10 + $0x170] sm:$0xff] }
 0xf59   : > { %4518 = vmatpush1.bf16.msra.mxu1 %v4517_v8  ;;  %v3342_v8 = vld [vmem:[#allocation10 + $0x110] sm:$0xff] }
 0xf5a   : > { %4502 = vmatpush3.bf16.msra.mxu0 %v4499_v53  ;;  %v3220_v53 = vld [vmem:[#allocation8 + $0x138] sm:$0xff] }
 0xf5b   : > { %4504 = vmatprep.subr.bf16.mxu0 %v4503_v60  ;;  %v4519_v57 = vpack.c.bf16 %v3220_v53, %v3218_v56  ;;  %v3343_v56 = vld [vmem:[#allocation10 + $0x118] sm:$0xff]  ;;  %v3360_v53 = vld [vmem:[#allocation10 + $0x1a0] sm:$0xff] }
 0xf5d   : > { %4520 = vmatprep.subr.bf16.mxu1 %v4519_v57  ;;  %v3361_v57 = vld [vmem:[#allocation10 + $0x1a8] sm:$0xff] }
 0xf5e   : > { %4506 = vmatpush3.bf16.msra.mxu0 %v4503_v60  ;;  %v3219_v60 = vld [vmem:[#allocation8 + $0x130] sm:$0xff] }
 0xf5f   : > { %4508 = vmatprep.subr.bf16.mxu0 %v4507_v63  ;;  %v4521_v61 = vpack.c.bf16 %v3219_v60, %v3217_v58  ;;  %v4553_v58 = vpack.c.bf16 %v3343_v56, %v3342_v8  ;;  %v4555_v60 = vpack.c.bf16 %v3361_v57, %v3360_v53 }
 0xf61   : > { %4522 = vmatpush1.bf16.msra.mxu1 %v4521_v61  ;;  %v3344_v61 = vld [vmem:[#allocation10 + $0x120] sm:$0xff] }
 0xf62   : > { %4510 = vmatpush3.bf16.msra.mxu0 %v4507_v63  ;;  %v3224_v63 = vld [vmem:[#allocation8 + $0x158] sm:$0xff] }
 0xf63   : > { %4512 = vmatprep.subr.bf16.mxu0 %v4511_v51  ;;  %v4523_v2 = vpack.c.bf16 %v3224_v63, %v3222_v62  ;;  %v3345_v62 = vld [vmem:[#allocation10 + $0x128] sm:$0xff]  ;;  %v3362_v63 = vld [vmem:[#allocation10 + $0x1b0] sm:$0xff] }
 0xf65   : > { %4524 = vmatprep.subr.bf16.mxu1 %v4523_v2  ;;  %v3363_v2 = vld [vmem:[#allocation10 + $0x1b8] sm:$0xff] }
 0xf66   : > { %4514 = vmatpush3.bf16.msra.mxu0 %v4511_v51  ;;  %v3223_v51 = vld [vmem:[#allocation8 + $0x150] sm:$0xff] }
 0xf98   : > { %v4122_v36 = vpop.f32.mrb[16].mxu0 }
 0xf99   : > { %v2782_v37 = vpop.f32.mrb[17].mxu0 }
0x101c   : > { %v4136_v5 = vpop.f32.mrb[18].mxu0 }
0x101d   : > { %v4129_v6 = vpop.f32.mrb[30].mxu1  ;;  %v2944_v41 = vpop.f32.mrb[19].mxu0 }
0x101e   : > { %v4759_v9 = vpack.i.bf16 %v4136_v5, %v2944_v41  ;;  %v2863_v10 = vpop.f32.mrb[31].mxu1  ;;  %v4525_v5 = vpack.c.bf16 %v3223_v51, %v3221_v3  ;;  %v3228_v41 = vld [vmem:[#allocation8 + $0x178] sm:$0xff]  ;;  %v4557_v3 = vpack.c.bf16 %v3345_v62, %v3344_v61  ;;  %v4559_v51 = vpack.c.bf16 %v3363_v2, %v3362_v63 }
0x101f   : > { %v4754_v1 = vpack.i.bf16 %v4129_v6, %v2863_v10  ;;  %v3226_v6 = vld [vmem:[#allocation8 + $0x168] sm:$0xff]  ;;  %v3225_v10 = vld [vmem:[#allocation8 + $0x160] sm:$0xff]  ;;  %v3371_v61 = vld [vmem:[#allocation10 + $0x1f8] sm:$0xff] }
0x1020   : > { %4760 = vrot.lane.b32.xlu0 %v4759_v9, %s5106_s2  ;;  %4526 = vmatpush1.bf16.msra.mxu1 %v4525_v5  ;;  %v4527_v9 = vpack.c.bf16 %v3228_v41, %v3226_v6  ;;  %v3346_v5 = vld [vmem:[#allocation10 + $0x130] sm:$0xff]  ;;  %v3347_v6 = vld [vmem:[#allocation10 + $0x138] sm:$0xff]  ;;  %v3364_v41 = vld [vmem:[#allocation10 + $0x1c0] sm:$0xff]  ;;  %s5021_s2 = sshll.u32 %s5109_s25, 4  ;;  %s5022_s2 = int_to_ptr.vmem [resolvable:$false] %s5021_s2 }
0x1021   : > { %4755 = vrot.lane.b32.xlu1 %v4754_v1, %s5107_s24  ;;  %v4143_v11 = vpop.f32.mrb[32].mxu1  ;;  %v3227_v1 = vld [vmem:[#allocation8 + $0x170] sm:$0xff]  ;;  %s5023_s24 = scalar_lea.vmem %s5022_s2, 512  ;;  %p5024_p2 = scmp.lt.s32.totalorder %s5791_s21, %s5022_s2 }
0x1022   : > { %v3025_v14 = vpop.f32.mrb[33].mxu1  ;;  %4528 = vmatprep.subr.bf16.mxu1 %v4527_v9  ;;  %v3365_v9 = vld [vmem:[#allocation10 + $0x1c8] sm:$0xff]  ;;  %p5025_p1 = scmp.lt.s32.totalorder %s5023_s24, %s5017_s17 }
0x1023   : > { %v4764_v7 = vpack.i.bf16 %v4143_v11, %v3025_v14  ;;  %v4529_v11 = vpack.c.bf16 %v3227_v1, %v3225_v10  ;;  %v3230_v14 = vld [vmem:[#allocation8 + $0x188] sm:$0xff]  ;;  %v4561_v10 = vpack.c.bf16 %v3347_v6, %v3346_v5  ;;  %v4563_v1 = vpack.c.bf16 %v3365_v9, %v3364_v41 }
0x1024   : > { %p5026_p13 = por %p5025_p1, %p5024_p2 }
0x1025   : > { %4765 = vrot.lane.b32.xlu1 %v4764_v7, %s5105_s26  ;;  %4530 = vmatpush1.bf16.msra.mxu1 %v4529_v11  ;;  %v3232_v7 = vld [vmem:[#allocation8 + $0x198] sm:$0xff]  ;;  %v3348_v11 = vld [vmem:[#allocation10 + $0x140] sm:$0xff]  ;;  %s3507_s26 = scalar_lea.sflag [#allocation4], %s5384_s27 }
0x1026   : > { %p5027_p9 = pnand %p5026_p13, %p5020_p12 }
0x1092   : > { %v4761_v13 = vpop.permute.xlu0 %4760 }
0x1093   : > { %v4756_v15 = vpop.permute.xlu1 %4755  ;;  %v4763_v20 = vunpack.i.h.bf16 %v4761_v13  ;;  %v4762_v21 = vunpack.i.l.bf16 %v4761_v13  ;;  %v3229_v13 = vld [vmem:[#allocation8 + $0x180] sm:$0xff] }
0x1094   : > { %v4758_v16 = vunpack.i.h.bf16 %v4756_v15  ;;  %v4757_v17 = vunpack.i.l.bf16 %v4756_v15  ;;  %v4531_v15 = vpack.c.bf16 %v3232_v7, %v3230_v14  ;;  %v3349_v14 = vld [vmem:[#allocation10 + $0x148] sm:$0xff]  ;;  %v3366_v7 = vld [vmem:[#allocation10 + $0x1d0] sm:$0xff] }
0x1096   : > { %v3059_v40 = vsel %vm770_vm4, %v4122_v36, %v4758_v16  ;;  %v3058_v18 = vsel %vm770_vm4, %v2782_v37, %v4757_v17  ;;  %v3231_v16 = vld [vmem:[#allocation8 + $0x190] sm:$0xff]  ;;  %4532 = vmatprep.subr.bf16.mxu1 %v4531_v15  ;;  %v3367_v15 = vld [vmem:[#allocation10 + $0x1d8] sm:$0xff] }
0x1097   : > { %v4766_v22 = vpop.permute.xlu1 %4765  ;;  %v3060_v24 = vsel %vm1564_vm9, %v3058_v18, %v4762_v21  ;;  %v3061_v25 = vsel %vm1564_vm9, %v3059_v40, %v4763_v20  ;;  %v4533_v17 = vpack.c.bf16 %v3231_v16, %v3229_v13  ;;  %v3234_v40 = vld [vmem:[#allocation8 + $0x1a8] sm:$0xff]  ;;  %v3236_v18 = vld [vmem:[#allocation8 + $0x1b8] sm:$0xff]  ;;  %v3233_v20 = vld [vmem:[#allocation8 + $0x1a0] sm:$0xff]  ;;  %v4565_v13 = vpack.c.bf16 %v3349_v14, %v3348_v11 }
0x1098   : > { %v4768_v19 = vunpack.i.h.bf16 %v4766_v22  ;;  %v4767_v23 = vunpack.i.l.bf16 %v4766_v22  ;;  %v4535_v21 = vpack.c.bf16 %v3236_v18, %v3234_v40  ;;  %v3235_v22 = vld [vmem:[#allocation8 + $0x1b0] sm:$0xff]  ;;  %v4567_v16 = vpack.c.bf16 %v3367_v15, %v3366_v7  ;;  %v3351_v40 = vld [vmem:[#allocation10 + $0x158] sm:$0xff]  ;;  %v3368_v18 = vld [vmem:[#allocation10 + $0x1e0] sm:$0xff] }
0x1099   : > { %4534 = vmatpush1.bf16.msra.mxu1 %v4533_v17  ;;  %v3350_v17 = vld [vmem:[#allocation10 + $0x150] sm:$0xff] }
0x109a   : > { %v3062_v26 = vsel %vm1567_vm10, %v3060_v24, %v4767_v23  ;;  %v3063_v28 = vsel %vm1567_vm10, %v3061_v25, %v4768_v19  ;;  %v3238_v19 = vld [vmem:[#allocation8 + $0x1c8] sm:$0xff]  ;;  %v3240_v23 = vld [vmem:[#allocation8 + $0x1d8] sm:$0xff]  ;;  %v4537_v24 = vpack.c.bf16 %v3235_v22, %v3233_v20  ;;  %4536 = vmatprep.subr.bf16.mxu1 %v4535_v21  ;;  %v4569_v21 = vpack.c.bf16 %v3351_v40, %v3350_v17 }
0x109b   : > { %4176 = vmatprep.mubr.f32.mxu0 %v3062_v26  ;;  %v4539_v25 = vpack.c.bf16 %v3240_v23, %v3238_v19  ;;  %v3237_v26 = vld [vmem:[#allocation8 + $0x1c0] sm:$0xff]  ;;  %v3369_v20 = vld [vmem:[#allocation10 + $0x1e8] sm:$0xff] }
0x109c   : > { %4177 = vmatmul.mubr.f32.vlgmr.msra.gmra.mrb[20].mxu0 %v3063_v28  ;;  %v3239_v28 = vld [vmem:[#allocation8 + $0x1d0] sm:$0xff]  ;;  %v4571_v22 = vpack.c.bf16 %v3369_v20, %v3368_v18  ;;  %v4874_v40 = vld [vmem:[%s5843_s8 + $0x8] sm:$0x3f] }
0x109d   : > { %4538 = vmatpush1.bf16.msra.mxu1 %v4537_v24  ;;  %v3452_v18 = vrot.slane %v4874_v40, %v1953_v27 }
0x109e   : > { %4540 = vmatprep.subr.bf16.mxu1 %v4539_v25 }
0x116f   : > { %v4178_v30 = vpop.f32.mrb[20].mxu0 }
0x1170   : > { %v3157_v34 = vadd.f32 %v4178_v30, %v5607_v47  ;;  %v3147_v36 = vpop.f32.mrb[21].mxu0  ;;  %v3244_v30 = vld [vmem:[#allocation8 + $0x1f8] sm:$0xff] }
0x1171   : > { %v3156_v37 = vadd.f32 %v3147_v36, %v5603_v42 }
0x1172   : > { %v5742_v38 = vadd.f32 %v3161_v29, %v3157_v34  ;;  %v4541_v34 = vpack.c.bf16 %v3239_v28, %v3237_v26 }
0x1173   : > { %v5744_v32 = vadd.f32 %v3161_v29, %v3156_v37  ;;  %v3242_v29 = vld [vmem:[#allocation8 + $0x1e8] sm:$0xff]  ;;  %v3241_v37 = vld [vmem:[#allocation8 + $0x1e0] sm:$0xff] }
0x1174   : > { %3166 = vadd.xlane.f32.xlu1 %v5742_v38  ;;  %v4543_v36 = vpack.c.bf16 %v3244_v30, %v3242_v29  ;;  %4542 = vmatpush1.bf16.msra.mxu1 %v4541_v34 }
0x1175   : > { %3164 = vadd.xlane.f32.xlu0 %v5744_v32 }
0x1176   : > { %4544 = vmatprep.subr.bf16.mxu1 %v4543_v36 }
0x1201   : > { %v3167_v12 = vpop.xlane.xlu1 %3166 }
0x1202   : > { %v3165_v43 = vpop.xlane.xlu0 %3164  ;;  %v3169_v48 = vmul.f32 0.0078125, %v3167_v12  ;;  %v3243_v12 = vld [vmem:[#allocation8 + $0x1f0] sm:$0xff] }
0x1203   : > { %v3168_v49 = vmul.f32 0.0078125, %v3165_v43  ;;  %v4545_v43 = vpack.c.bf16 %v3243_v12, %v3241_v37 }
0x1204   : > { %v5752_v47 = vsub.f32 %v5742_v38, %v3169_v48  ;;  %v3356_v48 = vld [vmem:[#allocation10 + $0x180] sm:$0xff] }
0x1205   : > { %v5749_v35 = vsub.f32 %v5744_v32, %v3168_v49  ;;  %4546 = vmatpush1.bf16.msra.mxu1 %v4545_v43  ;;  %v3357_v49 = vld [vmem:[#allocation10 + $0x188] sm:$0xff] }
0x1206   : > { %v3173_v0 = vmul.f32 %v5752_v47, %v5752_v47 }
0x1207   : > { %v3172_v42 = vmul.f32 %v5749_v35, %v5749_v35 }
0x1209   : > { %3174 = vadd.xlane.f32.xlu0 %v3172_v42  ;;  %v3340_v42 = vld [vmem:[#allocation10 + $0x100] sm:$0xff] }
0x120a   : > { %v4549_v45 = vpack.c.bf16 %v3341_v46, %v3340_v42 }
0x120d   : > { %3176 = vadd.xlane.f32.xlu0 %v3173_v0  ;;  %v4547_v0 = vpack.c.bf16 %v3357_v49, %v3356_v48 }
0x120f   : > { %4548 = vmatprep.subr.bf16.mxu0 %v4547_v0  ;;  %v3197_v0 = vrot.slane %v5623_v31, %v5444_v55  ;;  %v3353_v55 = vld [vmem:[#allocation10 + $0x168] sm:$0xff]  ;;  %v3355_v31 = vld [vmem:[#allocation10 + $0x178] sm:$0xff] }
0x1210   : > { %4550 = vmatpush3.bf16.msra.mxu0 %v4549_v45  ;;  %v4577_v63 = vpack.c.bf16 %v3355_v31, %v3354_v54 }
0x1211   : > { %4552 = vmatprep.subr.bf16.mxu0 %v4551_v4  ;;  %v3198_v46 = vmul.f32 %v3197_v0, %v5749_v35  ;;  %v3199_v4 = vmul.f32 %v3197_v0, %v5752_v47  ;;  %v3370_v35 = vld [vmem:[#allocation10 + $0x1f0] sm:$0xff]  ;;  %v3707_v47 = vld [vmem:[%s5842_s7 + $0x2] sm:$0x3] }
0x1212   : > { %v4575_v62 = vpack.c.bf16 %v3371_v61, %v3370_v35  ;;  %v3255_v2 = vrot.slane %v3707_v47, %v5432_v44 }
0x1214   : > { %4554 = vmatpush3.bf16.msra.mxu0 %v4553_v58  ;;  %v3352_v58 = vld [vmem:[#allocation10 + $0x160] sm:$0xff] }
0x1215   : > { %4556 = vmatprep.subr.bf16.mxu0 %v4555_v60  ;;  %v4573_v60 = vpack.c.bf16 %v3353_v55, %v3352_v58 }
0x1218   : > { %4558 = vmatpush3.bf16.msra.mxu0 %v4557_v3 }
0x1219   : > { %4560 = vmatprep.subr.bf16.mxu0 %v4559_v51 }
0x121c   : > { %4562 = vmatpush3.bf16.msra.mxu0 %v4561_v10 }
0x121d   : > { %4564 = vmatprep.subr.bf16.mxu0 %v4563_v1 }
0x1220   : > { %4566 = vmatpush3.bf16.msra.mxu0 %v4565_v13 }
0x1221   : > { %4568 = vmatprep.subr.bf16.mxu0 %v4567_v16 }
0x1224   : > { %4570 = vmatpush3.bf16.msra.mxu0 %v4569_v21 }
0x1225   : > { %4572 = vmatprep.subr.bf16.mxu0 %v4571_v22 }
0x1228   : > { %4574 = vmatpush3.bf16.msra.mxu0 %v4573_v60 }
0x1229   : > { %4576 = vmatprep.subr.bf16.mxu0 %v4575_v62 }
0x122c   : > { %4578 = vmatpush3.bf16.msra.mxu0 %v4577_v63 }
0x1296   : > { %v3175_v19 = vpop.xlane.xlu0 %3174 }
0x1297   : > { %v3178_v23 = vmul.f32 0.007874016, %v3175_v19 }
0x1299   : > { %4857 = vrsqrt.f32 %v3178_v23  ;;  %vm3182_vm3 = vcmp.eq.f32.partialorder %v3178_v23, inf  ;;  %v3185_v29 = vand.u32 2147483648, %v3178_v23  ;;  %vm3184_vm4 = vcmp.eq.f32.partialorder %v3178_v23, 0.0 }
0x129a   : > { %v3177_v24 = vpop.xlane.xlu0 %3176 }
0x129b   : > { %v3179_v25 = vmul.f32 0.007874016, %v3177_v24 }
0x129d   : > { %4859 = vrsqrt.f32 %v3179_v25  ;;  %vm3189_vm5 = vcmp.eq.f32.partialorder %v3179_v25, inf  ;;  %v3192_v43 = vand.u32 2147483648, %v3179_v25  ;;  %vm3191_vm6 = vcmp.eq.f32.partialorder %v3179_v25, 0.0 }
0x12a3   : > { %v4858_v26 = vpop.eup %4857 }
0x12a4   : > { %v3181_v28 = vmul.f32 %v4858_v26, %v3178_v23 }
0x12a6   : > { %v3183_v30 = vsel %vm3182_vm3, %v3178_v23, %v3181_v28 }
0x12a7   : > { %v4860_v34 = vpop.eup %4859  ;;  %v3186_v36 = vsel %vm3184_vm4, %v3185_v29, %v3183_v30 }
0x12a8   : > { %v3188_v37 = vmul.f32 %v4860_v34, %v3179_v25  ;;  %v3200_v12 = vadd.f32 1e-06, %v3186_v36 }
0x12aa   : > { %v3190_v48 = vsel %vm3189_vm5, %v3179_v25, %v3188_v37  ;;  %4861 = vrcp.f32 %v3200_v12 }
0x12ab   : > { %v3193_v49 = vsel %vm3191_vm6, %v3192_v43, %v3190_v48 }
0x12ac   : > { %v3201_v42 = vadd.f32 1e-06, %v3193_v49 }
0x12ae   : > { %4863 = vrcp.f32 %v3201_v42 }
0x12b4   : > { %v4862_v50 = vpop.eup %4861 }
0x12b5   : > { %v3203_v45 = vmul.f32 %v4862_v50, %v3198_v46 }
0x12b7   : > { %v3210_v8 = vadd.f32 %v3209_v52, %v3203_v45 }
0x12b8   : > { %v4864_v56 = vpop.eup %4863 }
0x12b9   : > { %3323 = vmatmul.mubr.f32.vlgmr.msra.gmra.mrb[34].mxu1 %v3210_v8  ;;  %v3205_v53 = vmul.f32 %v4864_v56, %v3199_v4  ;;  %v3455_v56 = vld [vmem:[%s5844_s9] sm:$0x3] }
0x12ba   : > { %3328 = vmatprep.mubr.f32.mxu1 %v5104_v59  ;;  %v3251_v59 = vrot.slane %v3707_v47, %v5422_v39  ;;  %v3501_v58 = vrot.slane %v3455_v56, %v5432_v44 }
0x12bb   : > { %v3211_v57 = vadd.f32 %v3209_v52, %v3205_v53 }
0x12bd   : > { %3329 = vmatmul.mubr.f32.gmra.mrb[36].mxu1 %v3211_v57  ;;  %v3489_v57 = vrot.slane %v3455_v56, %v5422_v39 }
0x138c   : > { %v3324_v3 = vpop.f32.mrb[34].mxu1 }
0x138d   : > { %v3325_v51 = vadd.f32 %v3324_v3, %v3251_v59  ;;  %v3326_v5 = vpop.f32.mrb[35].mxu1 }
0x138e   : > { %v3327_v6 = vadd.f32 %v3326_v5, %v3255_v2 }
0x138f   : > { %v3335_v10 = vmax.f32 %v3325_v51, 0.0 }
0x1390   : > { %v3336_v41 = vmax.f32 %v3327_v6, 0.0  ;;  %v3330_v9 = vpop.f32.mrb[36].mxu1 }
0x1391   : > { %v3331_v1 = vadd.f32 %v3330_v9, %v3251_v59  ;;  %v3332_v11 = vpop.f32.mrb[37].mxu1 }
0x1392   : > { %v3333_v14 = vadd.f32 %v3332_v11, %v3255_v2  ;;  %3436 = vmatprep.mubr.f32.mxu0 %v3336_v41 }
0x1393   : > { %3437 = vmatmul.mubr.f32.vlgmr.msra.gmra.mrb[22].mxu0 %v3335_v10  ;;  %v3337_v15 = vmax.f32 %v3331_v1, 0.0 }
0x1394   : > { %v3338_v7 = vmax.f32 %v3333_v14, 0.0 }
0x1396   : > { %3441 = vmatprep.mubr.f32.mxu0 %v3338_v7 }
0x1397   : > { %3442 = vmatmul.mubr.f32.gmra.mrb[24].mxu0 %v3337_v15 }
0x1466   : > { %v3921_v13 = vpop.f32.mrb[22].mxu0 }
0x1467   : > { %v3922_v16 = vpop.f32.mrb[23].mxu0 }
0x1468   : > { %v3923_v17 = vadd.f32 %v3922_v16, %v3921_v13 }
0x146a   : > { %v3447_v20 = vadd.f32 %v3923_v17, %v5744_v32  ;;  %v3924_v21 = vpop.f32.mrb[24].mxu0 }
0x146b   : > { %v3925_v22 = vpop.f32.mrb[25].mxu0 }
0x146c   : > { %v3926_v19 = vadd.f32 %v3925_v22, %v3924_v21  ;;  %v3453_v23 = vadd.f32 %v3452_v18, %v3447_v20 }
0x146e   : > { %v3448_v24 = vadd.f32 %v3926_v19, %v5742_v38  ;;  %3456 = vadd.xlane.f32.xlu0 %v3453_v23 }
0x1470   : > { %v3454_v25 = vadd.f32 %v3452_v18, %v3448_v24 }
0x1472   : > { %3458 = vadd.xlane.f32.xlu1 %v3454_v25 }
0x14fb   : > { %v3457_v26 = vpop.xlane.xlu0 %3456 }
0x14fc   : > { %v3460_v28 = vmul.f32 0.0078125, %v3457_v26 }
0x14fe   : > { %v3462_v29 = vsub.f32 %v3453_v23, %v3460_v28 }
0x14ff   : > { %v3459_v30 = vpop.xlane.xlu1 %3458 }
0x1500   : > { %v3461_v34 = vmul.f32 0.0078125, %v3459_v30  ;;  %v3464_v36 = vmul.f32 %v3462_v29, %v3462_v29  ;;  %v3490_v55 = vmul.f32 %v3489_v57, %v3462_v29 }
0x1502   : > { %v3463_v37 = vsub.f32 %v3454_v25, %v3461_v34  ;;  %3466 = vadd.xlane.f32.xlu0 %v3464_v36 }
0x1504   : > { %v3465_v33 = vmul.f32 %v3463_v37, %v3463_v37  ;;  %v3491_v61 = vmul.f32 %v3489_v57, %v3463_v37 }
0x1506   : > { %3468 = vadd.xlane.f32.xlu1 %v3465_v33 }
0x158f   : > { %v3467_v27 = vpop.xlane.xlu0 %3466 }
0x1590   : > { %v3470_v32 = vmul.f32 0.007874016, %v3467_v27 }
0x1592   : > { %4865 = vrsqrt.f32 %v3470_v32  ;;  %vm3474_vm7 = vcmp.eq.f32.partialorder %v3470_v32, inf  ;;  %v3477_v49 = vand.u32 2147483648, %v3470_v32  ;;  %vm3476_vm8 = vcmp.eq.f32.partialorder %v3470_v32, 0.0 }
0x1593   : > { %v3469_v12 = vpop.xlane.xlu1 %3468 }
0x1594   : > { %v3471_v43 = vmul.f32 0.007874016, %v3469_v12 }
0x1596   : > { %4867 = vrsqrt.f32 %v3471_v43  ;;  %vm3481_vm9 = vcmp.eq.f32.partialorder %v3471_v43, inf  ;;  %v3484_v45 = vand.u32 2147483648, %v3471_v43  ;;  %vm3483_vm10 = vcmp.eq.f32.partialorder %v3471_v43, 0.0 }
0x159c   : > { %v4866_v38 = vpop.eup %4865 }
0x159d   : > { %v3473_v48 = vmul.f32 %v4866_v38, %v3470_v32 }
0x159f   : > { %v3475_v42 = vsel %vm3474_vm7, %v3470_v32, %v3473_v48 }
0x15a0   : > { %v4868_v0 = vpop.eup %4867  ;;  %v3478_v46 = vsel %vm3476_vm8, %v3477_v49, %v3475_v42 }
0x15a1   : > { %v3492_v52 = vadd.f32 1e-06, %v3478_v46  ;;  %v3480_v50 = vmul.f32 %v4868_v0, %v3471_v43 }
0x15a3   : > { %4869 = vrcp.f32 %v3492_v52  ;;  %v3482_v4 = vsel %vm3481_vm9, %v3471_v43, %v3480_v50 }
0x15a4   : > { %v3485_v8 = vsel %vm3483_vm10, %v3484_v45, %v3482_v4 }
0x15a5   : > { %v3493_v53 = vadd.f32 1e-06, %v3485_v8 }
0x15a7   : > { %4871 = vrcp.f32 %v3493_v53 }
0x15ad   : > { %v4870_v60 = vpop.eup %4869 }
0x15ae   : > { %v3495_v35 = vmul.f32 %v4870_v60, %v3490_v55 }
0x15b0   : > { %v3502_v62 = vadd.f32 %v3501_v58, %v3495_v35 }
0x15b1   : > { %v4872_v54 = vpop.eup %4871 }
0x15b2   : > { %v3497_v31 = vmul.f32 %v4872_v54, %v3491_v61  ;;  %3504 = vst [vmem:[%s446_s19] sm:$0xff] %v3502_v62 }
0x15b4   : > { %v3503_v39 = vadd.f32 %v3501_v58, %v3497_v31 }
0x15b6   : > { %3505 = vst [vmem:[%s446_s19 + $0x8] sm:$0xff] %v3503_v39 }
0x15b7   : > { %5030 = shalt.err (!%p5027_p9)
}
0x15b8   : > { %s5031_s28 = scalar_lea.hbm %s5789_s22, 256  ;;  %s5035_s20 = scalar_lea.hbm %s5875_s18, 512 }
0x15b9   : > { %p5032_p0 = scmp.ne.s32.totalorder %s5789_s22, %s5031_s28  ;;  %p5036_p8 = scmp.lt.u32.totalorder %s5789_s22, %s5875_s18 }
0x15ba   : > { %p5037_p6 = scmp.lt.u32.totalorder %s5035_s20, %s5031_s28  ;;  %p5039_p5 = scmp.lt.u32.totalorder %s5031_s28, %s5789_s22 }
0x15bb   : > { %p5033_p11 = pnand %p5032_p0, %p5329_p10 }
0x15bc   : > { %p5038_p3 = por %p5037_p6, %p5036_p8 }
0x15bd   : > { %p5034_p4 = pneg %p5033_p11 }
0x15be   : > { %p5040_p7 = por %p5039_p5, %p5038_p3 }
0x15c0   : > { %p5041_p12 = pnand %p5040_p7, %p5034_p4 }
0x15c2   : > { %5044 = shalt.err (!%p5041_p12)
}
0x15c3   : > { %s5110_s10 = smov 128   ;;  %s5111_s17 = smov 8  }
0x15c4   : > { %4597 = dma.vmem_to_hbm [thread:$0]  (%p5329_p10), %s5791_s21, 256, %s5789_s22, %s3507_s26, %s5110_s10, %s5110_s10, %s5111_s17  }
0x15c5 PF: > { %s5876_s25 = sld [smem:[#allocation16_spill]]  ;;  %s5877_s2 = sld [smem:[#allocation17_spill]] }
0x15c6   : > { %p5879_p1 = scmp.ge.s32.totalorder %s5091_s16, 2 }
0x15cb   : > { %s3535_s24 = sand.u32 1, %s5876_s25   ;;  %p5878_p2 = scmp.ne.s32.totalorder %s5877_s2, 0 }
0x15cc   : > { %s3536_s28 = scalar_lea.sflag [#allocation4], %s3535_s24 }
0x15cd   : > { %p4617_p13 = pnand %p5879_p1, %p5878_p2 }
0x15cf   : > { %5074 = dma.done.wait (!%p4617_p13), %s3536_s28, 256  }
0x15d0   : > { %5076 = vsyncadd (!%p4617_p13), %s3536_s28, 4294967040  ;;  %p25_p9 = scmp.ge.s32.totalorder %s5319_s12, 4   ;;  %s5880_s13 = smov %s5083_s14 }
0x15d1   : > { %s5881_s14 = smov %s5087_s15  ;;  %s5882_s15 = smov %s5335_s11 }
0x15d2   : > { %s5883_s16 = smov %s5319_s12  ;;  %27 = sbr.rel (!%p25_p9) target bundleno = 10 (0xa), region = 131 }
0x15d9   :  { %3541 = vsyncpa [#allocation3], 1 }
0x15da   :  { %3543 = vsyncpa [#allocation3 + $0x1], 1 }
0x15db   :  { %3544 = vsyncpa [#allocation6], 1 }
0x15dc   :  { %3545 = vsyncpa [#allocation9], 1 }
0x15dd   :  { %3546 = vsyncpa [#allocation4], 1 }
0x15de   :  { %3548 = vsyncpa [#allocation4 + $0x1], 1 }

</bundles_post_ra>
